<compile_context>
chip_gen: v7x
topology: tpu7x:2x2x1
jax: 0.10.0
libtpu: 0.0.40
codegen_flags: <defaults>
</compile_context>

<pallas_src>
import numpy as np
import jax
import jax.numpy as jnp
from jax.experimental import pallas as pl
from jax.experimental.pallas import tpu as pltpu


# ----------------------------------------------------------------------------
# Host-side deterministic operator construction (float64, cast to f32 at end)
# ----------------------------------------------------------------------------
def _bilinear_matrix(out_size: int, in_size: int) -> np.ndarray:
    """Interpolation matrix matching F.interpolate(mode='bilinear',
    align_corners=False) along one axis: out = M @ in  (M: out_size x in_size)."""
    scale = in_size / out_size
    i = np.arange(out_size, dtype=np.float64)
    src = np.maximum((i + 0.5) * scale - 0.5, 0.0)
    i0 = np.minimum(np.floor(src).astype(np.int64), in_size - 1)
    i1 = np.minimum(i0 + 1, in_size - 1)
    frac = src - i0
    m = np.zeros((out_size, in_size), dtype=np.float64)
    np.add.at(m, (np.arange(out_size), i0), 1.0 - frac)
    np.add.at(m, (np.arange(out_size), i1), frac)
    return m


def _shifted_dft_matrices(n: int, axis: int):
    """DFT matrix exp(-2*pi*i*u*k/n) split into (re, im), with fftshift baked in
    by rolling n//2 along `axis` (axis=0: left factor rows, axis=1: right factor
    columns)."""
    k = np.arange(n)
    ang = -2.0 * np.pi * np.outer(k, k) / n
    re = np.roll(np.cos(ang), n // 2, axis=axis)
    im = np.roll(np.sin(ang), n // 2, axis=axis)
    return re, im


def _fused_operator(hi: int, wi: int, ho: int, wo: int) -> jnp.ndarray:
    """Build Kop (Hi*Wi, 4*Ho*Wo) so that for x_flat = x.reshape(Hi*Wi):
         y = x_flat @ Kop,  quadrants q = Ho*Wo columns each, ordered
         [ReRe | ImIm | ReIm | ImRe], and
         Y_re = y[:q] - y[q:2q],  Y_im = y[2q:3q] + y[3q:4q]
       equals the fftshift-ed 2D DFT of the bilinear-resized image."""
    rh = _bilinear_matrix(ho, hi)                      # (Ho, Hi)
    rw = _bilinear_matrix(wo, wi)                      # (Wo, Wi)
    are, aim = _shifted_dft_matrices(ho, axis=0)       # (Ho, Ho)
    bre, bim = _shifted_dft_matrices(wo, axis=1)       # (Wo, Wo)
    l_re, l_im = are @ rh, aim @ rh                    # (Ho, Hi)
    r_re, r_im = rw.T @ bre, rw.T @ bim                # (Wi, Wo)
    # kron(L^T, R)[i*Wi+j, h*Wo+w] = L[h,i] * R[j,w]
    kop = np.concatenate(
        [np.kron(l_re.T, r_re),   # ReRe
         np.kron(l_im.T, r_im),   # ImIm
         np.kron(l_re.T, r_im),   # ReIm
         np.kron(l_im.T, r_re)],  # ImRe
        axis=1).astype(np.float32)                     # (Hi*Wi, 4*Ho*Wo)
    return jnp.asarray(kop)


# ----------------------------------------------------------------------------
# Pallas kernel
# ----------------------------------------------------------------------------
def _make_kernel(ho: int, wo: int, apply_log: bool, normalize: bool):
    q = ho * wo  # columns per quadrant (1024 for 32x32)

    def kernel(x_ref, k_ref, o_ref):
        x = x_ref[...]                                                   # (BT, Hi*Wi)
        # Single MXU GEMM: resize + shifted 2D DFT, all four quadrants at once.
        y = jnp.dot(x, k_ref[...], preferred_element_type=jnp.float32)  # (BT, 4q)
        # Quadrant recombination on 1024-lane (8-vreg) boundaries.
        y_re = y[:, 0 * q:1 * q] - y[:, 1 * q:2 * q]
        y_im = y[:, 2 * q:3 * q] + y[:, 3 * q:4 * q]
        mag = jnp.sqrt(y_re * y_re + y_im * y_im)                        # |FFT|
        if apply_log:
            mag = jnp.log1p(mag)
        if normalize:
            # Per-image (per-row) single-pass mean / unbiased variance.
            s = jnp.sum(mag, axis=1, keepdims=True)
            sq = jnp.sum(mag * mag, axis=1, keepdims=True)
            mean = s / q
            var = jnp.maximum((sq - s * s / q) / (q - 1), 0.0)
            mag = (mag - mean) * jax.lax.rsqrt(var)
        o_ref[...] = mag

    return kernel


def _choose_batch_tile(n: int, max_tile: int = 128) -> int:
    """Multiple of 8 (sublane), <= max_tile; aim for >=2 grid steps when the
    batch is large enough so both v7x TensorCores get work."""
    if n <= 8:
        return 8
    t = min(max_tile, -(-n // 2))        # cdiv(n, 2)
    return min(((t + 7) // 8) * 8, max_tile)


# ----------------------------------------------------------------------------
# Wrappers
# ----------------------------------------------------------------------------
def simple_resize_pallas_batched(imgs, size=(32, 32), apply_log=True, normalize=False):
    """Batched SimpleResize: imgs is (N, C, H, W) or (N, H, W).  Each image uses
    the PyTorch per-image semantics (first channel only, per-image normalize).
    Returns (N, 1, Ho, Wo) float32."""
    imgs = jnp.asarray(imgs, jnp.float32)
    if imgs.ndim == 3:                       # (N, H, W) -> single channel
        imgs = imgs[:, None]
    x = imgs[:, 0, :, :]                     # first channel only (img[:1])
    n_img, hi, wi = int(x.shape[0]), int(x.shape[1]), int(x.shape[2])
    ho, wo = int(size[0]), int(size[1])
    k_in, k_out = hi * wi, ho * wo

    # Lane-dense, flattened layout: (N, Hi*Wi) in, (N, Ho*Wo) out.
    x_flat = x.reshape(n_img, k_in)
    bt = _choose_batch_tile(n_img)
    n_pad = pl.cdiv(n_img, bt) * bt
    if n_pad != n_img:
        x_flat = jnp.pad(x_flat, ((0, n_pad - n_img), (0, 0)))
    grid = (n_pad // bt,)

    kop = _fused_operator(hi, wi, ho, wo)    # (Hi*Wi, 4*Ho*Wo), resident in VMEM
    kernel = _make_kernel(ho, wo, apply_log, normalize)

    cost = pl.CostEstimate(
        flops=2 * n_pad * k_in * 4 * k_out + 8 * n_pad * k_out,
        transcendentals=2 * n_pad * k_out,   # sqrt + log1p per output element
        bytes_accessed=4 * (n_pad * k_in + k_in * 4 * k_out + n_pad * k_out),
    )

    out_flat = pl.pallas_call(
        kernel,
        out_shape=jax.ShapeDtypeStruct((n_pad, k_out), jnp.float32),
        grid=grid,
        in_specs=[
            pl.BlockSpec((bt, k_in), lambda b: (b, 0)),            # image tile
            pl.BlockSpec((k_in, 4 * k_out), lambda b: (0, 0)),     # operator, resident
        ],
        out_specs=pl.BlockSpec((bt, k_out), lambda b: (b, 0)),     # lane-dense output
        compiler_params=pltpu.CompilerParams(
            dimension_semantics=("parallel",),                     # megacore on v7x
        ),
        cost_estimate=cost,
    )(x_flat, kop)

    return out_flat[:n_img].reshape(n_img, 1, ho, wo)


def simple_resize_pallas(img, size=(32, 32), apply_log=True, normalize=False):
    """Exact equivalent of SimpleResize.forward for one image: returns (1, Ho, Wo)."""
    img = jnp.asarray(img, jnp.float32)
    if img.ndim == 2:
        img = img[None]
    elif img.ndim == 3 and img.shape[0] != 1:
        img = img[:1]
    out = simple_resize_pallas_batched(img[None], size=size,
                                       apply_log=apply_log, normalize=normalize)
    return out[0]                              # (1, Ho, Wo)


# ----------------------------------------------------------------------------
# Pure-JAX reference (same resize matrices, true FFT) for a sanity check
# ----------------------------------------------------------------------------
def _jax_reference(img, size=(32, 32), apply_log=True, normalize=False):
    img = jnp.asarray(img, jnp.float32)
    if img.ndim == 2:
        img = img[None]
    elif img.ndim == 3 and img.shape[0] != 1:
        img = img[:1]
    x = img[0]
    ho, wo = size
    rh = jnp.asarray(_bilinear_matrix(ho, x.shape[0]).astype(np.float32))
    rw = jnp.asarray(_bilinear_matrix(wo, x.shape[1]).astype(np.float32))
    resized = rh @ x @ rw.T
    mag = jnp.abs(jnp.fft.fftshift(jnp.fft.fft2(resized)))
    if apply_log:
        mag = jnp.log1p(mag)
    if normalize:
        mag = (mag - mag.mean()) / mag.std(ddof=1)
    return mag[None]


if __name__ == "__main__":
    key = jax.random.PRNGKey(0)
    # Small shapes consistent with the module: batch=2, C=4, 16x16 inputs,
    # module configured with size=(32, 32).
    imgs = jax.random.uniform(key, (2, 4, 16, 16), dtype=jnp.float32)

    # Batched path (main perf path).
    out = simple_resize_pallas_batched(imgs, size=(32, 32), apply_log=True, normalize=False)
    out = jax.block_until_ready(out)
    ref = jnp.stack([_jax_reference(imgs[i], size=(32, 32)) for i in range(imgs.shape[0])])
    np.testing.assert_allclose(np.asarray(out), np.asarray(ref), rtol=2e-3, atol=2e-3)
    assert out.shape == (2, 1, 32, 32) and out.dtype == jnp.float32

    # Normalize branch (per-image, unbiased std) sanity check.
    out_n = jax.block_until_ready(
        simple_resize_pallas_batched(imgs, size=(32, 32), apply_log=True, normalize=True))
    ref_n = jnp.stack([_jax_reference(imgs[i], size=(32, 32), normalize=True)
                       for i in range(imgs.shape[0])])
    np.testing.assert_allclose(np.asarray(out_n), np.asarray(ref_n), rtol=2e-3, atol=2e-3)

    # Single-image path matches the PyTorch forward signature exactly.
    single = jax.block_until_ready(simple_resize_pallas(imgs[0], size=(32, 32)))
    assert single.shape == (1, 32, 32)
    np.testing.assert_allclose(np.asarray(single),
                               np.asarray(_jax_reference(imgs[0], size=(32, 32))),
                               rtol=2e-3, atol=2e-3)

    # Larger batch exercises the multi-step "parallel" grid (>=2 steps).
    big = jax.random.uniform(jax.random.PRNGKey(1), (37, 1, 16, 16), dtype=jnp.float32)
    out_big = jax.block_until_ready(simple_resize_pallas_batched(big, size=(32, 32)))
    ref_big = jnp.stack([_jax_reference(big[i], size=(32, 32)) for i in range(big.shape[0])])
    np.testing.assert_allclose(np.asarray(out_big), np.asarray(ref_big), rtol=2e-3, atol=2e-3)

    print("KERNEL_OK")
</pallas_src>

<mosaic_0001>
module attributes {stable_mosaic.version = 11 : i64} {
  func.func @kernel(%arg0: i32, %arg1: memref<8x256xf32, #tpu.memory_space<vmem>>, %arg2: memref<256x4096xf32, #tpu.memory_space<vmem>>, %arg3: memref<8x1024xf32, #tpu.memory_space<vmem>>) attributes {dimension_semantics = [#tpu.dimension_semantics<parallel>], iteration_bounds = array<i64: 1>, scalar_prefetch = 0 : i64, scratch_operands = 0 : i64, tpu.core_type = #tpu.core_type<tc>, window_params = [{transform_indices = @transform_0, window_bounds = array<i64: 8, 256>}, {pipeline_mode = #tpu.pipeline_mode<synchronous>, transform_indices = @transform_1, window_bounds = array<i64: 256, 4096>}, {transform_indices = @transform_2, window_bounds = array<i64: 8, 1024>}]} {
    %c0 = arith.constant 0 : index
    %c0_0 = arith.constant 0 : index
    %0 = vector.load %arg1[%c0, %c0_0] : memref<8x256xf32, #tpu.memory_space<vmem>>, vector<8x256xf32>
    %c0_1 = arith.constant 0 : index
    %c0_2 = arith.constant 0 : index
    %1 = vector.load %arg2[%c0_1, %c0_2] : memref<256x4096xf32, #tpu.memory_space<vmem>>, vector<256x4096xf32>
    %cst = arith.constant dense<0.000000e+00> : vector<8x4096xf32>
    %2 = tpu.matmul %0, %1, %cst {dimension_numbers = #tpu.dot_dimension_numbers<[1], [0], [0], [1], [0, 0, 1, 1], [], []>} : vector<8x256xf32>, vector<256x4096xf32>, vector<8x4096xf32> -> vector<8x4096xf32>
    %3 = vector.extract_strided_slice %2 {offsets = [0, 0], sizes = [8, 1024], strides = [1, 1]} : vector<8x4096xf32> to vector<8x1024xf32>
    %4 = vector.extract_strided_slice %2 {offsets = [0, 1024], sizes = [8, 1024], strides = [1, 1]} : vector<8x4096xf32> to vector<8x1024xf32>
    %5 = arith.subf %3, %4 : vector<8x1024xf32>
    %6 = vector.extract_strided_slice %2 {offsets = [0, 2048], sizes = [8, 1024], strides = [1, 1]} : vector<8x4096xf32> to vector<8x1024xf32>
    %7 = vector.extract_strided_slice %2 {offsets = [0, 3072], sizes = [8, 1024], strides = [1, 1]} : vector<8x4096xf32> to vector<8x1024xf32>
    %8 = arith.addf %6, %7 : vector<8x1024xf32>
    %9 = arith.mulf %5, %5 : vector<8x1024xf32>
    %10 = arith.mulf %8, %8 : vector<8x1024xf32>
    %11 = arith.addf %9, %10 : vector<8x1024xf32>
    %12 = math.sqrt %11 : vector<8x1024xf32>
    %13 = math.log1p %12 : vector<8x1024xf32>
    %c0_3 = arith.constant 0 : index
    %c0_4 = arith.constant 0 : index
    %14 = vector.load %arg3[%c0_3, %c0_4] : memref<8x1024xf32, #tpu.memory_space<vmem>>, vector<8x1024xf32>
    tpu.vector_store %arg3[%c0_3, %c0_4], %13 {strides = array<i32>} : memref<8x1024xf32, #tpu.memory_space<vmem>>, vector<8x1024xf32>,
    return
  }
  func.func @transform_0(%arg0: i32) -> (i32, i32) {
    %c0_i32 = arith.constant 0 : i32
    %c0_i32_0 = arith.constant 0 : i32
    return %arg0, %c0_i32 : i32, i32
  }
  func.func @transform_1(%arg0: i32) -> (i32, i32) {
    %c0_i32 = arith.constant 0 : i32
    %c0_i32_0 = arith.constant 0 : i32
    %c0_i32_1 = arith.constant 0 : i32
    return %c0_i32, %c0_i32_0 : i32, i32
  }
  func.func @transform_2(%arg0: i32) -> (i32, i32) {
    %c0_i32 = arith.constant 0 : i32
    %c0_i32_0 = arith.constant 0 : i32
    return %arg0, %c0_i32 : i32, i32
  }
}

</mosaic_0001>

<bundles_post_ra>
// kernel: tpu_custom_call.1
= control target key start
LH: loop header
LB: loop body
LE: loop exit
PB: predicated region body
PF: predicated region fallthrough
CT: control target
= control target key end

     0   :  { %7 = vsyncpa [#allocation3], 0  ;;  %s3702_s0 = inlined_call_operand.hbm [shape: f32[8,256], index: 0, kind: input, shape index: {}]   ;;  %s3703_s1 = inlined_call_operand.hbm [shape: f32[256,4096], index: 1, kind: input, shape index: {}]   ;;  %s3704_s2 = inlined_call_operand.hbm [shape: f32[8,1024], index: 2, kind: output, shape index: {}]  }
   0x1   :  { %8 = vsyncpa [#allocation6], 0 }
   0x2   :  { %9 = vsyncpa [#allocation4], 0  ;;  %s3539_s9 = smov [#allocation2]   ;;  %s3540_s11 = smov [#allocation5]  }
   0x3   :  { %s16_s10 = sshll.u32 %s3539_s9, 4  ;;  %s25_s12 = sshll.u32 %s3540_s11, 4  ;;  %s17_s10 = int_to_ptr.vmem [resolvable:$true] %s16_s10  ;;  %s3559_s12 = int_to_ptr.vmem [resolvable:$true] %s25_s12 }
   0x4   :  { %s3467_s15 = scalar_lea.hbm %s3702_s0, 256 }
   0x5   :  { %p3468_p0 = scmp.ne.s32.totalorder %s3702_s0, %s3467_s15  ;;  %p3471_p1 = scmp.lt.u32.totalorder %s3467_s15, %s3702_s0 }
   0x7   :  { %p3473_p2 = pnand %p3471_p1, %p3468_p0 }
   0x9   :  { %3476 = shalt.err (!%p3473_p2)
}
   0xa   :  { %s3477_s20 = scalar_lea.vmem %s17_s10, 256  ;;  %p3482_p4 = scmp.lt.s32.totalorder %s17_s10, %s17_s10 }
   0xb   :  { %p3478_p3 = scmp.ne.s32.totalorder %s17_s10, %s3477_s20  ;;  %p3483_p5 = scmp.lt.s32.totalorder %s3477_s20, %s3477_s20 }
   0xd   :  { %p3484_p6 = por %p3483_p5, %p3482_p4 }
   0xf   :  { %p3485_p7 = pnand %p3484_p6, %p3478_p3 }
  0x11   :  { %3488 = shalt.err (!%p3485_p7)
}
  0x12   :  { %19 = dma.hbm_to_vmem [thread:$0]  %s3702_s0, 256, %s17_s10, [#allocation3]  }
  0x13   :  { %s3489_s25 = scalar_lea.hbm %s3703_s1, 131072 }
  0x14   :  { %p3490_p8 = scmp.ne.s32.totalorder %s3703_s1, %s3489_s25  ;;  %p3493_p9 = scmp.lt.u32.totalorder %s3489_s25, %s3703_s1 }
  0x16   :  { %p3495_p10 = pnand %p3493_p9, %p3490_p8 }
  0x18   :  { %3498 = shalt.err (!%p3495_p10)
}
  0x19   :  { %s3499_s30 = scalar_lea.vmem %s3559_s12, 131072  ;;  %p3504_p12 = scmp.lt.s32.totalorder %s3559_s12, %s3559_s12 }
  0x1a   :  { %p3500_p11 = scmp.ne.s32.totalorder %s3559_s12, %s3499_s30  ;;  %p3505_p13 = scmp.lt.s32.totalorder %s3499_s30, %s3499_s30 }
  0x1c   :  { %p3506_p0 = por %p3505_p13, %p3504_p12 }
  0x1e   :  { %p3507_p1 = pnand %p3506_p0, %p3500_p11 }
  0x20   :  { %3510 = shalt.err (!%p3507_p1)
}
  0x21   :  { %s3541_s0 = smov 4096   ;;  %s3542_s3 = smov 256  }
  0x22   :  { %31 = dma.hbm_to_vmem [thread:$0]  %s3703_s1, 131072, %s3559_s12, [#allocation6], %s3541_s0, %s3541_s0, %s3542_s3  }
  0x23   :  { %3533 = dma.done.wait [#allocation3], 256  }
  0x24   :  { %3534 = vsyncadd [#allocation3], 4294967040 }
  0x25   :  { %3535 = dma.done.wait [#allocation6], 131072  }
  0x26   :  { %3536 = vsyncadd [#allocation6], 4294836224  ;;  %v41_v0 = vld [vmem:[#allocation5 + $0x8] sm:$0xff]  ;;  %v43_v2 = vld [vmem:[#allocation5 + $0x18] sm:$0xff]  ;;  %s3543_s1 = smov [#allocation7]  }
  0x27   :  { %v73_v1 = vld [vmem:[#allocation5 + $0x108] sm:$0xff]  ;;  %v75_v4 = vld [vmem:[#allocation5 + $0x118] sm:$0xff]  ;;  %v40_v5 = vld [vmem:[#allocation5] sm:$0xff]  ;;  %s2382_s6 = sshll.u32 %s3543_s1, 4  ;;  %s2383_s6 = int_to_ptr.vmem [resolvable:$true] %s2382_s6 }
  0x28   :  { %v2392_v3 = vpack.c.bf16 %v73_v1, %v41_v0  ;;  %v72_v6 = vld [vmem:[#allocation5 + $0x100] sm:$0xff]  ;;  %v2456_v7 = vpack.c.bf16 %v75_v4, %v43_v2  ;;  %v42_v9 = vld [vmem:[#allocation5 + $0x10] sm:$0xff]  ;;  %v105_v11 = vld [vmem:[#allocation5 + $0x208] sm:$0xff]  ;;  %s3511_s7 = scalar_lea.vmem %s2383_s6, 1024  ;;  %p3516_p3 = scmp.lt.s32.totalorder %s2383_s6, %s2383_s6 }
  0x29   :  { %v2394_v8 = vpack.c.bf16 %v72_v6, %v40_v5  ;;  %v74_v10 = vld [vmem:[#allocation5 + $0x110] sm:$0xff]  ;;  %v137_v13 = vld [vmem:[#allocation5 + $0x308] sm:$0xff]  ;;  %v107_v14 = vld [vmem:[#allocation5 + $0x218] sm:$0xff]  ;;  %p3512_p2 = scmp.ne.s32.totalorder %s2383_s6, %s3511_s7  ;;  %p3517_p4 = scmp.lt.s32.totalorder %s3511_s7, %s3511_s7 }
  0x2a   :  { %2393 = vmatprep.subr.bf16.mxu0 %v2392_v3  ;;  %v2458_v12 = vpack.c.bf16 %v74_v10, %v42_v9  ;;  %v139_v15 = vld [vmem:[#allocation5 + $0x318] sm:$0xff]  ;;  %2457 = vmatprep.subr.bf16.mxu1 %v2456_v7  ;;  %v2396_v16 = vpack.c.bf16 %v137_v13, %v105_v11  ;;  %v104_v18 = vld [vmem:[#allocation5 + $0x200] sm:$0xff]  ;;  %v106_v20 = vld [vmem:[#allocation5 + $0x210] sm:$0xff] }
  0x2b   :  { %2395 = vmatpush1.bf16.msra.mxu0 %v2394_v8  ;;  %v2460_v17 = vpack.c.bf16 %v139_v15, %v107_v14  ;;  %v136_v19 = vld [vmem:[#allocation5 + $0x300] sm:$0xff]  ;;  %v138_v22 = vld [vmem:[#allocation5 + $0x310] sm:$0xff]  ;;  %v169_v23 = vld [vmem:[#allocation5 + $0x408] sm:$0xff]  ;;  %p3518_p5 = por %p3517_p4, %p3516_p3 }
  0x2c   :  { %2459 = vmatpush1.bf16.msra.mxu1 %v2458_v12  ;;  %v2398_v21 = vpack.c.bf16 %v136_v19, %v104_v18  ;;  %v201_v24 = vld [vmem:[#allocation5 + $0x508] sm:$0xff]  ;;  %2397 = vmatprep.subr.bf16.mxu0 %v2396_v16  ;;  %v2462_v25 = vpack.c.bf16 %v138_v22, %v106_v20  ;;  %v171_v27 = vld [vmem:[#allocation5 + $0x418] sm:$0xff]  ;;  %v168_v29 = vld [vmem:[#allocation5 + $0x400] sm:$0xff] }
  0x2d   :  { %2461 = vmatprep.subr.bf16.mxu1 %v2460_v17  ;;  %v2400_v26 = vpack.c.bf16 %v201_v24, %v169_v23  ;;  %v203_v28 = vld [vmem:[#allocation5 + $0x518] sm:$0xff]  ;;  %v200_v31 = vld [vmem:[#allocation5 + $0x500] sm:$0xff]  ;;  %v170_v32 = vld [vmem:[#allocation5 + $0x410] sm:$0xff]  ;;  %p3519_p6 = pnand %p3518_p5, %p3512_p2 }
  0x2e   :  { %v2464_v30 = vpack.c.bf16 %v203_v28, %v171_v27  ;;  %v202_v33 = vld [vmem:[#allocation5 + $0x510] sm:$0xff]  ;;  %v2402_v34 = vpack.c.bf16 %v200_v31, %v168_v29  ;;  %v233_v35 = vld [vmem:[#allocation5 + $0x608] sm:$0xff]  ;;  %v235_v37 = vld [vmem:[#allocation5 + $0x618] sm:$0xff] }
  0x2f   :  { %2399 = vmatpush1.bf16.msra.mxu0 %v2398_v21  ;;  %v265_v36 = vld [vmem:[#allocation5 + $0x708] sm:$0xff]  ;;  %v2466_v38 = vpack.c.bf16 %v202_v33, %v170_v32  ;;  %v267_v40 = vld [vmem:[#allocation5 + $0x718] sm:$0xff]  ;;  %v232_v41 = vld [vmem:[#allocation5 + $0x600] sm:$0xff] }
  0x30   :  { %2463 = vmatpush1.bf16.msra.mxu1 %v2462_v25  ;;  %2401 = vmatprep.subr.bf16.mxu0 %v2400_v26  ;;  %v2404_v39 = vpack.c.bf16 %v265_v36, %v233_v35  ;;  %v264_v42 = vld [vmem:[#allocation5 + $0x700] sm:$0xff]  ;;  %v2468_v43 = vpack.c.bf16 %v267_v40, %v235_v37  ;;  %v234_v44 = vld [vmem:[#allocation5 + $0x610] sm:$0xff]  ;;  %v297_v46 = vld [vmem:[#allocation5 + $0x808] sm:$0xff] }
  0x31   :  { %2465 = vmatprep.subr.bf16.mxu1 %v2464_v30  ;;  %v266_v45 = vld [vmem:[#allocation5 + $0x710] sm:$0xff]  ;;  %v329_v47 = vld [vmem:[#allocation5 + $0x908] sm:$0xff]  ;;  %v299_v48 = vld [vmem:[#allocation5 + $0x818] sm:$0xff]  ;;  %v2406_v50 = vpack.c.bf16 %v264_v42, %v232_v41 }
  0x32   :  { %v331_v49 = vld [vmem:[#allocation5 + $0x918] sm:$0xff]  ;;  %v2470_v51 = vpack.c.bf16 %v266_v45, %v234_v44  ;;  %v2408_v52 = vpack.c.bf16 %v329_v47, %v297_v46  ;;  %v296_v53 = vld [vmem:[#allocation5 + $0x800] sm:$0xff]  ;;  %v298_v55 = vld [vmem:[#allocation5 + $0x810] sm:$0xff] }
  0x33   :  { %2403 = vmatpush1.bf16.msra.mxu0 %v2402_v34  ;;  %v328_v54 = vld [vmem:[#allocation5 + $0x900] sm:$0xff]  ;;  %v2472_v56 = vpack.c.bf16 %v331_v49, %v299_v48  ;;  %v330_v57 = vld [vmem:[#allocation5 + $0x910] sm:$0xff]  ;;  %v361_v58 = vld [vmem:[#allocation5 + $0xa08] sm:$0xff] }
  0x34   :  { %2467 = vmatpush1.bf16.msra.mxu1 %v2466_v38  ;;  %2405 = vmatprep.subr.bf16.mxu0 %v2404_v39  ;;  %v393_v59 = vld [vmem:[#allocation5 + $0xb08] sm:$0xff]  ;;  %v363_v60 = vld [vmem:[#allocation5 + $0xa18] sm:$0xff]  ;;  %v2410_v62 = vpack.c.bf16 %v328_v54, %v296_v53  ;;  %v2474_v63 = vpack.c.bf16 %v330_v57, %v298_v55  ;;  %v360_v1 = vld [vmem:[#allocation5 + $0xa00] sm:$0xff] }
  0x35   :  { %2469 = vmatprep.subr.bf16.mxu1 %v2468_v43  ;;  %v395_v61 = vld [vmem:[#allocation5 + $0xb18] sm:$0xff]  ;;  %v2412_v0 = vpack.c.bf16 %v393_v59, %v361_v58  ;;  %v392_v2 = vld [vmem:[#allocation5 + $0xb00] sm:$0xff]  ;;  %v362_v3 = vld [vmem:[#allocation5 + $0xa10] sm:$0xff] }
  0x36   :  { %v2476_v4 = vpack.c.bf16 %v395_v61, %v363_v60  ;;  %v394_v5 = vld [vmem:[#allocation5 + $0xb10] sm:$0xff]  ;;  %v425_v6 = vld [vmem:[#allocation5 + $0xc08] sm:$0xff]  ;;  %v427_v8 = vld [vmem:[#allocation5 + $0xc18] sm:$0xff]  ;;  %v2414_v10 = vpack.c.bf16 %v392_v2, %v360_v1 }
  0x37   :  { %2407 = vmatpush1.bf16.msra.mxu0 %v2406_v50  ;;  %v457_v7 = vld [vmem:[#allocation5 + $0xd08] sm:$0xff]  ;;  %v459_v9 = vld [vmem:[#allocation5 + $0xd18] sm:$0xff]  ;;  %v2478_v11 = vpack.c.bf16 %v394_v5, %v362_v3  ;;  %v424_v13 = vld [vmem:[#allocation5 + $0xc00] sm:$0xff] }
  0x38   :  { %2471 = vmatpush1.bf16.msra.mxu1 %v2470_v51  ;;  %2409 = vmatprep.subr.bf16.mxu0 %v2408_v52  ;;  %v2416_v12 = vpack.c.bf16 %v457_v7, %v425_v6  ;;  %v456_v14 = vld [vmem:[#allocation5 + $0xd00] sm:$0xff]  ;;  %v426_v15 = vld [vmem:[#allocation5 + $0xc10] sm:$0xff]  ;;  %v2480_v16 = vpack.c.bf16 %v459_v9, %v427_v8  ;;  %v489_v18 = vld [vmem:[#allocation5 + $0xe08] sm:$0xff] }
  0x39   :  { %2473 = vmatprep.subr.bf16.mxu1 %v2472_v56  ;;  %v458_v17 = vld [vmem:[#allocation5 + $0xd10] sm:$0xff]  ;;  %v521_v19 = vld [vmem:[#allocation5 + $0xf08] sm:$0xff]  ;;  %v491_v20 = vld [vmem:[#allocation5 + $0xe18] sm:$0xff]  ;;  %v2418_v22 = vpack.c.bf16 %v456_v14, %v424_v13 }
  0x3a   :  { %v523_v21 = vld [vmem:[#allocation5 + $0xf18] sm:$0xff]  ;;  %v2482_v23 = vpack.c.bf16 %v458_v17, %v426_v15  ;;  %v2420_v24 = vpack.c.bf16 %v521_v19, %v489_v18  ;;  %v488_v25 = vld [vmem:[#allocation5 + $0xe00] sm:$0xff]  ;;  %v490_v27 = vld [vmem:[#allocation5 + $0xe10] sm:$0xff] }
  0x3b   :  { %2411 = vmatpush1.bf16.msra.mxu0 %v2410_v62  ;;  %v520_v26 = vld [vmem:[#allocation5 + $0xf00] sm:$0xff]  ;;  %v2484_v28 = vpack.c.bf16 %v523_v21, %v491_v20  ;;  %v522_v29 = vld [vmem:[#allocation5 + $0xf10] sm:$0xff]  ;;  %v553_v30 = vld [vmem:[#allocation5 + $0x1008] sm:$0xff] }
  0x3c   :  { %2475 = vmatpush1.bf16.msra.mxu1 %v2474_v63  ;;  %2413 = vmatprep.subr.bf16.mxu0 %v2412_v0  ;;  %v585_v31 = vld [vmem:[#allocation5 + $0x1108] sm:$0xff]  ;;  %v555_v32 = vld [vmem:[#allocation5 + $0x1018] sm:$0xff]  ;;  %v2422_v34 = vpack.c.bf16 %v520_v26, %v488_v25  ;;  %v2486_v35 = vpack.c.bf16 %v522_v29, %v490_v27  ;;  %v552_v37 = vld [vmem:[#allocation5 + $0x1000] sm:$0xff] }
  0x3d   :  { %2477 = vmatprep.subr.bf16.mxu1 %v2476_v4  ;;  %v587_v33 = vld [vmem:[#allocation5 + $0x1118] sm:$0xff]  ;;  %v2424_v36 = vpack.c.bf16 %v585_v31, %v553_v30  ;;  %v584_v38 = vld [vmem:[#allocation5 + $0x1100] sm:$0xff]  ;;  %v554_v39 = vld [vmem:[#allocation5 + $0x1010] sm:$0xff] }
  0x3e   :  { %v2488_v40 = vpack.c.bf16 %v587_v33, %v555_v32  ;;  %v586_v41 = vld [vmem:[#allocation5 + $0x1110] sm:$0xff]  ;;  %v617_v42 = vld [vmem:[#allocation5 + $0x1208] sm:$0xff]  ;;  %v619_v44 = vld [vmem:[#allocation5 + $0x1218] sm:$0xff]  ;;  %v2426_v46 = vpack.c.bf16 %v584_v38, %v552_v37 }
  0x3f   :  { %2415 = vmatpush1.bf16.msra.mxu0 %v2414_v10  ;;  %v649_v43 = vld [vmem:[#allocation5 + $0x1308] sm:$0xff]  ;;  %v651_v45 = vld [vmem:[#allocation5 + $0x1318] sm:$0xff]  ;;  %v2490_v47 = vpack.c.bf16 %v586_v41, %v554_v39  ;;  %v616_v49 = vld [vmem:[#allocation5 + $0x1200] sm:$0xff] }
  0x40   :  { %2479 = vmatpush1.bf16.msra.mxu1 %v2478_v11  ;;  %2417 = vmatprep.subr.bf16.mxu0 %v2416_v12  ;;  %v2428_v48 = vpack.c.bf16 %v649_v43, %v617_v42  ;;  %v648_v50 = vld [vmem:[#allocation5 + $0x1300] sm:$0xff]  ;;  %v618_v51 = vld [vmem:[#allocation5 + $0x1210] sm:$0xff]  ;;  %v2492_v52 = vpack.c.bf16 %v651_v45, %v619_v44  ;;  %v681_v54 = vld [vmem:[#allocation5 + $0x1408] sm:$0xff] }
  0x41   :  { %2481 = vmatprep.subr.bf16.mxu1 %v2480_v16  ;;  %v650_v53 = vld [vmem:[#allocation5 + $0x1310] sm:$0xff]  ;;  %v713_v55 = vld [vmem:[#allocation5 + $0x1508] sm:$0xff]  ;;  %v683_v56 = vld [vmem:[#allocation5 + $0x1418] sm:$0xff]  ;;  %v2430_v58 = vpack.c.bf16 %v648_v50, %v616_v49 }
  0x42   :  { %v715_v57 = vld [vmem:[#allocation5 + $0x1518] sm:$0xff]  ;;  %v2494_v59 = vpack.c.bf16 %v650_v53, %v618_v51  ;;  %v2432_v60 = vpack.c.bf16 %v713_v55, %v681_v54  ;;  %v680_v61 = vld [vmem:[#allocation5 + $0x1400] sm:$0xff]  ;;  %v682_v63 = vld [vmem:[#allocation5 + $0x1410] sm:$0xff] }
  0x43   :  { %2419 = vmatpush1.bf16.msra.mxu0 %v2418_v22  ;;  %v712_v62 = vld [vmem:[#allocation5 + $0x1500] sm:$0xff]  ;;  %v2496_v0 = vpack.c.bf16 %v715_v57, %v683_v56  ;;  %v714_v1 = vld [vmem:[#allocation5 + $0x1510] sm:$0xff]  ;;  %v745_v2 = vld [vmem:[#allocation5 + $0x1608] sm:$0xff] }
  0x44   :  { %2483 = vmatpush1.bf16.msra.mxu1 %v2482_v23  ;;  %2421 = vmatprep.subr.bf16.mxu0 %v2420_v24  ;;  %v777_v3 = vld [vmem:[#allocation5 + $0x1708] sm:$0xff]  ;;  %v747_v4 = vld [vmem:[#allocation5 + $0x1618] sm:$0xff]  ;;  %v2434_v6 = vpack.c.bf16 %v712_v62, %v680_v61  ;;  %v744_v7 = vld [vmem:[#allocation5 + $0x1600] sm:$0xff]  ;;  %v2498_v8 = vpack.c.bf16 %v714_v1, %v682_v63 }
  0x45   :  { %2485 = vmatprep.subr.bf16.mxu1 %v2484_v28  ;;  %v779_v5 = vld [vmem:[#allocation5 + $0x1718] sm:$0xff]  ;;  %v2436_v9 = vpack.c.bf16 %v777_v3, %v745_v2  ;;  %v776_v10 = vld [vmem:[#allocation5 + $0x1700] sm:$0xff]  ;;  %v746_v11 = vld [vmem:[#allocation5 + $0x1610] sm:$0xff] }
  0x46   :  { %v778_v12 = vld [vmem:[#allocation5 + $0x1710] sm:$0xff]  ;;  %v2500_v13 = vpack.c.bf16 %v779_v5, %v747_v4  ;;  %v809_v14 = vld [vmem:[#allocation5 + $0x1808] sm:$0xff]  ;;  %v3590_v16 = vld [vmem:[#allocation2 + $0x8] sm:$0xff]  ;;  %v2438_v19 = vpack.c.bf16 %v776_v10, %v744_v7 }
  0x47   :  { %2423 = vmatpush1.bf16.msra.mxu0 %v2422_v34  ;;  %v841_v15 = vld [vmem:[#allocation5 + $0x1908] sm:$0xff]  ;;  %v811_v17 = vld [vmem:[#allocation5 + $0x1818] sm:$0xff]  ;;  %1128 = vmatprep.mubr.f32.mxu0 %v3590_v16  ;;  %v2502_v20 = vpack.c.bf16 %v778_v12, %v746_v11  ;;  %v808_v22 = vld [vmem:[#allocation5 + $0x1800] sm:$0xff] }
  0x48   :  { %2487 = vmatpush1.bf16.msra.mxu1 %v2486_v35  ;;  %2425 = vmatprep.subr.bf16.mxu0 %v2424_v36  ;;  %v843_v18 = vld [vmem:[#allocation5 + $0x1918] sm:$0xff]  ;;  %v2440_v21 = vpack.c.bf16 %v841_v15, %v809_v14  ;;  %v840_v23 = vld [vmem:[#allocation5 + $0x1900] sm:$0xff]  ;;  %v810_v24 = vld [vmem:[#allocation5 + $0x1810] sm:$0xff] }
  0x49   :  { %2489 = vmatprep.subr.bf16.mxu1 %v2488_v40  ;;  %1199 = vmatprep.mubr.f32.mxu1 %v3590_v16  ;;  %v2504_v25 = vpack.c.bf16 %v843_v18, %v811_v17  ;;  %v842_v26 = vld [vmem:[#allocation5 + $0x1910] sm:$0xff]  ;;  %v873_v27 = vld [vmem:[#allocation5 + $0x1a08] sm:$0xff]  ;;  %v875_v29 = vld [vmem:[#allocation5 + $0x1a18] sm:$0xff]  ;;  %v2442_v31 = vpack.c.bf16 %v840_v23, %v808_v22 }
  0x4a   :  { %v905_v28 = vld [vmem:[#allocation5 + $0x1b08] sm:$0xff]  ;;  %v907_v30 = vld [vmem:[#allocation5 + $0x1b18] sm:$0xff]  ;;  %v2506_v32 = vpack.c.bf16 %v842_v26, %v810_v24  ;;  %v872_v34 = vld [vmem:[#allocation5 + $0x1a00] sm:$0xff] }
  0x4b   :  { %2427 = vmatpush1.bf16.msra.mxu0 %v2426_v46  ;;  %v2444_v33 = vpack.c.bf16 %v905_v28, %v873_v27  ;;  %v904_v35 = vld [vmem:[#allocation5 + $0x1b00] sm:$0xff]  ;;  %v874_v36 = vld [vmem:[#allocation5 + $0x1a10] sm:$0xff]  ;;  %v2508_v37 = vpack.c.bf16 %v907_v30, %v875_v29  ;;  %v937_v39 = vld [vmem:[#allocation5 + $0x1c08] sm:$0xff] }
  0x4c   :  { %2491 = vmatpush1.bf16.msra.mxu1 %v2490_v47  ;;  %2429 = vmatprep.subr.bf16.mxu0 %v2428_v48  ;;  %v906_v38 = vld [vmem:[#allocation5 + $0x1b10] sm:$0xff]  ;;  %v969_v40 = vld [vmem:[#allocation5 + $0x1d08] sm:$0xff]  ;;  %v939_v41 = vld [vmem:[#allocation5 + $0x1c18] sm:$0xff]  ;;  %v2446_v43 = vpack.c.bf16 %v904_v35, %v872_v34 }
  0x4d   :  { %2493 = vmatprep.subr.bf16.mxu1 %v2492_v52  ;;  %v971_v42 = vld [vmem:[#allocation5 + $0x1d18] sm:$0xff]  ;;  %v2510_v44 = vpack.c.bf16 %v906_v38, %v874_v36  ;;  %v2448_v45 = vpack.c.bf16 %v969_v40, %v937_v39  ;;  %v936_v46 = vld [vmem:[#allocation5 + $0x1c00] sm:$0xff]  ;;  %v938_v48 = vld [vmem:[#allocation5 + $0x1c10] sm:$0xff] }
  0x4e   :  { %v968_v47 = vld [vmem:[#allocation5 + $0x1d00] sm:$0xff]  ;;  %v2512_v49 = vpack.c.bf16 %v971_v42, %v939_v41  ;;  %v970_v50 = vld [vmem:[#allocation5 + $0x1d10] sm:$0xff]  ;;  %v1001_v51 = vld [vmem:[#allocation5 + $0x1e08] sm:$0xff] }
  0x4f   :  { %2431 = vmatpush1.bf16.msra.mxu0 %v2430_v58  ;;  %v1033_v52 = vld [vmem:[#allocation5 + $0x1f08] sm:$0xff]  ;;  %v1003_v53 = vld [vmem:[#allocation5 + $0x1e18] sm:$0xff]  ;;  %v2450_v55 = vpack.c.bf16 %v968_v47, %v936_v46  ;;  %v2514_v56 = vpack.c.bf16 %v970_v50, %v938_v48  ;;  %v1000_v58 = vld [vmem:[#allocation5 + $0x1e00] sm:$0xff] }
  0x50   :  { %2495 = vmatpush1.bf16.msra.mxu1 %v2494_v59  ;;  %2433 = vmatprep.subr.bf16.mxu0 %v2432_v60  ;;  %v1035_v54 = vld [vmem:[#allocation5 + $0x1f18] sm:$0xff]  ;;  %v2452_v57 = vpack.c.bf16 %v1033_v52, %v1001_v51  ;;  %v1032_v59 = vld [vmem:[#allocation5 + $0x1f00] sm:$0xff]  ;;  %v1002_v60 = vld [vmem:[#allocation5 + $0x1e10] sm:$0xff] }
  0x51   :  { %2497 = vmatprep.subr.bf16.mxu1 %v2496_v0  ;;  %v2516_v61 = vpack.c.bf16 %v1035_v54, %v1003_v53  ;;  %v1034_v62 = vld [vmem:[#allocation5 + $0x1f10] sm:$0xff]  ;;  %v45_v63 = vld [vmem:[#allocation5 + $0x28] sm:$0xff]  ;;  %v47_v1 = vld [vmem:[#allocation5 + $0x38] sm:$0xff]  ;;  %v2454_v3 = vpack.c.bf16 %v1032_v59, %v1000_v58 }
  0x52   :  { %v77_v0 = vld [vmem:[#allocation5 + $0x128] sm:$0xff]  ;;  %v79_v2 = vld [vmem:[#allocation5 + $0x138] sm:$0xff]  ;;  %v2518_v4 = vpack.c.bf16 %v1034_v62, %v1002_v60  ;;  %v76_v7 = vld [vmem:[#allocation5 + $0x120] sm:$0xff] }
  0x53   :  { %2435 = vmatpush1.bf16.msra.mxu0 %v2434_v6  ;;  %v2520_v5 = vpack.c.bf16 %v77_v0, %v45_v63  ;;  %v44_v6 = vld [vmem:[#allocation5 + $0x20] sm:$0xff]  ;;  %v78_v10 = vld [vmem:[#allocation5 + $0x130] sm:$0xff]  ;;  %v109_v11 = vld [vmem:[#allocation5 + $0x228] sm:$0xff] }
  0x54   :  { %2499 = vmatpush1.bf16.msra.mxu1 %v2498_v8  ;;  %2437 = vmatprep.subr.bf16.mxu0 %v2436_v9  ;;  %v46_v8 = vld [vmem:[#allocation5 + $0x30] sm:$0xff]  ;;  %v2584_v9 = vpack.c.bf16 %v79_v2, %v47_v1  ;;  %v141_v12 = vld [vmem:[#allocation5 + $0x328] sm:$0xff]  ;;  %v143_v14 = vld [vmem:[#allocation5 + $0x338] sm:$0xff]  ;;  %v2522_v17 = vpack.c.bf16 %v76_v7, %v44_v6 }
  0x55   :  { %2501 = vmatprep.subr.bf16.mxu1 %v2500_v13  ;;  %v111_v13 = vld [vmem:[#allocation5 + $0x238] sm:$0xff]  ;;  %v3594_v15 = vld [vmem:[#allocation2] sm:$0xff]  ;;  %v2586_v18 = vpack.c.bf16 %v78_v10, %v46_v8  ;;  %v205_v26 = vld [vmem:[#allocation5 + $0x528] sm:$0xff] }
  0x56   :  { %v110_v22 = vld [vmem:[#allocation5 + $0x230] sm:$0xff]  ;;  %v2588_v23 = vpack.c.bf16 %v143_v14, %v111_v13  ;;  %v175_v27 = vld [vmem:[#allocation5 + $0x438] sm:$0xff]  ;;  %v269_v38 = vld [vmem:[#allocation5 + $0x728] sm:$0xff] }
  0x57   :  { %2439 = vmatpush1.bf16.msra.mxu0 %v2438_v19  ;;  %v2524_v19 = vpack.c.bf16 %v141_v12, %v109_v11  ;;  %v142_v24 = vld [vmem:[#allocation5 + $0x330] sm:$0xff]  ;;  %v207_v28 = vld [vmem:[#allocation5 + $0x538] sm:$0xff]  ;;  %v333_v50 = vld [vmem:[#allocation5 + $0x928] sm:$0xff] }
  0x58   :  { %2503 = vmatpush1.bf16.msra.mxu1 %v2502_v20  ;;  %2441 = vmatprep.subr.bf16.mxu0 %v2440_v21  ;;  %v108_v20 = vld [vmem:[#allocation5 + $0x220] sm:$0xff]  ;;  %v2590_v30 = vpack.c.bf16 %v142_v24, %v110_v22  ;;  %v174_v34 = vld [vmem:[#allocation5 + $0x430] sm:$0xff]  ;;  %v2592_v35 = vpack.c.bf16 %v207_v28, %v175_v27  ;;  %v239_v39 = vld [vmem:[#allocation5 + $0x638] sm:$0xff] }
  0x59   :  { %2505 = vmatprep.subr.bf16.mxu1 %v2504_v25  ;;  %v140_v21 = vld [vmem:[#allocation5 + $0x320] sm:$0xff]  ;;  %v173_v25 = vld [vmem:[#allocation5 + $0x428] sm:$0xff]  ;;  %v206_v36 = vld [vmem:[#allocation5 + $0x530] sm:$0xff] }
  0x5a   :  { %v2526_v29 = vpack.c.bf16 %v140_v21, %v108_v20  ;;  %v271_v40 = vld [vmem:[#allocation5 + $0x738] sm:$0xff]  ;;  %v2594_v42 = vpack.c.bf16 %v206_v36, %v174_v34  ;;  %v238_v46 = vld [vmem:[#allocation5 + $0x630] sm:$0xff]  ;;  %v397_v62 = vld [vmem:[#allocation5 + $0xb28] sm:$0xff] }
  0x5b   :  { %2443 = vmatpush1.bf16.msra.mxu0 %v2442_v31  ;;  %v2528_v31 = vpack.c.bf16 %v205_v26, %v173_v25  ;;  %v2596_v47 = vpack.c.bf16 %v271_v40, %v239_v39  ;;  %v270_v48 = vld [vmem:[#allocation5 + $0x730] sm:$0xff]  ;;  %v303_v51 = vld [vmem:[#allocation5 + $0x838] sm:$0xff]  ;;  %v461_v10 = vld [vmem:[#allocation5 + $0xd28] sm:$0xff] }
  0x5c   :  { %2507 = vmatpush1.bf16.msra.mxu1 %v2506_v32  ;;  %2445 = vmatprep.subr.bf16.mxu0 %v2444_v33  ;;  %v172_v32 = vld [vmem:[#allocation5 + $0x420] sm:$0xff]  ;;  %v335_v52 = vld [vmem:[#allocation5 + $0x938] sm:$0xff]  ;;  %v2598_v54 = vpack.c.bf16 %v270_v48, %v238_v46  ;;  %v302_v58 = vld [vmem:[#allocation5 + $0x830] sm:$0xff] }
  0x5d   :  { %2509 = vmatprep.subr.bf16.mxu1 %v2508_v37  ;;  %v204_v33 = vld [vmem:[#allocation5 + $0x520] sm:$0xff]  ;;  %v237_v37 = vld [vmem:[#allocation5 + $0x628] sm:$0xff]  ;;  %v2600_v59 = vpack.c.bf16 %v335_v52, %v303_v51  ;;  %v334_v60 = vld [vmem:[#allocation5 + $0x930] sm:$0xff] }
  0x5e   :  { %v2530_v41 = vpack.c.bf16 %v204_v33, %v172_v32  ;;  %v367_v63 = vld [vmem:[#allocation5 + $0xa38] sm:$0xff]  ;;  %v2602_v2 = vpack.c.bf16 %v334_v60, %v302_v58  ;;  %v366_v6 = vld [vmem:[#allocation5 + $0xa30] sm:$0xff]  ;;  %v525_v24 = vld [vmem:[#allocation5 + $0xf28] sm:$0xff] }
  0x5f   :  { %2447 = vmatpush1.bf16.msra.mxu0 %v2446_v43  ;;  %v2532_v43 = vpack.c.bf16 %v269_v38, %v237_v37  ;;  %v399_v0 = vld [vmem:[#allocation5 + $0xb38] sm:$0xff]  ;;  %v398_v8 = vld [vmem:[#allocation5 + $0xb30] sm:$0xff]  ;;  %v589_v36 = vld [vmem:[#allocation5 + $0x1128] sm:$0xff] }
  0x60   :  { %2511 = vmatpush1.bf16.msra.mxu1 %v2510_v44  ;;  %2449 = vmatprep.subr.bf16.mxu0 %v2448_v45  ;;  %v236_v44 = vld [vmem:[#allocation5 + $0x620] sm:$0xff]  ;;  %v2604_v7 = vpack.c.bf16 %v399_v0, %v367_v63  ;;  %v431_v11 = vld [vmem:[#allocation5 + $0xc38] sm:$0xff]  ;;  %v2606_v14 = vpack.c.bf16 %v398_v8, %v366_v6  ;;  %v430_v20 = vld [vmem:[#allocation5 + $0xc30] sm:$0xff] }
  0x61   :  { %2513 = vmatprep.subr.bf16.mxu1 %v2512_v49  ;;  %v268_v45 = vld [vmem:[#allocation5 + $0x720] sm:$0xff]  ;;  %v301_v49 = vld [vmem:[#allocation5 + $0x828] sm:$0xff]  ;;  %v463_v12 = vld [vmem:[#allocation5 + $0xd38] sm:$0xff] }
  0x62   :  { %v2534_v53 = vpack.c.bf16 %v268_v45, %v236_v44  ;;  %v2608_v21 = vpack.c.bf16 %v463_v12, %v431_v11  ;;  %v462_v22 = vld [vmem:[#allocation5 + $0xd30] sm:$0xff]  ;;  %v495_v25 = vld [vmem:[#allocation5 + $0xe38] sm:$0xff]  ;;  %v653_v48 = vld [vmem:[#allocation5 + $0x1328] sm:$0xff] }
  0x63   :  { %2451 = vmatpush1.bf16.msra.mxu0 %v2450_v55  ;;  %v2536_v55 = vpack.c.bf16 %v333_v50, %v301_v49  ;;  %v527_v26 = vld [vmem:[#allocation5 + $0xf38] sm:$0xff]  ;;  %v2610_v28 = vpack.c.bf16 %v462_v22, %v430_v20  ;;  %v494_v32 = vld [vmem:[#allocation5 + $0xe30] sm:$0xff]  ;;  %v717_v60 = vld [vmem:[#allocation5 + $0x1528] sm:$0xff] }
  0x64   :  { %2515 = vmatpush1.bf16.msra.mxu1 %v2514_v56  ;;  %2453 = vmatprep.subr.bf16.mxu0 %v2452_v57  ;;  %v300_v56 = vld [vmem:[#allocation5 + $0x820] sm:$0xff]  ;;  %v2612_v33 = vpack.c.bf16 %v527_v26, %v495_v25  ;;  %v526_v34 = vld [vmem:[#allocation5 + $0xf30] sm:$0xff]  ;;  %v559_v37 = vld [vmem:[#allocation5 + $0x1038] sm:$0xff] }
  0x65   :  { %2517 = vmatprep.subr.bf16.mxu1 %v2516_v61  ;;  %v332_v57 = vld [vmem:[#allocation5 + $0x920] sm:$0xff]  ;;  %v365_v61 = vld [vmem:[#allocation5 + $0xa28] sm:$0xff]  ;;  %v591_v38 = vld [vmem:[#allocation5 + $0x1138] sm:$0xff]  ;;  %v2614_v40 = vpack.c.bf16 %v526_v34, %v494_v32 }
  0x66   :  { %v2538_v1 = vpack.c.bf16 %v332_v57, %v300_v56  ;;  %v558_v44 = vld [vmem:[#allocation5 + $0x1030] sm:$0xff]  ;;  %v2616_v45 = vpack.c.bf16 %v591_v38, %v559_v37  ;;  %v623_v49 = vld [vmem:[#allocation5 + $0x1238] sm:$0xff]  ;;  %v781_v8 = vld [vmem:[#allocation5 + $0x1728] sm:$0xff] }
  0x67   :  { %2455 = vmatpush1.bf16.msra.mxu0 %v2454_v3  ;;  %v2540_v3 = vpack.c.bf16 %v397_v62, %v365_v61  ;;  %v590_v46 = vld [vmem:[#allocation5 + $0x1130] sm:$0xff]  ;;  %v655_v50 = vld [vmem:[#allocation5 + $0x1338] sm:$0xff]  ;;  %v845_v22 = vld [vmem:[#allocation5 + $0x1928] sm:$0xff] }
  0x68   :  { %2519 = vmatpush1.bf16.msra.mxu1 %v2518_v4  ;;  %2521 = vmatprep.subr.bf16.mxu0 %v2520_v5  ;;  %v364_v4 = vld [vmem:[#allocation5 + $0xa20] sm:$0xff]  ;;  %v2618_v52 = vpack.c.bf16 %v590_v46, %v558_v44  ;;  %v622_v56 = vld [vmem:[#allocation5 + $0x1230] sm:$0xff]  ;;  %v2620_v57 = vpack.c.bf16 %v655_v50, %v623_v49  ;;  %v687_v61 = vld [vmem:[#allocation5 + $0x1438] sm:$0xff] }
  0x69   :  { %2585 = vmatprep.subr.bf16.mxu1 %v2584_v9  ;;  %v396_v5 = vld [vmem:[#allocation5 + $0xb20] sm:$0xff]  ;;  %v429_v9 = vld [vmem:[#allocation5 + $0xc28] sm:$0xff]  ;;  %v654_v58 = vld [vmem:[#allocation5 + $0x1330] sm:$0xff] }
  0x6a   :  { %1129 = vmatmul.mubr.f32.vlgmr.msra.gmra.mrb[0].mxu0 %v3594_v15  ;;  %v2542_v13 = vpack.c.bf16 %v396_v5, %v364_v4  ;;  %v719_v62 = vld [vmem:[#allocation5 + $0x1538] sm:$0xff]  ;;  %v2622_v0 = vpack.c.bf16 %v654_v58, %v622_v56  ;;  %v686_v4 = vld [vmem:[#allocation5 + $0x1430] sm:$0xff]  ;;  %v909_v34 = vld [vmem:[#allocation5 + $0x1b28] sm:$0xff] }
  0x6b   :  { %1200 = vmatmul.mubr.f32.vlgmr.msra.gmra.mrb[0].mxu1 %v3594_v15  ;;  %2523 = vmatpush1.bf16.msra.mxu0 %v2522_v17  ;;  %v2544_v17 = vpack.c.bf16 %v461_v10, %v429_v9  ;;  %v2624_v5 = vpack.c.bf16 %v719_v62, %v687_v61  ;;  %v718_v6 = vld [vmem:[#allocation5 + $0x1530] sm:$0xff]  ;;  %v751_v9 = vld [vmem:[#allocation5 + $0x1638] sm:$0xff]  ;;  %v973_v46 = vld [vmem:[#allocation5 + $0x1d28] sm:$0xff] }
  0x6c   :  { %2587 = vmatpush1.bf16.msra.mxu1 %v2586_v18  ;;  %2525 = vmatprep.subr.bf16.mxu0 %v2524_v19  ;;  %v428_v18 = vld [vmem:[#allocation5 + $0xc20] sm:$0xff]  ;;  %v783_v10 = vld [vmem:[#allocation5 + $0x1738] sm:$0xff]  ;;  %v2626_v12 = vpack.c.bf16 %v718_v6, %v686_v4  ;;  %v782_v20 = vld [vmem:[#allocation5 + $0x1730] sm:$0xff] }
  0x6d   :  { %2589 = vmatprep.subr.bf16.mxu1 %v2588_v23  ;;  %1270 = vmatprep.mubr.f32.mxu0 %v3590_v16  ;;  %v460_v19 = vld [vmem:[#allocation5 + $0xd20] sm:$0xff]  ;;  %v493_v23 = vld [vmem:[#allocation5 + $0xe28] sm:$0xff]  ;;  %v846_v32 = vld [vmem:[#allocation5 + $0x1930] sm:$0xff] }
  0x6e   :  { %1341 = vmatprep.mubr.f32.mxu1 %v3590_v16  ;;  %v2546_v27 = vpack.c.bf16 %v460_v19, %v428_v18  ;;  %v750_v18 = vld [vmem:[#allocation5 + $0x1630] sm:$0xff]  ;;  %v2628_v19 = vpack.c.bf16 %v783_v10, %v751_v9  ;;  %v1037_v58 = vld [vmem:[#allocation5 + $0x1f28] sm:$0xff] }
  0x6f   :  { %2527 = vmatpush1.bf16.msra.mxu0 %v2526_v29  ;;  %v2548_v29 = vpack.c.bf16 %v525_v24, %v493_v23  ;;  %v815_v23 = vld [vmem:[#allocation5 + $0x1838] sm:$0xff]  ;;  %v2630_v26 = vpack.c.bf16 %v782_v20, %v750_v18  ;;  %v910_v44 = vld [vmem:[#allocation5 + $0x1b30] sm:$0xff]  ;;  %v81_v6 = vld [vmem:[#allocation5 + $0x148] sm:$0xff] }
  0x70   :  { %2591 = vmatpush1.bf16.msra.mxu1 %v2590_v30  ;;  %2529 = vmatprep.subr.bf16.mxu0 %v2528_v31  ;;  %v492_v30 = vld [vmem:[#allocation5 + $0xe20] sm:$0xff]  ;;  %v847_v24 = vld [vmem:[#allocation5 + $0x1938] sm:$0xff]  ;;  %v974_v56 = vld [vmem:[#allocation5 + $0x1d30] sm:$0xff] }
  0x71   :  { %2593 = vmatprep.subr.bf16.mxu1 %v2592_v35  ;;  %v524_v31 = vld [vmem:[#allocation5 + $0xf20] sm:$0xff]  ;;  %v557_v35 = vld [vmem:[#allocation5 + $0x1028] sm:$0xff]  ;;  %v1038_v4 = vld [vmem:[#allocation5 + $0x1f30] sm:$0xff] }
  0x72   :  { %v2550_v39 = vpack.c.bf16 %v524_v31, %v492_v30  ;;  %v814_v30 = vld [vmem:[#allocation5 + $0x1830] sm:$0xff]  ;;  %v2632_v31 = vpack.c.bf16 %v847_v24, %v815_v23  ;;  %v145_v20 = vld [vmem:[#allocation5 + $0x348] sm:$0xff] }
  0x73   :  { %2531 = vmatpush1.bf16.msra.mxu0 %v2530_v41  ;;  %v2552_v41 = vpack.c.bf16 %v589_v36, %v557_v35  ;;  %v879_v35 = vld [vmem:[#allocation5 + $0x1a38] sm:$0xff]  ;;  %v2634_v38 = vpack.c.bf16 %v846_v32, %v814_v30  ;;  %v82_v18 = vld [vmem:[#allocation5 + $0x150] sm:$0xff]  ;;  %v209_v32 = vld [vmem:[#allocation5 + $0x548] sm:$0xff] }
  0x74   :  { %2595 = vmatpush1.bf16.msra.mxu1 %v2594_v42  ;;  %2533 = vmatprep.subr.bf16.mxu0 %v2532_v43  ;;  %v556_v42 = vld [vmem:[#allocation5 + $0x1020] sm:$0xff]  ;;  %v911_v36 = vld [vmem:[#allocation5 + $0x1b38] sm:$0xff]  ;;  %v146_v30 = vld [vmem:[#allocation5 + $0x350] sm:$0xff] }
  0x75   :  { %2597 = vmatprep.subr.bf16.mxu1 %v2596_v47  ;;  %v588_v43 = vld [vmem:[#allocation5 + $0x1120] sm:$0xff]  ;;  %v621_v47 = vld [vmem:[#allocation5 + $0x1228] sm:$0xff] }
  0x76   :  { %v2554_v51 = vpack.c.bf16 %v588_v43, %v556_v42  ;;  %v878_v42 = vld [vmem:[#allocation5 + $0x1a30] sm:$0xff]  ;;  %v2636_v43 = vpack.c.bf16 %v911_v36, %v879_v35 }
  0x77   :  { %2535 = vmatpush1.bf16.msra.mxu0 %v2534_v53  ;;  %v2556_v53 = vpack.c.bf16 %v653_v48, %v621_v47  ;;  %v943_v47 = vld [vmem:[#allocation5 + $0x1c38] sm:$0xff]  ;;  %v2638_v50 = vpack.c.bf16 %v910_v44, %v878_v42  ;;  %v210_v42 = vld [vmem:[#allocation5 + $0x550] sm:$0xff]  ;;  %v273_v44 = vld [vmem:[#allocation5 + $0x748] sm:$0xff] }
  0x78   :  { %2599 = vmatpush1.bf16.msra.mxu1 %v2598_v54  ;;  %2537 = vmatprep.subr.bf16.mxu0 %v2536_v55  ;;  %v620_v54 = vld [vmem:[#allocation5 + $0x1220] sm:$0xff]  ;;  %v975_v48 = vld [vmem:[#allocation5 + $0x1d38] sm:$0xff] }
  0x79   :  { %2601 = vmatprep.subr.bf16.mxu1 %v2600_v59  ;;  %v652_v55 = vld [vmem:[#allocation5 + $0x1320] sm:$0xff]  ;;  %v685_v59 = vld [vmem:[#allocation5 + $0x1428] sm:$0xff] }
  0x7a   :  { %v2558_v63 = vpack.c.bf16 %v652_v55, %v620_v54  ;;  %v942_v54 = vld [vmem:[#allocation5 + $0x1c30] sm:$0xff]  ;;  %v2640_v55 = vpack.c.bf16 %v975_v48, %v943_v47 }
  0x7b   :  { %2539 = vmatpush1.bf16.msra.mxu0 %v2538_v1  ;;  %v2560_v1 = vpack.c.bf16 %v717_v60, %v685_v59  ;;  %v1007_v59 = vld [vmem:[#allocation5 + $0x1e38] sm:$0xff]  ;;  %v2642_v62 = vpack.c.bf16 %v974_v56, %v942_v54  ;;  %v305_v54 = vld [vmem:[#allocation5 + $0x848] sm:$0xff] }
  0x7c   :  { %2603 = vmatpush1.bf16.msra.mxu1 %v2602_v2  ;;  %2541 = vmatprep.subr.bf16.mxu0 %v2540_v3  ;;  %v684_v2 = vld [vmem:[#allocation5 + $0x1420] sm:$0xff]  ;;  %v1039_v60 = vld [vmem:[#allocation5 + $0x1f38] sm:$0xff] }
  0x7d   :  { %2605 = vmatprep.subr.bf16.mxu1 %v2604_v7  ;;  %v716_v3 = vld [vmem:[#allocation5 + $0x1520] sm:$0xff]  ;;  %v749_v7 = vld [vmem:[#allocation5 + $0x1628] sm:$0xff]  ;;  %v307_v56 = vld [vmem:[#allocation5 + $0x858] sm:$0xff] }
  0x7e   :  { %v2562_v11 = vpack.c.bf16 %v716_v3, %v684_v2  ;;  %v1006_v2 = vld [vmem:[#allocation5 + $0x1e30] sm:$0xff]  ;;  %v2644_v3 = vpack.c.bf16 %v1039_v60, %v1007_v59  ;;  %v304_v60 = vld [vmem:[#allocation5 + $0x840] sm:$0xff] }
  0x7f   :  { %2543 = vmatpush1.bf16.msra.mxu0 %v2542_v13  ;;  %v2564_v13 = vpack.c.bf16 %v781_v8, %v749_v7  ;;  %v51_v7 = vld [vmem:[#allocation5 + $0x58] sm:$0xff]  ;;  %v2646_v10 = vpack.c.bf16 %v1038_v4, %v1006_v2  ;;  %v401_v2 = vld [vmem:[#allocation5 + $0xb48] sm:$0xff] }
  0x80   :  { %2607 = vmatpush1.bf16.msra.mxu1 %v2606_v14  ;;  %2545 = vmatprep.subr.bf16.mxu0 %v2544_v17  ;;  %v748_v14 = vld [vmem:[#allocation5 + $0x1620] sm:$0xff]  ;;  %v83_v8 = vld [vmem:[#allocation5 + $0x158] sm:$0xff] }
  0x81   :  { %2609 = vmatprep.subr.bf16.mxu1 %v2608_v21  ;;  %v780_v17 = vld [vmem:[#allocation5 + $0x1720] sm:$0xff]  ;;  %v813_v21 = vld [vmem:[#allocation5 + $0x1828] sm:$0xff]  ;;  %v403_v4 = vld [vmem:[#allocation5 + $0xb58] sm:$0xff] }
  0x82   :  { %v2566_v25 = vpack.c.bf16 %v780_v17, %v748_v14  ;;  %v50_v14 = vld [vmem:[#allocation5 + $0x50] sm:$0xff]  ;;  %v2712_v17 = vpack.c.bf16 %v83_v8, %v51_v7  ;;  %v368_v8 = vld [vmem:[#allocation5 + $0xa40] sm:$0xff] }
  0x83   :  { %2547 = vmatpush1.bf16.msra.mxu0 %v2546_v27  ;;  %v2568_v27 = vpack.c.bf16 %v845_v22, %v813_v21  ;;  %v115_v21 = vld [vmem:[#allocation5 + $0x258] sm:$0xff]  ;;  %v2714_v24 = vpack.c.bf16 %v82_v18, %v50_v14  ;;  %v465_v14 = vld [vmem:[#allocation5 + $0xd48] sm:$0xff] }
  0x84   :  { %2611 = vmatpush1.bf16.msra.mxu1 %v2610_v28  ;;  %2549 = vmatprep.subr.bf16.mxu0 %v2548_v29  ;;  %v812_v28 = vld [vmem:[#allocation5 + $0x1820] sm:$0xff]  ;;  %v147_v22 = vld [vmem:[#allocation5 + $0x358] sm:$0xff] }
  0x85   :  { %2613 = vmatprep.subr.bf16.mxu1 %v2612_v33  ;;  %v844_v29 = vld [vmem:[#allocation5 + $0x1920] sm:$0xff]  ;;  %v877_v33 = vld [vmem:[#allocation5 + $0x1a28] sm:$0xff]  ;;  %v467_v18 = vld [vmem:[#allocation5 + $0xd58] sm:$0xff] }
  0x86   :  { %v2570_v37 = vpack.c.bf16 %v844_v29, %v812_v28  ;;  %v114_v28 = vld [vmem:[#allocation5 + $0x250] sm:$0xff]  ;;  %v2716_v29 = vpack.c.bf16 %v147_v22, %v115_v21  ;;  %v432_v22 = vld [vmem:[#allocation5 + $0xc40] sm:$0xff] }
  0x87   :  { %2551 = vmatpush1.bf16.msra.mxu0 %v2550_v39  ;;  %v2572_v39 = vpack.c.bf16 %v909_v34, %v877_v33  ;;  %v179_v33 = vld [vmem:[#allocation5 + $0x458] sm:$0xff]  ;;  %v2718_v36 = vpack.c.bf16 %v146_v30, %v114_v28  ;;  %v529_v28 = vld [vmem:[#allocation5 + $0xf48] sm:$0xff] }
  0x88   :  { %2615 = vmatpush1.bf16.msra.mxu1 %v2614_v40  ;;  %2553 = vmatprep.subr.bf16.mxu0 %v2552_v41  ;;  %v876_v40 = vld [vmem:[#allocation5 + $0x1a20] sm:$0xff]  ;;  %v211_v34 = vld [vmem:[#allocation5 + $0x558] sm:$0xff] }
  0x89   :  { %2617 = vmatprep.subr.bf16.mxu1 %v2616_v45  ;;  %v908_v41 = vld [vmem:[#allocation5 + $0x1b20] sm:$0xff]  ;;  %v941_v45 = vld [vmem:[#allocation5 + $0x1c28] sm:$0xff]  ;;  %v531_v30 = vld [vmem:[#allocation5 + $0xf58] sm:$0xff] }
  0x8a   :  { %v2574_v49 = vpack.c.bf16 %v908_v41, %v876_v40  ;;  %v178_v40 = vld [vmem:[#allocation5 + $0x450] sm:$0xff]  ;;  %v2720_v41 = vpack.c.bf16 %v211_v34, %v179_v33  ;;  %v496_v34 = vld [vmem:[#allocation5 + $0xe40] sm:$0xff] }
  0x8b   :  { %2555 = vmatpush1.bf16.msra.mxu0 %v2554_v51  ;;  %v2576_v51 = vpack.c.bf16 %v973_v46, %v941_v45  ;;  %v243_v45 = vld [vmem:[#allocation5 + $0x658] sm:$0xff]  ;;  %v2722_v47 = vpack.c.bf16 %v210_v42, %v178_v40  ;;  %v593_v40 = vld [vmem:[#allocation5 + $0x1148] sm:$0xff] }
  0x8c   :  { %2619 = vmatpush1.bf16.msra.mxu1 %v2618_v52  ;;  %2557 = vmatprep.subr.bf16.mxu0 %v2556_v53  ;;  %v940_v52 = vld [vmem:[#allocation5 + $0x1c20] sm:$0xff]  ;;  %v275_v46 = vld [vmem:[#allocation5 + $0x758] sm:$0xff] }
  0x8d   :  { %2621 = vmatprep.subr.bf16.mxu1 %v2620_v57  ;;  %v972_v53 = vld [vmem:[#allocation5 + $0x1d20] sm:$0xff]  ;;  %v1005_v57 = vld [vmem:[#allocation5 + $0x1e28] sm:$0xff]  ;;  %v595_v42 = vld [vmem:[#allocation5 + $0x1158] sm:$0xff] }
  0x8e   :  { %v2578_v61 = vpack.c.bf16 %v972_v53, %v940_v52  ;;  %v2724_v52 = vpack.c.bf16 %v275_v46, %v243_v45  ;;  %v274_v53 = vld [vmem:[#allocation5 + $0x750] sm:$0xff]  ;;  %v560_v46 = vld [vmem:[#allocation5 + $0x1040] sm:$0xff] }
  0x8f   :  { %2559 = vmatpush1.bf16.msra.mxu0 %v2558_v63  ;;  %v2580_v63 = vpack.c.bf16 %v1037_v58, %v1005_v57  ;;  %v339_v57 = vld [vmem:[#allocation5 + $0x958] sm:$0xff] }
  0x90   :  { %2623 = vmatpush1.bf16.msra.mxu1 %v2622_v0  ;;  %2561 = vmatprep.subr.bf16.mxu0 %v2560_v1  ;;  %v1004_v0 = vld [vmem:[#allocation5 + $0x1e20] sm:$0xff] }
  0x91   :  { %2625 = vmatprep.subr.bf16.mxu1 %v2624_v5  ;;  %v1036_v1 = vld [vmem:[#allocation5 + $0x1f20] sm:$0xff]  ;;  %v49_v5 = vld [vmem:[#allocation5 + $0x48] sm:$0xff] }
  0x92   :  { %v2582_v9 = vpack.c.bf16 %v1036_v1, %v1004_v0  ;;  %v338_v0 = vld [vmem:[#allocation5 + $0x950] sm:$0xff]  ;;  %v369_v1 = vld [vmem:[#allocation5 + $0xa48] sm:$0xff] }
  0x93   :  { %2563 = vmatpush1.bf16.msra.mxu0 %v2562_v11  ;;  %v2648_v11 = vpack.c.bf16 %v81_v6, %v49_v5  ;;  %v2668_v7 = vpack.c.bf16 %v401_v2, %v369_v1 }
  0x94   :  { %2627 = vmatpush1.bf16.msra.mxu1 %v2626_v12  ;;  %2565 = vmatprep.subr.bf16.mxu0 %v2564_v13  ;;  %v48_v12 = vld [vmem:[#allocation5 + $0x40] sm:$0xff] }
  0x95   :  { %2629 = vmatprep.subr.bf16.mxu1 %v2628_v19  ;;  %v80_v13 = vld [vmem:[#allocation5 + $0x140] sm:$0xff]  ;;  %v113_v19 = vld [vmem:[#allocation5 + $0x248] sm:$0xff] }
  0x96   :  { %v2650_v23 = vpack.c.bf16 %v80_v13, %v48_v12  ;;  %v402_v12 = vld [vmem:[#allocation5 + $0xb50] sm:$0xff]  ;;  %v433_v13 = vld [vmem:[#allocation5 + $0xc48] sm:$0xff] }
  0x97   :  { %2567 = vmatpush1.bf16.msra.mxu0 %v2566_v25  ;;  %v2652_v25 = vpack.c.bf16 %v145_v20, %v113_v19  ;;  %v2672_v21 = vpack.c.bf16 %v465_v14, %v433_v13 }
  0x98   :  { %2631 = vmatpush1.bf16.msra.mxu1 %v2630_v26  ;;  %2569 = vmatprep.subr.bf16.mxu0 %v2568_v27  ;;  %v112_v26 = vld [vmem:[#allocation5 + $0x240] sm:$0xff] }
  0x99   :  { %2633 = vmatprep.subr.bf16.mxu1 %v2632_v31  ;;  %v144_v27 = vld [vmem:[#allocation5 + $0x340] sm:$0xff]  ;;  %v177_v31 = vld [vmem:[#allocation5 + $0x448] sm:$0xff] }
  0x9a   :  { %v2654_v35 = vpack.c.bf16 %v144_v27, %v112_v26  ;;  %v466_v26 = vld [vmem:[#allocation5 + $0xd50] sm:$0xff]  ;;  %v497_v27 = vld [vmem:[#allocation5 + $0xe48] sm:$0xff] }
  0x9b   :  { %2571 = vmatpush1.bf16.msra.mxu0 %v2570_v37  ;;  %v2656_v37 = vpack.c.bf16 %v209_v32, %v177_v31  ;;  %v2676_v33 = vpack.c.bf16 %v529_v28, %v497_v27 }
  0x9c   :  { %2635 = vmatpush1.bf16.msra.mxu1 %v2634_v38  ;;  %2573 = vmatprep.subr.bf16.mxu0 %v2572_v39  ;;  %v176_v38 = vld [vmem:[#allocation5 + $0x440] sm:$0xff] }
  0x9d   :  { %2637 = vmatprep.subr.bf16.mxu1 %v2636_v43  ;;  %v208_v39 = vld [vmem:[#allocation5 + $0x540] sm:$0xff]  ;;  %v241_v43 = vld [vmem:[#allocation5 + $0x648] sm:$0xff] }
  0x9e   :  { %v2660_v48 = vpack.c.bf16 %v273_v44, %v241_v43 }
  0x9f   :  { %2575 = vmatpush1.bf16.msra.mxu0 %v2574_v49  ;;  %v240_v49 = vld [vmem:[#allocation5 + $0x640] sm:$0xff] }
  0xa0   :  { %2639 = vmatpush1.bf16.msra.mxu1 %v2638_v50  ;;  %2577 = vmatprep.subr.bf16.mxu0 %v2576_v51  ;;  %v272_v50 = vld [vmem:[#allocation5 + $0x740] sm:$0xff]  ;;  %v242_v51 = vld [vmem:[#allocation5 + $0x650] sm:$0xff] }
  0xa1   :  { %2641 = vmatprep.subr.bf16.mxu1 %v2640_v55  ;;  %v337_v55 = vld [vmem:[#allocation5 + $0x948] sm:$0xff]  ;;  %v2662_v58 = vpack.c.bf16 %v272_v50, %v240_v49  ;;  %v594_v49 = vld [vmem:[#allocation5 + $0x1150] sm:$0xff] }
  0xa2   :  { %v2664_v59 = vpack.c.bf16 %v337_v55, %v305_v54  ;;  %v625_v50 = vld [vmem:[#allocation5 + $0x1248] sm:$0xff] }
  0xa3   :  { %2579 = vmatpush1.bf16.msra.mxu0 %v2578_v61  ;;  %v336_v61 = vld [vmem:[#allocation5 + $0x940] sm:$0xff] }
  0xa4   :  { %2643 = vmatpush1.bf16.msra.mxu1 %v2642_v62  ;;  %2581 = vmatprep.subr.bf16.mxu0 %v2580_v63  ;;  %v306_v62 = vld [vmem:[#allocation5 + $0x850] sm:$0xff]  ;;  %v2728_v63 = vpack.c.bf16 %v339_v57, %v307_v56  ;;  %v2666_v5 = vpack.c.bf16 %v336_v61, %v304_v60  ;;  %v624_v57 = vld [vmem:[#allocation5 + $0x1240] sm:$0xff]  ;;  %v689_v61 = vld [vmem:[#allocation5 + $0x1448] sm:$0xff] }
  0xa5   :  { %2645 = vmatprep.subr.bf16.mxu1 %v2644_v3  ;;  %v371_v3 = vld [vmem:[#allocation5 + $0xa58] sm:$0xff]  ;;  %v2730_v6 = vpack.c.bf16 %v338_v0, %v306_v62  ;;  %v658_v60 = vld [vmem:[#allocation5 + $0x1350] sm:$0xff]  ;;  %v721_v62 = vld [vmem:[#allocation5 + $0x1548] sm:$0xff] }
  0xa6   :  { %v723_v0 = vld [vmem:[#allocation5 + $0x1558] sm:$0xff] }
  0xa7   :  { %2583 = vmatpush1.bf16.msra.mxu0 %v2582_v9  ;;  %v400_v9 = vld [vmem:[#allocation5 + $0xb40] sm:$0xff] }
  0xa8   :  { %2647 = vmatpush1.bf16.msra.mxu1 %v2646_v10  ;;  %2649 = vmatprep.subr.bf16.mxu0 %v2648_v11  ;;  %v370_v10 = vld [vmem:[#allocation5 + $0xa50] sm:$0xff]  ;;  %v2732_v11 = vpack.c.bf16 %v403_v4, %v371_v3  ;;  %v2670_v19 = vpack.c.bf16 %v400_v9, %v368_v8  ;;  %v2688_v3 = vpack.c.bf16 %v721_v62, %v689_v61  ;;  %v688_v4 = vld [vmem:[#allocation5 + $0x1440] sm:$0xff]  ;;  %v753_v9 = vld [vmem:[#allocation5 + $0x1648] sm:$0xff] }
  0xa9   :  { %2713 = vmatprep.subr.bf16.mxu1 %v2712_v17  ;;  %v435_v17 = vld [vmem:[#allocation5 + $0xc58] sm:$0xff]  ;;  %v2734_v20 = vpack.c.bf16 %v402_v12, %v370_v10  ;;  %v722_v8 = vld [vmem:[#allocation5 + $0x1550] sm:$0xff]  ;;  %v785_v10 = vld [vmem:[#allocation5 + $0x1748] sm:$0xff] }
  0xaa   :  { %1271 = vmatmul.mubr.f32.vlgmr.msra.gmra.mrb[2].mxu0 %v3594_v15  ;;  %v787_v12 = vld [vmem:[#allocation5 + $0x1758] sm:$0xff] }
  0xab   :  { %1342 = vmatmul.mubr.f32.vlgmr.msra.gmra.mrb[2].mxu1 %v3594_v15  ;;  %2651 = vmatpush1.bf16.msra.mxu0 %v2650_v23  ;;  %v2658_v15 = vpack.c.bf16 %v208_v39, %v176_v38  ;;  %v464_v23 = vld [vmem:[#allocation5 + $0xd40] sm:$0xff]  ;;  %v530_v38 = vld [vmem:[#allocation5 + $0xf50] sm:$0xff]  ;;  %v561_v39 = vld [vmem:[#allocation5 + $0x1048] sm:$0xff] }
  0xac   :  { %2715 = vmatpush1.bf16.msra.mxu1 %v2714_v24  ;;  %2653 = vmatprep.subr.bf16.mxu0 %v2652_v25  ;;  %v434_v24 = vld [vmem:[#allocation5 + $0xc50] sm:$0xff]  ;;  %v2736_v25 = vpack.c.bf16 %v467_v18, %v435_v17  ;;  %v2674_v31 = vpack.c.bf16 %v464_v23, %v432_v22  ;;  %v2680_v45 = vpack.c.bf16 %v593_v40, %v561_v39  ;;  %v752_v18 = vld [vmem:[#allocation5 + $0x1640] sm:$0xff]  ;;  %v817_v23 = vld [vmem:[#allocation5 + $0x1848] sm:$0xff] }
  0xad   :  { %2717 = vmatprep.subr.bf16.mxu1 %v2716_v29  ;;  %1412 = vmatprep.mubr.f32.mxu0 %v3590_v16  ;;  %v499_v29 = vld [vmem:[#allocation5 + $0xe58] sm:$0xff]  ;;  %v2738_v32 = vpack.c.bf16 %v466_v26, %v434_v24  ;;  %v2692_v17 = vpack.c.bf16 %v785_v10, %v753_v9  ;;  %v786_v22 = vld [vmem:[#allocation5 + $0x1750] sm:$0xff]  ;;  %v849_v24 = vld [vmem:[#allocation5 + $0x1948] sm:$0xff] }
  0xae   :  { %1483 = vmatprep.mubr.f32.mxu1 %v3590_v16  ;;  %v2726_v16 = vpack.c.bf16 %v274_v53, %v242_v51  ;;  %v657_v51 = vld [vmem:[#allocation5 + $0x1348] sm:$0xff]  ;;  %v659_v53 = vld [vmem:[#allocation5 + $0x1358] sm:$0xff] }
  0xaf   :  { %2655 = vmatpush1.bf16.msra.mxu0 %v2654_v35  ;;  %v528_v35 = vld [vmem:[#allocation5 + $0xf40] sm:$0xff]  ;;  %v2684_v56 = vpack.c.bf16 %v657_v51, %v625_v50  ;;  %v851_v26 = vld [vmem:[#allocation5 + $0x1958] sm:$0xff] }
  0xb0   :  { %2719 = vmatpush1.bf16.msra.mxu1 %v2718_v36  ;;  %2657 = vmatprep.subr.bf16.mxu0 %v2656_v37  ;;  %v498_v36 = vld [vmem:[#allocation5 + $0xe50] sm:$0xff]  ;;  %v2740_v37 = vpack.c.bf16 %v531_v30, %v499_v29  ;;  %v2678_v43 = vpack.c.bf16 %v528_v35, %v496_v34  ;;  %v2696_v29 = vpack.c.bf16 %v849_v24, %v817_v23  ;;  %v816_v30 = vld [vmem:[#allocation5 + $0x1840] sm:$0xff]  ;;  %v881_v35 = vld [vmem:[#allocation5 + $0x1a48] sm:$0xff] }
  0xb1   :  { %2721 = vmatprep.subr.bf16.mxu1 %v2720_v41  ;;  %v563_v41 = vld [vmem:[#allocation5 + $0x1058] sm:$0xff]  ;;  %v2742_v44 = vpack.c.bf16 %v530_v38, %v498_v36  ;;  %v850_v34 = vld [vmem:[#allocation5 + $0x1950] sm:$0xff]  ;;  %v913_v36 = vld [vmem:[#allocation5 + $0x1b48] sm:$0xff] }
  0xb2   :  { %v915_v38 = vld [vmem:[#allocation5 + $0x1b58] sm:$0xff] }
  0xb3   :  { %2659 = vmatpush1.bf16.msra.mxu0 %v2658_v15  ;;  %v592_v15 = vld [vmem:[#allocation5 + $0x1140] sm:$0xff] }
  0xb4   :  { %2723 = vmatpush1.bf16.msra.mxu1 %v2722_v47  ;;  %2661 = vmatprep.subr.bf16.mxu0 %v2660_v48  ;;  %v562_v47 = vld [vmem:[#allocation5 + $0x1050] sm:$0xff]  ;;  %v2744_v48 = vpack.c.bf16 %v595_v42, %v563_v41  ;;  %v2682_v54 = vpack.c.bf16 %v592_v15, %v560_v46  ;;  %v2700_v41 = vpack.c.bf16 %v913_v36, %v881_v35  ;;  %v880_v42 = vld [vmem:[#allocation5 + $0x1a40] sm:$0xff]  ;;  %v945_v15 = vld [vmem:[#allocation5 + $0x1c48] sm:$0xff] }
  0xb5   :  { %2725 = vmatprep.subr.bf16.mxu1 %v2724_v52  ;;  %v627_v52 = vld [vmem:[#allocation5 + $0x1258] sm:$0xff]  ;;  %v2746_v55 = vpack.c.bf16 %v594_v49, %v562_v47  ;;  %v914_v46 = vld [vmem:[#allocation5 + $0x1b50] sm:$0xff]  ;;  %v977_v47 = vld [vmem:[#allocation5 + $0x1d48] sm:$0xff] }
  0xb6   :  { %v979_v49 = vld [vmem:[#allocation5 + $0x1d58] sm:$0xff] }
  0xb7   :  { %2663 = vmatpush1.bf16.msra.mxu0 %v2662_v58  ;;  %v656_v58 = vld [vmem:[#allocation5 + $0x1340] sm:$0xff]  ;;  %v215_v35 = vld [vmem:[#allocation5 + $0x578] sm:$0xff] }
  0xb8   :  { %2727 = vmatpush1.bf16.msra.mxu1 %v2726_v16  ;;  %2665 = vmatprep.subr.bf16.mxu0 %v2664_v59  ;;  %v626_v16 = vld [vmem:[#allocation5 + $0x1250] sm:$0xff]  ;;  %v2748_v59 = vpack.c.bf16 %v659_v53, %v627_v52  ;;  %v2686_v1 = vpack.c.bf16 %v656_v58, %v624_v57  ;;  %v2704_v52 = vpack.c.bf16 %v977_v47, %v945_v15  ;;  %v944_v53 = vld [vmem:[#allocation5 + $0x1c40] sm:$0xff]  ;;  %v1009_v58 = vld [vmem:[#allocation5 + $0x1e48] sm:$0xff] }
  0xb9   :  { %2729 = vmatprep.subr.bf16.mxu1 %v2728_v63  ;;  %v691_v63 = vld [vmem:[#allocation5 + $0x1458] sm:$0xff]  ;;  %v2750_v2 = vpack.c.bf16 %v658_v60, %v626_v16  ;;  %v978_v57 = vld [vmem:[#allocation5 + $0x1d50] sm:$0xff]  ;;  %v1041_v16 = vld [vmem:[#allocation5 + $0x1f48] sm:$0xff] }
  0xba   :  { %v1043_v60 = vld [vmem:[#allocation5 + $0x1f58] sm:$0xff] }
  0xbb   :  { %2667 = vmatpush1.bf16.msra.mxu0 %v2666_v5  ;;  %v720_v5 = vld [vmem:[#allocation5 + $0x1540] sm:$0xff]  ;;  %v247_v15 = vld [vmem:[#allocation5 + $0x678] sm:$0xff] }
  0xbc   :  { %2731 = vmatpush1.bf16.msra.mxu1 %v2730_v6  ;;  %2669 = vmatprep.subr.bf16.mxu0 %v2668_v7  ;;  %v690_v6 = vld [vmem:[#allocation5 + $0x1450] sm:$0xff]  ;;  %v2752_v7 = vpack.c.bf16 %v723_v0, %v691_v63  ;;  %v2690_v13 = vpack.c.bf16 %v720_v5, %v688_v4  ;;  %v2708_v63 = vpack.c.bf16 %v1041_v16, %v1009_v58  ;;  %v1008_v0 = vld [vmem:[#allocation5 + $0x1e40] sm:$0xff]  ;;  %v53_v5 = vld [vmem:[#allocation5 + $0x68] sm:$0xff] }
  0xbd   :  { %2733 = vmatprep.subr.bf16.mxu1 %v2732_v11  ;;  %v755_v11 = vld [vmem:[#allocation5 + $0x1658] sm:$0xff]  ;;  %v2754_v14 = vpack.c.bf16 %v722_v8, %v690_v6  ;;  %v1042_v4 = vld [vmem:[#allocation5 + $0x1f50] sm:$0xff]  ;;  %v85_v6 = vld [vmem:[#allocation5 + $0x168] sm:$0xff] }
  0xbe   :  { %v87_v8 = vld [vmem:[#allocation5 + $0x178] sm:$0xff] }
  0xbf   :  { %2671 = vmatpush1.bf16.msra.mxu0 %v2670_v19  ;;  %v784_v19 = vld [vmem:[#allocation5 + $0x1740] sm:$0xff]  ;;  %v279_v47 = vld [vmem:[#allocation5 + $0x778] sm:$0xff] }
  0xc0   :  { %2735 = vmatpush1.bf16.msra.mxu1 %v2734_v20  ;;  %2673 = vmatprep.subr.bf16.mxu0 %v2672_v21  ;;  %v754_v20 = vld [vmem:[#allocation5 + $0x1650] sm:$0xff]  ;;  %v2756_v21 = vpack.c.bf16 %v787_v12, %v755_v11  ;;  %v2694_v27 = vpack.c.bf16 %v784_v19, %v752_v18  ;;  %v2776_v11 = vpack.c.bf16 %v85_v6, %v53_v5  ;;  %v52_v12 = vld [vmem:[#allocation5 + $0x60] sm:$0xff]  ;;  %v117_v19 = vld [vmem:[#allocation5 + $0x268] sm:$0xff] }
  0xc1   :  { %2737 = vmatprep.subr.bf16.mxu1 %v2736_v25  ;;  %v819_v25 = vld [vmem:[#allocation5 + $0x1858] sm:$0xff]  ;;  %v2758_v28 = vpack.c.bf16 %v786_v22, %v754_v20  ;;  %v86_v18 = vld [vmem:[#allocation5 + $0x170] sm:$0xff]  ;;  %v149_v20 = vld [vmem:[#allocation5 + $0x368] sm:$0xff] }
  0xc2   :  { %v151_v22 = vld [vmem:[#allocation5 + $0x378] sm:$0xff] }
  0xc3   :  { %2675 = vmatpush1.bf16.msra.mxu0 %v2674_v31  ;;  %v848_v31 = vld [vmem:[#allocation5 + $0x1940] sm:$0xff]  ;;  %v311_v58 = vld [vmem:[#allocation5 + $0x878] sm:$0xff] }
  0xc4   :  { %2739 = vmatpush1.bf16.msra.mxu1 %v2738_v32  ;;  %2677 = vmatprep.subr.bf16.mxu0 %v2676_v33  ;;  %v818_v32 = vld [vmem:[#allocation5 + $0x1850] sm:$0xff]  ;;  %v2760_v33 = vpack.c.bf16 %v851_v26, %v819_v25  ;;  %v2698_v39 = vpack.c.bf16 %v848_v31, %v816_v30  ;;  %v2780_v25 = vpack.c.bf16 %v149_v20, %v117_v19  ;;  %v116_v26 = vld [vmem:[#allocation5 + $0x260] sm:$0xff]  ;;  %v181_v31 = vld [vmem:[#allocation5 + $0x468] sm:$0xff] }
  0xc5   :  { %2741 = vmatprep.subr.bf16.mxu1 %v2740_v37  ;;  %v883_v37 = vld [vmem:[#allocation5 + $0x1a58] sm:$0xff]  ;;  %v2762_v40 = vpack.c.bf16 %v850_v34, %v818_v32  ;;  %v150_v30 = vld [vmem:[#allocation5 + $0x370] sm:$0xff]  ;;  %v213_v32 = vld [vmem:[#allocation5 + $0x568] sm:$0xff] }
  0xc6   :  { %v183_v34 = vld [vmem:[#allocation5 + $0x478] sm:$0xff] }
  0xc7   :  { %2679 = vmatpush1.bf16.msra.mxu0 %v2678_v43  ;;  %v912_v43 = vld [vmem:[#allocation5 + $0x1b40] sm:$0xff]  ;;  %v343_v16 = vld [vmem:[#allocation5 + $0x978] sm:$0xff] }
  0xc8   :  { %2743 = vmatpush1.bf16.msra.mxu1 %v2742_v44  ;;  %2681 = vmatprep.subr.bf16.mxu0 %v2680_v45  ;;  %v882_v44 = vld [vmem:[#allocation5 + $0x1a50] sm:$0xff]  ;;  %v2764_v45 = vpack.c.bf16 %v915_v38, %v883_v37  ;;  %v2702_v50 = vpack.c.bf16 %v912_v43, %v880_v42  ;;  %v2784_v38 = vpack.c.bf16 %v213_v32, %v181_v31  ;;  %v375_v5 = vld [vmem:[#allocation5 + $0xa78] sm:$0xff] }
  0xc9   :  { %2745 = vmatprep.subr.bf16.mxu1 %v2744_v48  ;;  %v947_v48 = vld [vmem:[#allocation5 + $0x1c58] sm:$0xff]  ;;  %v2766_v51 = vpack.c.bf16 %v914_v46, %v882_v44  ;;  %v2848_v42 = vpack.c.bf16 %v215_v35, %v183_v34  ;;  %v214_v43 = vld [vmem:[#allocation5 + $0x570] sm:$0xff]  ;;  %v245_v44 = vld [vmem:[#allocation5 + $0x668] sm:$0xff] }
  0xca   :  { %v3608_v46 = vld [vmem:[#allocation2 + $0x8] sm:$0xff] }
  0xcb   :  { %2683 = vmatpush1.bf16.msra.mxu0 %v2682_v54  ;;  %v976_v54 = vld [vmem:[#allocation5 + $0x1d40] sm:$0xff]  ;;  %v407_v6 = vld [vmem:[#allocation5 + $0xb78] sm:$0xff] }
  0xcc   :  { %2747 = vmatpush1.bf16.msra.mxu1 %v2746_v55  ;;  %2685 = vmatprep.subr.bf16.mxu0 %v2684_v56  ;;  %v946_v55 = vld [vmem:[#allocation5 + $0x1c50] sm:$0xff]  ;;  %v2768_v56 = vpack.c.bf16 %v979_v49, %v947_v48  ;;  %v2706_v61 = vpack.c.bf16 %v976_v54, %v944_v53  ;;  %v2852_v54 = vpack.c.bf16 %v279_v47, %v247_v15  ;;  %v439_v19 = vld [vmem:[#allocation5 + $0xc78] sm:$0xff] }
  0xcd   :  { %2749 = vmatprep.subr.bf16.mxu1 %v2748_v59  ;;  %v1011_v59 = vld [vmem:[#allocation5 + $0x1e58] sm:$0xff]  ;;  %v2770_v62 = vpack.c.bf16 %v978_v57, %v946_v55  ;;  %v246_v53 = vld [vmem:[#allocation5 + $0x670] sm:$0xff]  ;;  %v341_v57 = vld [vmem:[#allocation5 + $0x968] sm:$0xff] }
  0xce   :  { %v278_v55 = vld [vmem:[#allocation5 + $0x770] sm:$0xff]  ;;  %v471_v20 = vld [vmem:[#allocation5 + $0xd78] sm:$0xff] }
  0xcf   :  { %2687 = vmatpush1.bf16.msra.mxu0 %v2686_v1  ;;  %v1040_v1 = vld [vmem:[#allocation5 + $0x1f40] sm:$0xff]  ;;  %v503_v31 = vld [vmem:[#allocation5 + $0xe78] sm:$0xff] }
  0xd0   :  { %2751 = vmatpush1.bf16.msra.mxu1 %v2750_v2  ;;  %2689 = vmatprep.subr.bf16.mxu0 %v2688_v3  ;;  %v1010_v2 = vld [vmem:[#allocation5 + $0x1e50] sm:$0xff]  ;;  %v2772_v3 = vpack.c.bf16 %v1043_v60, %v1011_v59  ;;  %v2710_v9 = vpack.c.bf16 %v1040_v1, %v1008_v0  ;;  %v2854_v60 = vpack.c.bf16 %v278_v55, %v246_v53  ;;  %v535_v32 = vld [vmem:[#allocation5 + $0xf78] sm:$0xff]  ;;  %v661_v55 = vld [vmem:[#allocation5 + $0x1368] sm:$0xff] }
  0xd1   :  { %2753 = vmatprep.subr.bf16.mxu1 %v2752_v7  ;;  %v55_v7 = vld [vmem:[#allocation5 + $0x78] sm:$0xff]  ;;  %v2774_v10 = vpack.c.bf16 %v1042_v4, %v1010_v2  ;;  %v310_v0 = vld [vmem:[#allocation5 + $0x870] sm:$0xff]  ;;  %v2856_v1 = vpack.c.bf16 %v343_v16, %v311_v58  ;;  %v405_v4 = vld [vmem:[#allocation5 + $0xb68] sm:$0xff] }
  0xd2   :  { %v342_v2 = vld [vmem:[#allocation5 + $0x970] sm:$0xff] }
  0xd3   :  { %2691 = vmatpush1.bf16.msra.mxu0 %v2690_v13  ;;  %v84_v13 = vld [vmem:[#allocation5 + $0x160] sm:$0xff]  ;;  %v598_v53 = vld [vmem:[#allocation5 + $0x1170] sm:$0xff] }
  0xd4   :  { %2755 = vmatpush1.bf16.msra.mxu1 %v2754_v14  ;;  %2693 = vmatprep.subr.bf16.mxu0 %v2692_v17  ;;  %v54_v14 = vld [vmem:[#allocation5 + $0x70] sm:$0xff]  ;;  %v2840_v17 = vpack.c.bf16 %v87_v8, %v55_v7  ;;  %v2778_v23 = vpack.c.bf16 %v84_v13, %v52_v12  ;;  %v2858_v8 = vpack.c.bf16 %v342_v2, %v310_v0  ;;  %v725_v2 = vld [vmem:[#allocation5 + $0x1568] sm:$0xff] }
  0xd5   :  { %2757 = vmatprep.subr.bf16.mxu1 %v2756_v21  ;;  %v119_v21 = vld [vmem:[#allocation5 + $0x278] sm:$0xff]  ;;  %v2842_v24 = vpack.c.bf16 %v86_v18, %v54_v14  ;;  %v374_v12 = vld [vmem:[#allocation5 + $0xa70] sm:$0xff]  ;;  %v2860_v13 = vpack.c.bf16 %v407_v6, %v375_v5  ;;  %v469_v18 = vld [vmem:[#allocation5 + $0xd68] sm:$0xff] }
  0xd6   :  { %v406_v14 = vld [vmem:[#allocation5 + $0xb70] sm:$0xff] }
  0xd7   :  { %2695 = vmatpush1.bf16.msra.mxu0 %v2694_v27  ;;  %v148_v27 = vld [vmem:[#allocation5 + $0x360] sm:$0xff]  ;;  %v662_v0 = vld [vmem:[#allocation5 + $0x1370] sm:$0xff] }
  0xd8   :  { %2759 = vmatpush1.bf16.msra.mxu1 %v2758_v28  ;;  %2697 = vmatprep.subr.bf16.mxu0 %v2696_v29  ;;  %v118_v28 = vld [vmem:[#allocation5 + $0x270] sm:$0xff]  ;;  %v2844_v29 = vpack.c.bf16 %v151_v22, %v119_v21  ;;  %v2782_v36 = vpack.c.bf16 %v148_v27, %v116_v26  ;;  %v2862_v22 = vpack.c.bf16 %v406_v14, %v374_v12  ;;  %v789_v14 = vld [vmem:[#allocation5 + $0x1768] sm:$0xff] }
  0xd9   :  { %2761 = vmatprep.subr.bf16.mxu1 %v2760_v33  ;;  %v3604_v33 = vld [vmem:[#allocation2] sm:$0xff]  ;;  %v2846_v37 = vpack.c.bf16 %v150_v30, %v118_v28  ;;  %v2864_v27 = vpack.c.bf16 %v471_v20, %v439_v19  ;;  %v533_v30 = vld [vmem:[#allocation5 + $0xf68] sm:$0xff] }
  0xda   :  { %v438_v26 = vld [vmem:[#allocation5 + $0xc70] sm:$0xff] }
  0xdb   :  { %2699 = vmatpush1.bf16.msra.mxu0 %v2698_v39  ;;  %v180_v39 = vld [vmem:[#allocation5 + $0x460] sm:$0xff]  ;;  %v470_v28 = vld [vmem:[#allocation5 + $0xd70] sm:$0xff] }
  0xdc   :  { %2763 = vmatpush1.bf16.msra.mxu1 %v2762_v40  ;;  %2701 = vmatprep.subr.bf16.mxu0 %v2700_v41  ;;  %v212_v40 = vld [vmem:[#allocation5 + $0x560] sm:$0xff]  ;;  %v182_v41 = vld [vmem:[#allocation5 + $0x470] sm:$0xff]  ;;  %v2866_v35 = vpack.c.bf16 %v470_v28, %v438_v26  ;;  %v853_v28 = vld [vmem:[#allocation5 + $0x1968] sm:$0xff] }
  0xdd   :  { %2765 = vmatprep.subr.bf16.mxu1 %v2764_v45  ;;  %v277_v45 = vld [vmem:[#allocation5 + $0x768] sm:$0xff]  ;;  %v2786_v48 = vpack.c.bf16 %v212_v40, %v180_v39  ;;  %v2850_v49 = vpack.c.bf16 %v214_v43, %v182_v41  ;;  %v502_v39 = vld [vmem:[#allocation5 + $0xe70] sm:$0xff]  ;;  %v2868_v40 = vpack.c.bf16 %v535_v32, %v503_v31 }
  0xde   :  { %v534_v41 = vld [vmem:[#allocation5 + $0xf70] sm:$0xff]  ;;  %v597_v43 = vld [vmem:[#allocation5 + $0x1168] sm:$0xff] }
  0xdf   :  { %2703 = vmatpush1.bf16.msra.mxu0 %v2702_v50  ;;  %v2788_v50 = vpack.c.bf16 %v277_v45, %v245_v44  ;;  %v567_v44 = vld [vmem:[#allocation5 + $0x1078] sm:$0xff]  ;;  %v2870_v47 = vpack.c.bf16 %v534_v41, %v502_v39  ;;  %v726_v12 = vld [vmem:[#allocation5 + $0x1570] sm:$0xff]  ;;  %v917_v41 = vld [vmem:[#allocation5 + $0x1b68] sm:$0xff] }
  0xe0   :  { %2767 = vmatpush1.bf16.msra.mxu1 %v2766_v51  ;;  %2705 = vmatprep.subr.bf16.mxu0 %v2704_v52  ;;  %v244_v51 = vld [vmem:[#allocation5 + $0x660] sm:$0xff]  ;;  %v599_v45 = vld [vmem:[#allocation5 + $0x1178] sm:$0xff]  ;;  %v790_v26 = vld [vmem:[#allocation5 + $0x1770] sm:$0xff] }
  0xe1   :  { %2769 = vmatprep.subr.bf16.mxu1 %v2768_v56  ;;  %v276_v52 = vld [vmem:[#allocation5 + $0x760] sm:$0xff]  ;;  %v309_v56 = vld [vmem:[#allocation5 + $0x868] sm:$0xff]  ;;  %v854_v39 = vld [vmem:[#allocation5 + $0x1970] sm:$0xff] }
  0xe2   :  { %v2790_v59 = vpack.c.bf16 %v276_v52, %v244_v51  ;;  %v566_v51 = vld [vmem:[#allocation5 + $0x1070] sm:$0xff]  ;;  %v2872_v52 = vpack.c.bf16 %v599_v45, %v567_v44 }
  0xe3   :  { %2707 = vmatpush1.bf16.msra.mxu0 %v2706_v61  ;;  %v2792_v61 = vpack.c.bf16 %v341_v57, %v309_v56  ;;  %v631_v56 = vld [vmem:[#allocation5 + $0x1278] sm:$0xff]  ;;  %v2874_v16 = vpack.c.bf16 %v598_v53, %v566_v51  ;;  %v918_v51 = vld [vmem:[#allocation5 + $0x1b70] sm:$0xff]  ;;  %v981_v53 = vld [vmem:[#allocation5 + $0x1d68] sm:$0xff] }
  0xe4   :  { %2771 = vmatpush1.bf16.msra.mxu1 %v2770_v62  ;;  %2709 = vmatprep.subr.bf16.mxu0 %v2708_v63  ;;  %v308_v62 = vld [vmem:[#allocation5 + $0x860] sm:$0xff]  ;;  %v663_v57 = vld [vmem:[#allocation5 + $0x1378] sm:$0xff] }
  0xe5   :  { %2773 = vmatprep.subr.bf16.mxu1 %v2772_v3  ;;  %v340_v63 = vld [vmem:[#allocation5 + $0x960] sm:$0xff]  ;;  %v373_v3 = vld [vmem:[#allocation5 + $0xa68] sm:$0xff] }
  0xe6   :  { %v2794_v7 = vpack.c.bf16 %v340_v63, %v308_v62  ;;  %v630_v62 = vld [vmem:[#allocation5 + $0x1270] sm:$0xff]  ;;  %v2876_v63 = vpack.c.bf16 %v663_v57, %v631_v56 }
  0xe7   :  { %2711 = vmatpush1.bf16.msra.mxu0 %v2710_v9  ;;  %v2796_v9 = vpack.c.bf16 %v405_v4, %v373_v3  ;;  %v695_v3 = vld [vmem:[#allocation5 + $0x1478] sm:$0xff]  ;;  %v2878_v6 = vpack.c.bf16 %v662_v0, %v630_v62  ;;  %v982_v62 = vld [vmem:[#allocation5 + $0x1d70] sm:$0xff]  ;;  %v1045_v0 = vld [vmem:[#allocation5 + $0x1f68] sm:$0xff] }
  0xe8   :  { %2775 = vmatpush1.bf16.msra.mxu1 %v2774_v10  ;;  %2777 = vmatprep.subr.bf16.mxu0 %v2776_v11  ;;  %v372_v10 = vld [vmem:[#allocation5 + $0xa60] sm:$0xff]  ;;  %v727_v4 = vld [vmem:[#allocation5 + $0x1578] sm:$0xff] }
  0xe9   :  { %2841 = vmatprep.subr.bf16.mxu1 %v2840_v17  ;;  %v404_v11 = vld [vmem:[#allocation5 + $0xb60] sm:$0xff]  ;;  %v437_v17 = vld [vmem:[#allocation5 + $0xc68] sm:$0xff] }
  0xea   :  { %1413 = vmatmul.mubr.f32.vlgmr.msra.gmra.mrb[4].mxu0 %v3604_v33  ;;  %v2798_v21 = vpack.c.bf16 %v404_v11, %v372_v10  ;;  %v694_v10 = vld [vmem:[#allocation5 + $0x1470] sm:$0xff]  ;;  %v2880_v11 = vpack.c.bf16 %v727_v4, %v695_v3 }
  0xeb   :  { %1484 = vmatmul.mubr.f32.vlgmr.msra.gmra.mrb[4].mxu1 %v3604_v33  ;;  %2779 = vmatpush1.bf16.msra.mxu0 %v2778_v23  ;;  %v2800_v23 = vpack.c.bf16 %v469_v18, %v437_v17  ;;  %v759_v17 = vld [vmem:[#allocation5 + $0x1678] sm:$0xff]  ;;  %v2882_v20 = vpack.c.bf16 %v726_v12, %v694_v10  ;;  %v1046_v10 = vld [vmem:[#allocation5 + $0x1f70] sm:$0xff]  ;;  %v89_v12 = vld [vmem:[#allocation5 + $0x188] sm:$0xff] }
  0xec   :  { %2843 = vmatpush1.bf16.msra.mxu1 %v2842_v24  ;;  %2781 = vmatprep.subr.bf16.mxu0 %v2780_v25  ;;  %v436_v24 = vld [vmem:[#allocation5 + $0xc60] sm:$0xff]  ;;  %v791_v18 = vld [vmem:[#allocation5 + $0x1778] sm:$0xff] }
  0xed   :  { %2845 = vmatprep.subr.bf16.mxu1 %v2844_v29  ;;  %1554 = vmatprep.mubr.f32.mxu0 %v3608_v46  ;;  %v468_v25 = vld [vmem:[#allocation5 + $0xd60] sm:$0xff]  ;;  %v501_v29 = vld [vmem:[#allocation5 + $0xe68] sm:$0xff] }
  0xee   :  { %1625 = vmatprep.mubr.f32.mxu1 %v3608_v46  ;;  %v2802_v34 = vpack.c.bf16 %v468_v25, %v436_v24  ;;  %v758_v24 = vld [vmem:[#allocation5 + $0x1670] sm:$0xff]  ;;  %v2884_v25 = vpack.c.bf16 %v791_v18, %v759_v17 }
  0xef   :  { %2783 = vmatpush1.bf16.msra.mxu0 %v2782_v36  ;;  %v2804_v36 = vpack.c.bf16 %v533_v30, %v501_v29  ;;  %v823_v29 = vld [vmem:[#allocation5 + $0x1878] sm:$0xff]  ;;  %v2886_v32 = vpack.c.bf16 %v790_v26, %v758_v24  ;;  %v90_v24 = vld [vmem:[#allocation5 + $0x190] sm:$0xff]  ;;  %v153_v26 = vld [vmem:[#allocation5 + $0x388] sm:$0xff] }
  0xf0   :  { %2847 = vmatpush1.bf16.msra.mxu1 %v2846_v37  ;;  %2785 = vmatprep.subr.bf16.mxu0 %v2784_v38  ;;  %v500_v37 = vld [vmem:[#allocation5 + $0xe60] sm:$0xff]  ;;  %v855_v30 = vld [vmem:[#allocation5 + $0x1978] sm:$0xff] }
  0xf1   :  { %2849 = vmatprep.subr.bf16.mxu1 %v2848_v42  ;;  %v532_v38 = vld [vmem:[#allocation5 + $0xf60] sm:$0xff]  ;;  %v565_v42 = vld [vmem:[#allocation5 + $0x1068] sm:$0xff] }
  0xf2   :  { %v2806_v15 = vpack.c.bf16 %v532_v38, %v500_v37  ;;  %v822_v37 = vld [vmem:[#allocation5 + $0x1870] sm:$0xff]  ;;  %v2888_v38 = vpack.c.bf16 %v855_v30, %v823_v29 }
  0xf3   :  { %2787 = vmatpush1.bf16.msra.mxu0 %v2786_v48  ;;  %v2808_v48 = vpack.c.bf16 %v597_v43, %v565_v42  ;;  %v887_v42 = vld [vmem:[#allocation5 + $0x1a78] sm:$0xff]  ;;  %v2890_v45 = vpack.c.bf16 %v854_v39, %v822_v37  ;;  %v154_v37 = vld [vmem:[#allocation5 + $0x390] sm:$0xff]  ;;  %v217_v39 = vld [vmem:[#allocation5 + $0x588] sm:$0xff] }
  0xf4   :  { %2851 = vmatpush1.bf16.msra.mxu1 %v2850_v49  ;;  %2789 = vmatprep.subr.bf16.mxu0 %v2788_v50  ;;  %v564_v49 = vld [vmem:[#allocation5 + $0x1060] sm:$0xff]  ;;  %v919_v43 = vld [vmem:[#allocation5 + $0x1b78] sm:$0xff] }
  0xf5   :  { %2853 = vmatprep.subr.bf16.mxu1 %v2852_v54  ;;  %v596_v50 = vld [vmem:[#allocation5 + $0x1160] sm:$0xff]  ;;  %v629_v54 = vld [vmem:[#allocation5 + $0x1268] sm:$0xff] }
  0xf6   :  { %v2810_v58 = vpack.c.bf16 %v596_v50, %v564_v49  ;;  %v886_v49 = vld [vmem:[#allocation5 + $0x1a70] sm:$0xff]  ;;  %v2892_v50 = vpack.c.bf16 %v919_v43, %v887_v42 }
  0xf7   :  { %2791 = vmatpush1.bf16.msra.mxu0 %v2790_v59  ;;  %v2812_v59 = vpack.c.bf16 %v661_v55, %v629_v54  ;;  %v951_v54 = vld [vmem:[#allocation5 + $0x1c78] sm:$0xff]  ;;  %v2894_v57 = vpack.c.bf16 %v918_v51, %v886_v49  ;;  %v218_v49 = vld [vmem:[#allocation5 + $0x590] sm:$0xff]  ;;  %v281_v51 = vld [vmem:[#allocation5 + $0x788] sm:$0xff] }
  0xf8   :  { %2855 = vmatpush1.bf16.msra.mxu1 %v2854_v60  ;;  %2793 = vmatprep.subr.bf16.mxu0 %v2792_v61  ;;  %v628_v60 = vld [vmem:[#allocation5 + $0x1260] sm:$0xff]  ;;  %v983_v55 = vld [vmem:[#allocation5 + $0x1d78] sm:$0xff] }
  0xf9   :  { %2857 = vmatprep.subr.bf16.mxu1 %v2856_v1  ;;  %v660_v61 = vld [vmem:[#allocation5 + $0x1360] sm:$0xff]  ;;  %v693_v1 = vld [vmem:[#allocation5 + $0x1468] sm:$0xff] }
  0xfa   :  { %v2814_v5 = vpack.c.bf16 %v660_v61, %v628_v60  ;;  %v950_v60 = vld [vmem:[#allocation5 + $0x1c70] sm:$0xff]  ;;  %v2896_v61 = vpack.c.bf16 %v983_v55, %v951_v54 }
  0xfb   :  { %2795 = vmatpush1.bf16.msra.mxu0 %v2794_v7  ;;  %v2816_v7 = vpack.c.bf16 %v725_v2, %v693_v1  ;;  %v1015_v1 = vld [vmem:[#allocation5 + $0x1e78] sm:$0xff]  ;;  %v2898_v4 = vpack.c.bf16 %v982_v62, %v950_v60  ;;  %v313_v60 = vld [vmem:[#allocation5 + $0x888] sm:$0xff] }
  0xfc   :  { %2859 = vmatpush1.bf16.msra.mxu1 %v2858_v8  ;;  %2797 = vmatprep.subr.bf16.mxu0 %v2796_v9  ;;  %v692_v8 = vld [vmem:[#allocation5 + $0x1460] sm:$0xff]  ;;  %v1047_v2 = vld [vmem:[#allocation5 + $0x1f78] sm:$0xff] }
  0xfd   :  { %2861 = vmatprep.subr.bf16.mxu1 %v2860_v13  ;;  %v724_v9 = vld [vmem:[#allocation5 + $0x1560] sm:$0xff]  ;;  %v757_v13 = vld [vmem:[#allocation5 + $0x1668] sm:$0xff]  ;;  %v315_v62 = vld [vmem:[#allocation5 + $0x898] sm:$0xff] }
  0xfe   :  { %v2818_v19 = vpack.c.bf16 %v724_v9, %v692_v8  ;;  %v1014_v8 = vld [vmem:[#allocation5 + $0x1e70] sm:$0xff]  ;;  %v2900_v9 = vpack.c.bf16 %v1047_v2, %v1015_v1  ;;  %v312_v2 = vld [vmem:[#allocation5 + $0x880] sm:$0xff] }
  0xff   :  { %2799 = vmatpush1.bf16.msra.mxu0 %v2798_v21  ;;  %v2820_v21 = vpack.c.bf16 %v789_v14, %v757_v13  ;;  %v59_v13 = vld [vmem:[#allocation5 + $0x98] sm:$0xff]  ;;  %v2902_v18 = vpack.c.bf16 %v1046_v10, %v1014_v8  ;;  %v409_v8 = vld [vmem:[#allocation5 + $0xb88] sm:$0xff] }
 0x100   :  { %2863 = vmatpush1.bf16.msra.mxu1 %v2862_v22  ;;  %2801 = vmatprep.subr.bf16.mxu0 %v2800_v23  ;;  %v756_v22 = vld [vmem:[#allocation5 + $0x1660] sm:$0xff]  ;;  %v91_v14 = vld [vmem:[#allocation5 + $0x198] sm:$0xff] }
 0x101   :  { %2865 = vmatprep.subr.bf16.mxu1 %v2864_v27  ;;  %v788_v23 = vld [vmem:[#allocation5 + $0x1760] sm:$0xff]  ;;  %v821_v27 = vld [vmem:[#allocation5 + $0x1868] sm:$0xff]  ;;  %v411_v10 = vld [vmem:[#allocation5 + $0xb98] sm:$0xff] }
 0x102   :  { %v2822_v31 = vpack.c.bf16 %v788_v23, %v756_v22  ;;  %v58_v22 = vld [vmem:[#allocation5 + $0x90] sm:$0xff]  ;;  %v2968_v23 = vpack.c.bf16 %v91_v14, %v59_v13  ;;  %v376_v14 = vld [vmem:[#allocation5 + $0xa80] sm:$0xff] }
 0x103   :  { %2803 = vmatpush1.bf16.msra.mxu0 %v2802_v34  ;;  %v2824_v34 = vpack.c.bf16 %v853_v28, %v821_v27  ;;  %v123_v27 = vld [vmem:[#allocation5 + $0x298] sm:$0xff]  ;;  %v2970_v30 = vpack.c.bf16 %v90_v24, %v58_v22  ;;  %v473_v22 = vld [vmem:[#allocation5 + $0xd88] sm:$0xff] }
 0x104   :  { %2867 = vmatpush1.bf16.msra.mxu1 %v2866_v35  ;;  %2805 = vmatprep.subr.bf16.mxu0 %v2804_v36  ;;  %v820_v35 = vld [vmem:[#allocation5 + $0x1860] sm:$0xff]  ;;  %v155_v28 = vld [vmem:[#allocation5 + $0x398] sm:$0xff] }
 0x105   :  { %2869 = vmatprep.subr.bf16.mxu1 %v2868_v40  ;;  %v852_v36 = vld [vmem:[#allocation5 + $0x1960] sm:$0xff]  ;;  %v885_v40 = vld [vmem:[#allocation5 + $0x1a68] sm:$0xff]  ;;  %v475_v24 = vld [vmem:[#allocation5 + $0xd98] sm:$0xff] }
 0x106   :  { %v2826_v44 = vpack.c.bf16 %v852_v36, %v820_v35  ;;  %v122_v35 = vld [vmem:[#allocation5 + $0x290] sm:$0xff]  ;;  %v2972_v36 = vpack.c.bf16 %v155_v28, %v123_v27  ;;  %v440_v28 = vld [vmem:[#allocation5 + $0xc80] sm:$0xff] }
 0x107   :  { %2807 = vmatpush1.bf16.msra.mxu0 %v2806_v15  ;;  %v2828_v15 = vpack.c.bf16 %v917_v41, %v885_v40  ;;  %v187_v40 = vld [vmem:[#allocation5 + $0x498] sm:$0xff]  ;;  %v2974_v43 = vpack.c.bf16 %v154_v37, %v122_v35  ;;  %v505_v35 = vld [vmem:[#allocation5 + $0xe88] sm:$0xff] }
 0x108   :  { %2871 = vmatpush1.bf16.msra.mxu1 %v2870_v47  ;;  %2809 = vmatprep.subr.bf16.mxu0 %v2808_v48  ;;  %v884_v47 = vld [vmem:[#allocation5 + $0x1a60] sm:$0xff]  ;;  %v219_v41 = vld [vmem:[#allocation5 + $0x598] sm:$0xff] }
 0x109   :  { %2873 = vmatprep.subr.bf16.mxu1 %v2872_v52  ;;  %v916_v48 = vld [vmem:[#allocation5 + $0x1b60] sm:$0xff]  ;;  %v949_v52 = vld [vmem:[#allocation5 + $0x1c68] sm:$0xff] }
 0x10a   :  { %v2830_v56 = vpack.c.bf16 %v916_v48, %v884_v47  ;;  %v186_v47 = vld [vmem:[#allocation5 + $0x490] sm:$0xff]  ;;  %v2976_v48 = vpack.c.bf16 %v219_v41, %v187_v40  ;;  %v539_v40 = vld [vmem:[#allocation5 + $0xf98] sm:$0xff] }
 0x10b   :  { %2811 = vmatpush1.bf16.msra.mxu0 %v2810_v58  ;;  %v2832_v58 = vpack.c.bf16 %v981_v53, %v949_v52  ;;  %v251_v52 = vld [vmem:[#allocation5 + $0x698] sm:$0xff]  ;;  %v2978_v54 = vpack.c.bf16 %v218_v49, %v186_v47  ;;  %v506_v47 = vld [vmem:[#allocation5 + $0xe90] sm:$0xff] }
 0x10c   :  { %2875 = vmatpush1.bf16.msra.mxu1 %v2874_v16  ;;  %2813 = vmatprep.subr.bf16.mxu0 %v2812_v59  ;;  %v948_v16 = vld [vmem:[#allocation5 + $0x1c60] sm:$0xff]  ;;  %v283_v53 = vld [vmem:[#allocation5 + $0x798] sm:$0xff]  ;;  %v538_v49 = vld [vmem:[#allocation5 + $0xf90] sm:$0xff] }
 0x10d   :  { %2877 = vmatprep.subr.bf16.mxu1 %v2876_v63  ;;  %v980_v59 = vld [vmem:[#allocation5 + $0x1d60] sm:$0xff]  ;;  %v1013_v63 = vld [vmem:[#allocation5 + $0x1e68] sm:$0xff] }
 0x10e   :  { %v2834_v3 = vpack.c.bf16 %v980_v59, %v948_v16  ;;  %v2980_v16 = vpack.c.bf16 %v283_v53, %v251_v52  ;;  %v282_v59 = vld [vmem:[#allocation5 + $0x790] sm:$0xff]  ;;  %v571_v52 = vld [vmem:[#allocation5 + $0x1098] sm:$0xff] }
 0x10f   :  { %2815 = vmatpush1.bf16.msra.mxu0 %v2814_v5  ;;  %v2836_v5 = vpack.c.bf16 %v1045_v0, %v1013_v63  ;;  %v347_v63 = vld [vmem:[#allocation5 + $0x998] sm:$0xff] }
 0x110   :  { %2879 = vmatpush1.bf16.msra.mxu1 %v2878_v6  ;;  %2817 = vmatprep.subr.bf16.mxu0 %v2816_v7  ;;  %v1012_v6 = vld [vmem:[#allocation5 + $0x1e60] sm:$0xff]  ;;  %v603_v53 = vld [vmem:[#allocation5 + $0x1198] sm:$0xff] }
 0x111   :  { %2881 = vmatprep.subr.bf16.mxu1 %v2880_v11  ;;  %v1044_v7 = vld [vmem:[#allocation5 + $0x1f60] sm:$0xff]  ;;  %v57_v11 = vld [vmem:[#allocation5 + $0x88] sm:$0xff] }
 0x112   :  { %v2838_v17 = vpack.c.bf16 %v1044_v7, %v1012_v6  ;;  %v346_v6 = vld [vmem:[#allocation5 + $0x990] sm:$0xff]  ;;  %v377_v7 = vld [vmem:[#allocation5 + $0xa88] sm:$0xff] }
 0x113   :  { %2819 = vmatpush1.bf16.msra.mxu0 %v2818_v19  ;;  %v2904_v19 = vpack.c.bf16 %v89_v12, %v57_v11  ;;  %v2924_v13 = vpack.c.bf16 %v409_v8, %v377_v7  ;;  %v697_v7 = vld [vmem:[#allocation5 + $0x1488] sm:$0xff] }
 0x114   :  { %2883 = vmatpush1.bf16.msra.mxu1 %v2882_v20  ;;  %2821 = vmatprep.subr.bf16.mxu0 %v2820_v21  ;;  %v56_v20 = vld [vmem:[#allocation5 + $0x80] sm:$0xff]  ;;  %v729_v8 = vld [vmem:[#allocation5 + $0x1588] sm:$0xff] }
 0x115   :  { %2885 = vmatprep.subr.bf16.mxu1 %v2884_v25  ;;  %v88_v21 = vld [vmem:[#allocation5 + $0x180] sm:$0xff]  ;;  %v121_v25 = vld [vmem:[#allocation5 + $0x288] sm:$0xff] }
 0x116   :  { %v2906_v29 = vpack.c.bf16 %v88_v21, %v56_v20  ;;  %v410_v20 = vld [vmem:[#allocation5 + $0xb90] sm:$0xff]  ;;  %v441_v21 = vld [vmem:[#allocation5 + $0xc88] sm:$0xff] }
 0x117   :  { %2823 = vmatpush1.bf16.msra.mxu0 %v2822_v31  ;;  %v2908_v31 = vpack.c.bf16 %v153_v26, %v121_v25  ;;  %v2928_v27 = vpack.c.bf16 %v473_v22, %v441_v21  ;;  %v761_v21 = vld [vmem:[#allocation5 + $0x1688] sm:$0xff] }
 0x118   :  { %2887 = vmatpush1.bf16.msra.mxu1 %v2886_v32  ;;  %2825 = vmatprep.subr.bf16.mxu0 %v2824_v34  ;;  %v120_v32 = vld [vmem:[#allocation5 + $0x280] sm:$0xff]  ;;  %v793_v22 = vld [vmem:[#allocation5 + $0x1788] sm:$0xff] }
 0x119   :  { %2889 = vmatprep.subr.bf16.mxu1 %v2888_v38  ;;  %v152_v34 = vld [vmem:[#allocation5 + $0x380] sm:$0xff]  ;;  %v185_v38 = vld [vmem:[#allocation5 + $0x488] sm:$0xff] }
 0x11a   :  { %v2910_v42 = vpack.c.bf16 %v152_v34, %v120_v32  ;;  %v474_v34 = vld [vmem:[#allocation5 + $0xd90] sm:$0xff] }
 0x11b   :  { %2827 = vmatpush1.bf16.msra.mxu0 %v2826_v44  ;;  %v2912_v44 = vpack.c.bf16 %v217_v39, %v185_v38  ;;  %v507_v39 = vld [vmem:[#allocation5 + $0xe98] sm:$0xff] }
 0x11c   :  { %2891 = vmatpush1.bf16.msra.mxu1 %v2890_v45  ;;  %2829 = vmatprep.subr.bf16.mxu0 %v2828_v15  ;;  %v184_v45 = vld [vmem:[#allocation5 + $0x480] sm:$0xff] }
 0x11d   :  { %2893 = vmatprep.subr.bf16.mxu1 %v2892_v50  ;;  %v216_v15 = vld [vmem:[#allocation5 + $0x580] sm:$0xff]  ;;  %v249_v50 = vld [vmem:[#allocation5 + $0x688] sm:$0xff] }
 0x11e   :  { %v2916_v55 = vpack.c.bf16 %v281_v51, %v249_v50  ;;  %v569_v50 = vld [vmem:[#allocation5 + $0x1088] sm:$0xff] }
 0x11f   :  { %2831 = vmatpush1.bf16.msra.mxu0 %v2830_v56  ;;  %v248_v56 = vld [vmem:[#allocation5 + $0x680] sm:$0xff]  ;;  %v601_v51 = vld [vmem:[#allocation5 + $0x1188] sm:$0xff] }
 0x120   :  { %2895 = vmatpush1.bf16.msra.mxu1 %v2894_v57  ;;  %2833 = vmatprep.subr.bf16.mxu0 %v2832_v58  ;;  %v280_v57 = vld [vmem:[#allocation5 + $0x780] sm:$0xff]  ;;  %v250_v58 = vld [vmem:[#allocation5 + $0x690] sm:$0xff] }
 0x121   :  { %2897 = vmatprep.subr.bf16.mxu1 %v2896_v61  ;;  %v345_v61 = vld [vmem:[#allocation5 + $0x988] sm:$0xff]  ;;  %v2918_v0 = vpack.c.bf16 %v280_v57, %v248_v56  ;;  %v568_v56 = vld [vmem:[#allocation5 + $0x1080] sm:$0xff] }
 0x122   :  { %v2920_v1 = vpack.c.bf16 %v345_v61, %v313_v60  ;;  %v600_v57 = vld [vmem:[#allocation5 + $0x1180] sm:$0xff]  ;;  %v633_v60 = vld [vmem:[#allocation5 + $0x1288] sm:$0xff] }
 0x123   :  { %2835 = vmatpush1.bf16.msra.mxu0 %v2834_v3  ;;  %v344_v3 = vld [vmem:[#allocation5 + $0x980] sm:$0xff]  ;;  %v665_v61 = vld [vmem:[#allocation5 + $0x1388] sm:$0xff] }
 0x124   :  { %2899 = vmatpush1.bf16.msra.mxu1 %v2898_v4  ;;  %2837 = vmatprep.subr.bf16.mxu0 %v2836_v5  ;;  %v314_v4 = vld [vmem:[#allocation5 + $0x890] sm:$0xff]  ;;  %v2984_v5 = vpack.c.bf16 %v347_v63, %v315_v62  ;;  %v2922_v11 = vpack.c.bf16 %v344_v3, %v312_v2  ;;  %v635_v62 = vld [vmem:[#allocation5 + $0x1298] sm:$0xff]  ;;  %v632_v2 = vld [vmem:[#allocation5 + $0x1280] sm:$0xff] }
 0x125   :  { %2901 = vmatprep.subr.bf16.mxu1 %v2900_v9  ;;  %v379_v9 = vld [vmem:[#allocation5 + $0xa98] sm:$0xff]  ;;  %v2986_v12 = vpack.c.bf16 %v346_v6, %v314_v4  ;;  %v664_v3 = vld [vmem:[#allocation5 + $0x1380] sm:$0xff]  ;;  %v634_v4 = vld [vmem:[#allocation5 + $0x1290] sm:$0xff] }
 0x126   :  { %v667_v63 = vld [vmem:[#allocation5 + $0x1398] sm:$0xff]  ;;  %v666_v6 = vld [vmem:[#allocation5 + $0x1390] sm:$0xff] }
 0x127   :  { %2839 = vmatpush1.bf16.msra.mxu0 %v2838_v17  ;;  %v408_v17 = vld [vmem:[#allocation5 + $0xb80] sm:$0xff] }
 0x128   :  { %2903 = vmatpush1.bf16.msra.mxu1 %v2902_v18  ;;  %2905 = vmatprep.subr.bf16.mxu0 %v2904_v19  ;;  %v378_v18 = vld [vmem:[#allocation5 + $0xa90] sm:$0xff]  ;;  %v2988_v19 = vpack.c.bf16 %v411_v10, %v379_v9  ;;  %v2926_v25 = vpack.c.bf16 %v408_v17, %v376_v14  ;;  %v699_v9 = vld [vmem:[#allocation5 + $0x1498] sm:$0xff]  ;;  %v696_v14 = vld [vmem:[#allocation5 + $0x1480] sm:$0xff] }
 0x129   :  { %2969 = vmatprep.subr.bf16.mxu1 %v2968_v23  ;;  %v443_v23 = vld [vmem:[#allocation5 + $0xc98] sm:$0xff]  ;;  %v2990_v26 = vpack.c.bf16 %v410_v20, %v378_v18  ;;  %v728_v17 = vld [vmem:[#allocation5 + $0x1580] sm:$0xff]  ;;  %v698_v18 = vld [vmem:[#allocation5 + $0x1490] sm:$0xff] }
 0x12a   :  { %1555 = vmatmul.mubr.f32.vlgmr.msra.gmra.mrb[6].mxu0 %v3604_v33  ;;  %v2992_v32 = vpack.c.bf16 %v475_v24, %v443_v23  ;;  %v731_v10 = vld [vmem:[#allocation5 + $0x1598] sm:$0xff]  ;;  %v730_v20 = vld [vmem:[#allocation5 + $0x1590] sm:$0xff] }
 0x12b   :  { %1626 = vmatmul.mubr.f32.vlgmr.msra.gmra.mrb[6].mxu1 %v3604_v33  ;;  %2907 = vmatpush1.bf16.msra.mxu0 %v2906_v29  ;;  %v2914_v33 = vpack.c.bf16 %v216_v15, %v184_v45  ;;  %v472_v29 = vld [vmem:[#allocation5 + $0xd80] sm:$0xff]  ;;  %v763_v23 = vld [vmem:[#allocation5 + $0x1698] sm:$0xff] }
 0x12c   :  { %2971 = vmatpush1.bf16.msra.mxu1 %v2970_v30  ;;  %2909 = vmatprep.subr.bf16.mxu0 %v2908_v31  ;;  %v442_v30 = vld [vmem:[#allocation5 + $0xc90] sm:$0xff]  ;;  %v504_v45 = vld [vmem:[#allocation5 + $0xe80] sm:$0xff]  ;;  %v795_v24 = vld [vmem:[#allocation5 + $0x1798] sm:$0xff] }
 0x12d   :  { %2973 = vmatprep.subr.bf16.mxu1 %v2972_v36  ;;  %1696 = vmatprep.mubr.f32.mxu0 %v3608_v46  ;;  %v537_v36 = vld [vmem:[#allocation5 + $0xf88] sm:$0xff]  ;;  %v536_v15 = vld [vmem:[#allocation5 + $0xf80] sm:$0xff] }
 0x12e   :  { %1767 = vmatprep.mubr.f32.mxu1 %v3608_v46  ;;  %v2982_v46 = vpack.c.bf16 %v282_v59, %v250_v58  ;;  %v570_v58 = vld [vmem:[#allocation5 + $0x1090] sm:$0xff] }
 0x12f   :  { %2911 = vmatpush1.bf16.msra.mxu0 %v2910_v42  ;;  %v2930_v42 = vpack.c.bf16 %v472_v29, %v440_v28  ;;  %v602_v59 = vld [vmem:[#allocation5 + $0x1190] sm:$0xff]  ;;  %v760_v28 = vld [vmem:[#allocation5 + $0x1680] sm:$0xff] }
 0x130   :  { %2975 = vmatpush1.bf16.msra.mxu1 %v2974_v43  ;;  %2913 = vmatprep.subr.bf16.mxu0 %v2912_v44  ;;  %v2994_v43 = vpack.c.bf16 %v474_v34, %v442_v30  ;;  %v2932_v44 = vpack.c.bf16 %v537_v36, %v505_v35  ;;  %v792_v29 = vld [vmem:[#allocation5 + $0x1780] sm:$0xff]  ;;  %v762_v30 = vld [vmem:[#allocation5 + $0x1690] sm:$0xff]  ;;  %v825_v35 = vld [vmem:[#allocation5 + $0x1888] sm:$0xff] }
 0x131   :  { %2977 = vmatprep.subr.bf16.mxu1 %v2976_v48  ;;  %v2996_v48 = vpack.c.bf16 %v539_v40, %v507_v39  ;;  %v794_v34 = vld [vmem:[#allocation5 + $0x1790] sm:$0xff]  ;;  %v857_v36 = vld [vmem:[#allocation5 + $0x1988] sm:$0xff]  ;;  %v827_v39 = vld [vmem:[#allocation5 + $0x1898] sm:$0xff] }
 0x132   :  { %v859_v40 = vld [vmem:[#allocation5 + $0x1998] sm:$0xff] }
 0x133   :  { %2915 = vmatpush1.bf16.msra.mxu0 %v2914_v33  ;;  %v2934_v33 = vpack.c.bf16 %v536_v15, %v504_v45  ;;  %v824_v45 = vld [vmem:[#allocation5 + $0x1880] sm:$0xff] }
 0x134   :  { %2979 = vmatpush1.bf16.msra.mxu1 %v2978_v54  ;;  %2917 = vmatprep.subr.bf16.mxu0 %v2916_v55  ;;  %v2998_v54 = vpack.c.bf16 %v538_v49, %v506_v47  ;;  %v2936_v55 = vpack.c.bf16 %v601_v51, %v569_v50  ;;  %v856_v15 = vld [vmem:[#allocation5 + $0x1980] sm:$0xff]  ;;  %v826_v47 = vld [vmem:[#allocation5 + $0x1890] sm:$0xff]  ;;  %v889_v50 = vld [vmem:[#allocation5 + $0x1a88] sm:$0xff] }
 0x135   :  { %2981 = vmatprep.subr.bf16.mxu1 %v2980_v16  ;;  %v3000_v16 = vpack.c.bf16 %v603_v53, %v571_v52  ;;  %v858_v49 = vld [vmem:[#allocation5 + $0x1990] sm:$0xff]  ;;  %v921_v51 = vld [vmem:[#allocation5 + $0x1b88] sm:$0xff]  ;;  %v891_v52 = vld [vmem:[#allocation5 + $0x1a98] sm:$0xff] }
 0x136   :  { %v923_v53 = vld [vmem:[#allocation5 + $0x1b98] sm:$0xff] }
 0x137   :  { %2919 = vmatpush1.bf16.msra.mxu0 %v2918_v0  ;;  %v2938_v0 = vpack.c.bf16 %v600_v57, %v568_v56  ;;  %v888_v56 = vld [vmem:[#allocation5 + $0x1a80] sm:$0xff] }
 0x138   :  { %2983 = vmatpush1.bf16.msra.mxu1 %v2982_v46  ;;  %2921 = vmatprep.subr.bf16.mxu0 %v2920_v1  ;;  %v3002_v46 = vpack.c.bf16 %v602_v59, %v570_v58  ;;  %v2940_v1 = vpack.c.bf16 %v665_v61, %v633_v60  ;;  %v920_v57 = vld [vmem:[#allocation5 + $0x1b80] sm:$0xff]  ;;  %v890_v58 = vld [vmem:[#allocation5 + $0x1a90] sm:$0xff]  ;;  %v953_v60 = vld [vmem:[#allocation5 + $0x1c88] sm:$0xff] }
 0x139   :  { %2985 = vmatprep.subr.bf16.mxu1 %v2984_v5  ;;  %v3004_v5 = vpack.c.bf16 %v667_v63, %v635_v62  ;;  %v922_v59 = vld [vmem:[#allocation5 + $0x1b90] sm:$0xff]  ;;  %v985_v61 = vld [vmem:[#allocation5 + $0x1d88] sm:$0xff]  ;;  %v955_v62 = vld [vmem:[#allocation5 + $0x1c98] sm:$0xff] }
 0x13a   :  { %v987_v63 = vld [vmem:[#allocation5 + $0x1d98] sm:$0xff] }
 0x13b   :  { %2923 = vmatpush1.bf16.msra.mxu0 %v2922_v11  ;;  %v2942_v11 = vpack.c.bf16 %v664_v3, %v632_v2  ;;  %v952_v2 = vld [vmem:[#allocation5 + $0x1c80] sm:$0xff] }
 0x13c   :  { %2987 = vmatpush1.bf16.msra.mxu1 %v2986_v12  ;;  %2925 = vmatprep.subr.bf16.mxu0 %v2924_v13  ;;  %v3006_v12 = vpack.c.bf16 %v666_v6, %v634_v4  ;;  %v2944_v13 = vpack.c.bf16 %v729_v8, %v697_v7  ;;  %v984_v3 = vld [vmem:[#allocation5 + $0x1d80] sm:$0xff]  ;;  %v954_v4 = vld [vmem:[#allocation5 + $0x1c90] sm:$0xff]  ;;  %v1017_v7 = vld [vmem:[#allocation5 + $0x1e88] sm:$0xff] }
 0x13d   :  { %v3616_v31 = vpop.f32.mrb[0].mxu0  ;;  %2989 = vmatprep.subr.bf16.mxu1 %v2988_v19  ;;  %v3008_v19 = vpack.c.bf16 %v731_v10, %v699_v9  ;;  %v986_v6 = vld [vmem:[#allocation5 + $0x1d90] sm:$0xff]  ;;  %v1049_v8 = vld [vmem:[#allocation5 + $0x1f88] sm:$0xff]  ;;  %v1019_v9 = vld [vmem:[#allocation5 + $0x1e98] sm:$0xff] }
 0x13e   :  { %v3618_v37 = vpop.f32.mrb[0].mxu1  ;;  %v3620_v38 = vpop.f32.mrb[1].mxu0  ;;  %v1051_v10 = vld [vmem:[#allocation5 + $0x1f98] sm:$0xff] }
 0x13f   :  { %v3622_v41 = vpop.f32.mrb[1].mxu1  ;;  %2927 = vmatpush1.bf16.msra.mxu0 %v2926_v25  ;;  %v2946_v25 = vpack.c.bf16 %v728_v17, %v696_v14  ;;  %v1016_v14 = vld [vmem:[#allocation5 + $0x1e80] sm:$0xff] }
 0x140   :  { %2991 = vmatpush1.bf16.msra.mxu1 %v2990_v26  ;;  %2929 = vmatprep.subr.bf16.mxu0 %v2928_v27  ;;  %v3010_v26 = vpack.c.bf16 %v730_v20, %v698_v18  ;;  %v2948_v27 = vpack.c.bf16 %v793_v22, %v761_v21  ;;  %v1048_v17 = vld [vmem:[#allocation5 + $0x1f80] sm:$0xff]  ;;  %v1018_v18 = vld [vmem:[#allocation5 + $0x1e90] sm:$0xff]  ;;  %v61_v21 = vld [vmem:[#allocation5 + $0xa8] sm:$0xff] }
 0x141   :  { %2993 = vmatprep.subr.bf16.mxu1 %v2992_v32  ;;  %v3012_v32 = vpack.c.bf16 %v795_v24, %v763_v23  ;;  %v1050_v20 = vld [vmem:[#allocation5 + $0x1f90] sm:$0xff]  ;;  %v93_v22 = vld [vmem:[#allocation5 + $0x1a8] sm:$0xff]  ;;  %v63_v23 = vld [vmem:[#allocation5 + $0xb8] sm:$0xff] }
 0x142   :  { %v95_v24 = vld [vmem:[#allocation5 + $0x1b8] sm:$0xff] }
 0x143   :  { %2931 = vmatpush1.bf16.msra.mxu0 %v2930_v42  ;;  %v2950_v42 = vpack.c.bf16 %v792_v29, %v760_v28  ;;  %v60_v28 = vld [vmem:[#allocation5 + $0xa0] sm:$0xff] }
 0x144   :  { %2995 = vmatpush1.bf16.msra.mxu1 %v2994_v43  ;;  %2933 = vmatprep.subr.bf16.mxu0 %v2932_v44  ;;  %v3014_v43 = vpack.c.bf16 %v794_v34, %v762_v30  ;;  %v2952_v44 = vpack.c.bf16 %v857_v36, %v825_v35  ;;  %v92_v29 = vld [vmem:[#allocation5 + $0x1a0] sm:$0xff]  ;;  %v62_v30 = vld [vmem:[#allocation5 + $0xb0] sm:$0xff]  ;;  %v125_v35 = vld [vmem:[#allocation5 + $0x2a8] sm:$0xff] }
 0x145   :  { %2997 = vmatprep.subr.bf16.mxu1 %v2996_v48  ;;  %v3016_v48 = vpack.c.bf16 %v859_v40, %v827_v39  ;;  %v94_v34 = vld [vmem:[#allocation5 + $0x1b0] sm:$0xff]  ;;  %v157_v36 = vld [vmem:[#allocation5 + $0x3a8] sm:$0xff]  ;;  %v127_v39 = vld [vmem:[#allocation5 + $0x2b8] sm:$0xff] }
 0x146   :  { %v159_v40 = vld [vmem:[#allocation5 + $0x3b8] sm:$0xff] }
 0x147   :  { %2935 = vmatpush1.bf16.msra.mxu0 %v2934_v33  ;;  %v2954_v33 = vpack.c.bf16 %v856_v15, %v824_v45  ;;  %v124_v45 = vld [vmem:[#allocation5 + $0x2a0] sm:$0xff] }
 0x148   :  { %2999 = vmatpush1.bf16.msra.mxu1 %v2998_v54  ;;  %2937 = vmatprep.subr.bf16.mxu0 %v2936_v55  ;;  %v3018_v54 = vpack.c.bf16 %v858_v49, %v826_v47  ;;  %v2956_v55 = vpack.c.bf16 %v921_v51, %v889_v50  ;;  %v156_v15 = vld [vmem:[#allocation5 + $0x3a0] sm:$0xff]  ;;  %v126_v47 = vld [vmem:[#allocation5 + $0x2b0] sm:$0xff]  ;;  %v189_v50 = vld [vmem:[#allocation5 + $0x4a8] sm:$0xff] }
 0x149   :  { %3001 = vmatprep.subr.bf16.mxu1 %v3000_v16  ;;  %v3020_v16 = vpack.c.bf16 %v923_v53, %v891_v52  ;;  %v158_v49 = vld [vmem:[#allocation5 + $0x3b0] sm:$0xff]  ;;  %v221_v51 = vld [vmem:[#allocation5 + $0x5a8] sm:$0xff]  ;;  %v191_v53 = vld [vmem:[#allocation5 + $0x4b8] sm:$0xff] }
 0x14a   :  { %v3624_v52 = vld [vmem:[#allocation2] sm:$0xff] }
 0x14b   :  { %2939 = vmatpush1.bf16.msra.mxu0 %v2938_v0  ;;  %v2958_v0 = vpack.c.bf16 %v920_v57, %v888_v56  ;;  %v3040_v56 = vpack.c.bf16 %v221_v51, %v189_v50  ;;  %v188_v57 = vld [vmem:[#allocation5 + $0x4a0] sm:$0xff] }
 0x14c   :  { %3003 = vmatpush1.bf16.msra.mxu1 %v3002_v46  ;;  %2941 = vmatprep.subr.bf16.mxu0 %v2940_v1  ;;  %v3022_v46 = vpack.c.bf16 %v922_v59, %v890_v58  ;;  %v2960_v1 = vpack.c.bf16 %v985_v61, %v953_v60  ;;  %v220_v58 = vld [vmem:[#allocation5 + $0x5a0] sm:$0xff]  ;;  %v222_v60 = vld [vmem:[#allocation5 + $0x5b0] sm:$0xff]  ;;  %v253_v61 = vld [vmem:[#allocation5 + $0x6a8] sm:$0xff] }
 0x14d   :  { %3005 = vmatprep.subr.bf16.mxu1 %v3004_v5  ;;  %v3024_v5 = vpack.c.bf16 %v987_v63, %v955_v62  ;;  %v285_v62 = vld [vmem:[#allocation5 + $0x7a8] sm:$0xff]  ;;  %v3628_v63 = vld [vmem:[#allocation2 + $0x8] sm:$0xff] }
 0x14f   :  { %2943 = vmatpush1.bf16.msra.mxu0 %v2942_v11  ;;  %v2962_v11 = vpack.c.bf16 %v984_v3, %v952_v2  ;;  %v3044_v3 = vpack.c.bf16 %v285_v62, %v253_v61  ;;  %v508_v62 = vld [vmem:[#allocation5 + $0xea0] sm:$0xff] }
 0x150   :  { %3007 = vmatpush1.bf16.msra.mxu1 %v3006_v12  ;;  %2945 = vmatprep.subr.bf16.mxu0 %v2944_v13  ;;  %v3026_v12 = vpack.c.bf16 %v986_v6, %v954_v4  ;;  %v2964_v13 = vpack.c.bf16 %v1049_v8, %v1017_v7  ;;  %v252_v4 = vld [vmem:[#allocation5 + $0x6a0] sm:$0xff]  ;;  %v254_v6 = vld [vmem:[#allocation5 + $0x6b0] sm:$0xff] }
 0x151   :  { %3009 = vmatprep.subr.bf16.mxu1 %v3008_v19  ;;  %v3028_v19 = vpack.c.bf16 %v1051_v10, %v1019_v9  ;;  %v286_v8 = vld [vmem:[#allocation5 + $0x7b0] sm:$0xff]  ;;  %v317_v9 = vld [vmem:[#allocation5 + $0x8a8] sm:$0xff] }
 0x152   :  { %v349_v10 = vld [vmem:[#allocation5 + $0x9a8] sm:$0xff] }
 0x153   :  { %2947 = vmatpush1.bf16.msra.mxu0 %v2946_v25  ;;  %v2966_v25 = vpack.c.bf16 %v1048_v17, %v1016_v14  ;;  %v3110_v14 = vpack.c.bf16 %v286_v8, %v254_v6  ;;  %v3048_v17 = vpack.c.bf16 %v349_v10, %v317_v9  ;;  %v607_v6 = vld [vmem:[#allocation5 + $0x11b8] sm:$0xff]  ;;  %v572_v10 = vld [vmem:[#allocation5 + $0x10a0] sm:$0xff] }
 0x154   :  { %3011 = vmatpush1.bf16.msra.mxu1 %v3010_v26  ;;  %2949 = vmatprep.subr.bf16.mxu0 %v2948_v27  ;;  %v3030_v26 = vpack.c.bf16 %v1050_v20, %v1018_v18  ;;  %v3032_v27 = vpack.c.bf16 %v93_v22, %v61_v21  ;;  %v316_v18 = vld [vmem:[#allocation5 + $0x8a0] sm:$0xff]  ;;  %v318_v20 = vld [vmem:[#allocation5 + $0x8b0] sm:$0xff] }
 0x155   :  { %3013 = vmatprep.subr.bf16.mxu1 %v3012_v32  ;;  %v3096_v32 = vpack.c.bf16 %v95_v24, %v63_v23  ;;  %v350_v22 = vld [vmem:[#allocation5 + $0x9b0] sm:$0xff]  ;;  %v381_v23 = vld [vmem:[#allocation5 + $0xaa8] sm:$0xff] }
 0x156   :  { %v413_v24 = vld [vmem:[#allocation5 + $0xba8] sm:$0xff] }
 0x157   :  { %2951 = vmatpush1.bf16.msra.mxu0 %v2950_v42  ;;  %v3034_v42 = vpack.c.bf16 %v92_v29, %v60_v28  ;;  %v3114_v28 = vpack.c.bf16 %v350_v22, %v318_v20  ;;  %v3052_v29 = vpack.c.bf16 %v413_v24, %v381_v23  ;;  %v671_v20 = vld [vmem:[#allocation5 + $0x13b8] sm:$0xff]  ;;  %v636_v24 = vld [vmem:[#allocation5 + $0x12a0] sm:$0xff] }
 0x158   :  { %3015 = vmatpush1.bf16.msra.mxu1 %v3014_v43  ;;  %2953 = vmatprep.subr.bf16.mxu0 %v2952_v44  ;;  %v3098_v43 = vpack.c.bf16 %v94_v34, %v62_v30  ;;  %v3036_v44 = vpack.c.bf16 %v157_v36, %v125_v35  ;;  %v380_v30 = vld [vmem:[#allocation5 + $0xaa0] sm:$0xff]  ;;  %v382_v34 = vld [vmem:[#allocation5 + $0xab0] sm:$0xff] }
 0x159   :  { %3017 = vmatprep.subr.bf16.mxu1 %v3016_v48  ;;  %v3100_v48 = vpack.c.bf16 %v159_v40, %v127_v39  ;;  %v414_v36 = vld [vmem:[#allocation5 + $0xbb0] sm:$0xff]  ;;  %v445_v39 = vld [vmem:[#allocation5 + $0xca8] sm:$0xff] }
 0x15a   :  { %v477_v40 = vld [vmem:[#allocation5 + $0xda8] sm:$0xff] }
 0x15b   :  { %2955 = vmatpush1.bf16.msra.mxu0 %v2954_v33  ;;  %v223_v33 = vld [vmem:[#allocation5 + $0x5b8] sm:$0xff] }
 0x15c   :  { %3019 = vmatpush1.bf16.msra.mxu1 %v3018_v54  ;;  %2957 = vmatprep.subr.bf16.mxu0 %v2956_v55  ;;  %v3038_v54 = vpack.c.bf16 %v156_v15, %v124_v45  ;;  %v3102_v55 = vpack.c.bf16 %v158_v49, %v126_v47  ;;  %v3104_v59 = vpack.c.bf16 %v223_v33, %v191_v53  ;;  %v444_v47 = vld [vmem:[#allocation5 + $0xca0] sm:$0xff]  ;;  %v446_v49 = vld [vmem:[#allocation5 + $0xcb0] sm:$0xff]  ;;  %v509_v33 = vld [vmem:[#allocation5 + $0xea8] sm:$0xff] }
 0x15d   :  { %3021 = vmatprep.subr.bf16.mxu1 %v3020_v16  ;;  %v190_v16 = vld [vmem:[#allocation5 + $0x4b0] sm:$0xff]  ;;  %v3118_v45 = vpack.c.bf16 %v414_v36, %v382_v34  ;;  %v3056_v15 = vpack.c.bf16 %v477_v40, %v445_v39  ;;  %v735_v34 = vld [vmem:[#allocation5 + $0x15b8] sm:$0xff]  ;;  %v700_v40 = vld [vmem:[#allocation5 + $0x14a0] sm:$0xff] }
 0x15e   :  { %v3106_v2 = vpack.c.bf16 %v222_v60, %v190_v16  ;;  %v478_v53 = vld [vmem:[#allocation5 + $0xdb0] sm:$0xff] }
 0x15f   :  { %2959 = vmatpush1.bf16.msra.mxu0 %v2958_v0  ;;  %v255_v0 = vld [vmem:[#allocation5 + $0x6b8] sm:$0xff]  ;;  %v3122_v60 = vpack.c.bf16 %v478_v53, %v446_v49 }
 0x160   :  { %3023 = vmatpush1.bf16.msra.mxu1 %v3022_v46  ;;  %2961 = vmatprep.subr.bf16.mxu0 %v2960_v1  ;;  %v287_v46 = vld [vmem:[#allocation5 + $0x7b8] sm:$0xff]  ;;  %v3042_v1 = vpack.c.bf16 %v220_v58, %v188_v57 }
 0x161   :  { %3025 = vmatprep.subr.bf16.mxu1 %v3024_v5  ;;  %v284_v5 = vld [vmem:[#allocation5 + $0x7a0] sm:$0xff]  ;;  %v3108_v7 = vpack.c.bf16 %v287_v46, %v255_v0  ;;  %v511_v57 = vld [vmem:[#allocation5 + $0xeb8] sm:$0xff]  ;;  %v510_v46 = vld [vmem:[#allocation5 + $0xeb0] sm:$0xff] }
 0x162   :  { %v543_v58 = vld [vmem:[#allocation5 + $0xfb8] sm:$0xff]  ;;  %v540_v0 = vld [vmem:[#allocation5 + $0xfa0] sm:$0xff] }
 0x163   :  { %2963 = vmatpush1.bf16.msra.mxu0 %v2962_v11  ;;  %v319_v11 = vld [vmem:[#allocation5 + $0x8b8] sm:$0xff] }
 0x164   :  { %3027 = vmatpush1.bf16.msra.mxu1 %v3026_v12  ;;  %2965 = vmatprep.subr.bf16.mxu0 %v2964_v13  ;;  %v351_v12 = vld [vmem:[#allocation5 + $0x9b8] sm:$0xff]  ;;  %v3046_v13 = vpack.c.bf16 %v284_v5, %v252_v4  ;;  %v605_v4 = vld [vmem:[#allocation5 + $0x11a8] sm:$0xff] }
 0x165   :  { %3029 = vmatprep.subr.bf16.mxu1 %v3028_v19  ;;  %v348_v19 = vld [vmem:[#allocation5 + $0x9a0] sm:$0xff]  ;;  %v3112_v21 = vpack.c.bf16 %v351_v12, %v319_v11  ;;  %v575_v5 = vld [vmem:[#allocation5 + $0x10b8] sm:$0xff]  ;;  %v574_v12 = vld [vmem:[#allocation5 + $0x10b0] sm:$0xff] }
 0x166   :  { %v604_v11 = vld [vmem:[#allocation5 + $0x11a0] sm:$0xff]  ;;  %v799_v49 = vld [vmem:[#allocation5 + $0x17b8] sm:$0xff] }
 0x167   :  { %2967 = vmatpush1.bf16.msra.mxu0 %v2966_v25  ;;  %v383_v25 = vld [vmem:[#allocation5 + $0xab8] sm:$0xff] }
 0x168   :  { %3031 = vmatpush1.bf16.msra.mxu1 %v3030_v26  ;;  %3033 = vmatprep.subr.bf16.mxu0 %v3032_v27  ;;  %v415_v26 = vld [vmem:[#allocation5 + $0xbb8] sm:$0xff]  ;;  %v3050_v27 = vpack.c.bf16 %v348_v19, %v316_v18  ;;  %v669_v18 = vld [vmem:[#allocation5 + $0x13a8] sm:$0xff] }
 0x169   :  { %3097 = vmatprep.subr.bf16.mxu1 %v3096_v32  ;;  %v412_v32 = vld [vmem:[#allocation5 + $0xba0] sm:$0xff]  ;;  %v3116_v35 = vpack.c.bf16 %v415_v26, %v383_v25  ;;  %v639_v19 = vld [vmem:[#allocation5 + $0x12b8] sm:$0xff]  ;;  %v638_v26 = vld [vmem:[#allocation5 + $0x12b0] sm:$0xff] }
 0x16a   :  { %1697 = vmatmul.mubr.f32.vlgmr.msra.gmra.mrb[8].mxu0 %v3624_v52  ;;  %v668_v25 = vld [vmem:[#allocation5 + $0x13a0] sm:$0xff] }
 0x16b   :  { %1768 = vmatmul.mubr.f32.vlgmr.msra.gmra.mrb[8].mxu1 %v3624_v52  ;;  %3035 = vmatpush1.bf16.msra.mxu0 %v3034_v42  ;;  %v447_v42 = vld [vmem:[#allocation5 + $0xcb8] sm:$0xff] }
 0x16c   :  { %3099 = vmatpush1.bf16.msra.mxu1 %v3098_v43  ;;  %3037 = vmatprep.subr.bf16.mxu0 %v3036_v44  ;;  %v479_v43 = vld [vmem:[#allocation5 + $0xdb8] sm:$0xff]  ;;  %v3054_v44 = vpack.c.bf16 %v412_v32, %v380_v30  ;;  %v733_v30 = vld [vmem:[#allocation5 + $0x15a8] sm:$0xff] }
 0x16d   :  { %3101 = vmatprep.subr.bf16.mxu1 %v3100_v48  ;;  %1838 = vmatprep.mubr.f32.mxu0 %v3628_v63  ;;  %v476_v48 = vld [vmem:[#allocation5 + $0xda0] sm:$0xff]  ;;  %v3120_v51 = vpack.c.bf16 %v479_v43, %v447_v42  ;;  %v703_v32 = vld [vmem:[#allocation5 + $0x14b8] sm:$0xff]  ;;  %v702_v43 = vld [vmem:[#allocation5 + $0x14b0] sm:$0xff] }
 0x16e   :  { %1909 = vmatprep.mubr.f32.mxu1 %v3628_v63  ;;  %v732_v42 = vld [vmem:[#allocation5 + $0x15a0] sm:$0xff] }
 0x16f   :  { %3039 = vmatpush1.bf16.msra.mxu0 %v3038_v54  ;;  %v541_v54 = vld [vmem:[#allocation5 + $0xfa8] sm:$0xff] }
 0x170   :  { %3103 = vmatpush1.bf16.msra.mxu1 %v3102_v55  ;;  %3041 = vmatprep.subr.bf16.mxu0 %v3040_v56  ;;  %v3060_v61 = vpack.c.bf16 %v541_v54, %v509_v33  ;;  %v764_v54 = vld [vmem:[#allocation5 + $0x16a0] sm:$0xff] }
 0x171   :  { %3105 = vmatprep.subr.bf16.mxu1 %v3104_v59  ;;  %v3058_v59 = vpack.c.bf16 %v476_v48, %v444_v47  ;;  %v797_v47 = vld [vmem:[#allocation5 + $0x17a8] sm:$0xff]  ;;  %v767_v48 = vld [vmem:[#allocation5 + $0x16b8] sm:$0xff] }
 0x173   :  { %3043 = vmatpush1.bf16.msra.mxu0 %v3042_v1  ;;  %v3124_v1 = vpack.c.bf16 %v543_v58, %v511_v57  ;;  %v796_v57 = vld [vmem:[#allocation5 + $0x17a0] sm:$0xff]  ;;  %v766_v58 = vld [vmem:[#allocation5 + $0x16b0] sm:$0xff] }
 0x174   :  { %3107 = vmatpush1.bf16.msra.mxu1 %v3106_v2  ;;  %3045 = vmatprep.subr.bf16.mxu0 %v3044_v3  ;;  %v542_v2 = vld [vmem:[#allocation5 + $0xfb0] sm:$0xff]  ;;  %v573_v3 = vld [vmem:[#allocation5 + $0x10a8] sm:$0xff] }
 0x175   :  { %3109 = vmatprep.subr.bf16.mxu1 %v3108_v7  ;;  %v3062_v7 = vpack.c.bf16 %v540_v0, %v508_v62  ;;  %v3126_v8 = vpack.c.bf16 %v542_v2, %v510_v46  ;;  %v3064_v9 = vpack.c.bf16 %v605_v4, %v573_v3  ;;  %v861_v62 = vld [vmem:[#allocation5 + $0x19a8] sm:$0xff]  ;;  %v831_v0 = vld [vmem:[#allocation5 + $0x18b8] sm:$0xff]  ;;  %v828_v4 = vld [vmem:[#allocation5 + $0x18a0] sm:$0xff] }
 0x176   :  { %v863_v46 = vld [vmem:[#allocation5 + $0x19b8] sm:$0xff] }
 0x177   :  { %3047 = vmatpush1.bf16.msra.mxu0 %v3046_v13  ;;  %v3128_v13 = vpack.c.bf16 %v607_v6, %v575_v5  ;;  %v860_v5 = vld [vmem:[#allocation5 + $0x19a0] sm:$0xff]  ;;  %v830_v6 = vld [vmem:[#allocation5 + $0x18b0] sm:$0xff] }
 0x178   :  { %3111 = vmatpush1.bf16.msra.mxu1 %v3110_v14  ;;  %3049 = vmatprep.subr.bf16.mxu0 %v3048_v17  ;;  %v606_v14 = vld [vmem:[#allocation5 + $0x11b0] sm:$0xff]  ;;  %v637_v17 = vld [vmem:[#allocation5 + $0x12a8] sm:$0xff] }
 0x179   :  { %3113 = vmatprep.subr.bf16.mxu1 %v3112_v21  ;;  %v3066_v21 = vpack.c.bf16 %v604_v11, %v572_v10  ;;  %v3130_v22 = vpack.c.bf16 %v606_v14, %v574_v12  ;;  %v3068_v23 = vpack.c.bf16 %v669_v18, %v637_v17  ;;  %v925_v10 = vld [vmem:[#allocation5 + $0x1ba8] sm:$0xff]  ;;  %v895_v11 = vld [vmem:[#allocation5 + $0x1ab8] sm:$0xff]  ;;  %v892_v18 = vld [vmem:[#allocation5 + $0x1aa0] sm:$0xff] }
 0x17a   :  { %v927_v12 = vld [vmem:[#allocation5 + $0x1bb8] sm:$0xff] }
 0x17b   :  { %3051 = vmatpush1.bf16.msra.mxu0 %v3050_v27  ;;  %v3132_v27 = vpack.c.bf16 %v671_v20, %v639_v19  ;;  %v924_v19 = vld [vmem:[#allocation5 + $0x1ba0] sm:$0xff]  ;;  %v894_v20 = vld [vmem:[#allocation5 + $0x1ab0] sm:$0xff] }
 0x17c   :  { %3115 = vmatpush1.bf16.msra.mxu1 %v3114_v28  ;;  %3053 = vmatprep.subr.bf16.mxu0 %v3052_v29  ;;  %v670_v28 = vld [vmem:[#allocation5 + $0x13b0] sm:$0xff]  ;;  %v701_v29 = vld [vmem:[#allocation5 + $0x14a8] sm:$0xff] }
 0x17d   :  { %v3632_v50 = vpop.f32.mrb[2].mxu0  ;;  %3117 = vmatprep.subr.bf16.mxu1 %v3116_v35  ;;  %v3070_v35 = vpack.c.bf16 %v668_v25, %v636_v24  ;;  %v3134_v36 = vpack.c.bf16 %v670_v28, %v638_v26  ;;  %v3072_v39 = vpack.c.bf16 %v733_v30, %v701_v29  ;;  %v989_v24 = vld [vmem:[#allocation5 + $0x1da8] sm:$0xff]  ;;  %v959_v25 = vld [vmem:[#allocation5 + $0x1cb8] sm:$0xff]  ;;  %v956_v30 = vld [vmem:[#allocation5 + $0x1ca0] sm:$0xff] }
 0x17e   :  { %v3634_v55 = vpop.f32.mrb[2].mxu1  ;;  %v3636_v56 = vpop.f32.mrb[3].mxu0  ;;  %v991_v26 = vld [vmem:[#allocation5 + $0x1db8] sm:$0xff] }
 0x17f   :  { %v3638_v16 = vpop.f32.mrb[3].mxu1  ;;  %3055 = vmatpush1.bf16.msra.mxu0 %v3054_v44  ;;  %v3136_v44 = vpack.c.bf16 %v735_v34, %v703_v32  ;;  %v988_v32 = vld [vmem:[#allocation5 + $0x1da0] sm:$0xff]  ;;  %v958_v34 = vld [vmem:[#allocation5 + $0x1cb0] sm:$0xff] }
 0x180   :  { %3119 = vmatpush1.bf16.msra.mxu1 %v3118_v45  ;;  %3057 = vmatprep.subr.bf16.mxu0 %v3056_v15  ;;  %v734_v45 = vld [vmem:[#allocation5 + $0x15b0] sm:$0xff]  ;;  %v765_v15 = vld [vmem:[#allocation5 + $0x16a8] sm:$0xff] }
 0x181   :  { %3121 = vmatprep.subr.bf16.mxu1 %v3120_v51  ;;  %v3074_v51 = vpack.c.bf16 %v732_v42, %v700_v40  ;;  %v3138_v53 = vpack.c.bf16 %v734_v45, %v702_v43  ;;  %v3076_v33 = vpack.c.bf16 %v797_v47, %v765_v15  ;;  %v1053_v40 = vld [vmem:[#allocation5 + $0x1fa8] sm:$0xff]  ;;  %v1023_v42 = vld [vmem:[#allocation5 + $0x1eb8] sm:$0xff]  ;;  %v1020_v47 = vld [vmem:[#allocation5 + $0x1ea0] sm:$0xff] }
 0x182   :  { %v1055_v43 = vld [vmem:[#allocation5 + $0x1fb8] sm:$0xff] }
 0x183   :  { %3059 = vmatpush1.bf16.msra.mxu0 %v3058_v59  ;;  %v3140_v59 = vpack.c.bf16 %v799_v49, %v767_v48  ;;  %v1052_v48 = vld [vmem:[#allocation5 + $0x1fa0] sm:$0xff]  ;;  %v1022_v49 = vld [vmem:[#allocation5 + $0x1eb0] sm:$0xff] }
 0x184   :  { %3123 = vmatpush1.bf16.msra.mxu1 %v3122_v60  ;;  %3061 = vmatprep.subr.bf16.mxu0 %v3060_v61  ;;  %v798_v60 = vld [vmem:[#allocation5 + $0x17b0] sm:$0xff]  ;;  %v829_v61 = vld [vmem:[#allocation5 + $0x18a8] sm:$0xff] }
 0x185   :  { %3125 = vmatprep.subr.bf16.mxu1 %v3124_v1  ;;  %v3078_v1 = vpack.c.bf16 %v796_v57, %v764_v54  ;;  %v3142_v2 = vpack.c.bf16 %v798_v60, %v766_v58  ;;  %v3080_v3 = vpack.c.bf16 %v861_v62, %v829_v61  ;;  %v97_v54 = vld [vmem:[#allocation5 + $0x1c8] sm:$0xff]  ;;  %v67_v57 = vld [vmem:[#allocation5 + $0xd8] sm:$0xff]  ;;  %v64_v62 = vld [vmem:[#allocation5 + $0xc0] sm:$0xff] }
 0x186   :  { %v99_v58 = vld [vmem:[#allocation5 + $0x1d8] sm:$0xff] }
 0x187   :  { %3063 = vmatpush1.bf16.msra.mxu0 %v3062_v7  ;;  %v3144_v7 = vpack.c.bf16 %v863_v46, %v831_v0  ;;  %v96_v0 = vld [vmem:[#allocation5 + $0x1c0] sm:$0xff]  ;;  %v66_v46 = vld [vmem:[#allocation5 + $0xd0] sm:$0xff] }
 0x188   :  { %3127 = vmatpush1.bf16.msra.mxu1 %v3126_v8  ;;  %3065 = vmatprep.subr.bf16.mxu0 %v3064_v9  ;;  %v862_v8 = vld [vmem:[#allocation5 + $0x19b0] sm:$0xff]  ;;  %v893_v9 = vld [vmem:[#allocation5 + $0x1aa8] sm:$0xff] }
 0x189   :  { %3129 = vmatprep.subr.bf16.mxu1 %v3128_v13  ;;  %v3082_v13 = vpack.c.bf16 %v860_v5, %v828_v4  ;;  %v3146_v14 = vpack.c.bf16 %v862_v8, %v830_v6  ;;  %v3084_v17 = vpack.c.bf16 %v925_v10, %v893_v9  ;;  %v161_v4 = vld [vmem:[#allocation5 + $0x3c8] sm:$0xff]  ;;  %v131_v5 = vld [vmem:[#allocation5 + $0x2d8] sm:$0xff]  ;;  %v128_v10 = vld [vmem:[#allocation5 + $0x2c0] sm:$0xff] }
 0x18a   :  { %v163_v6 = vld [vmem:[#allocation5 + $0x3d8] sm:$0xff] }
 0x18b   :  { %3067 = vmatpush1.bf16.msra.mxu0 %v3066_v21  ;;  %v3148_v21 = vpack.c.bf16 %v927_v12, %v895_v11  ;;  %v160_v11 = vld [vmem:[#allocation5 + $0x3c0] sm:$0xff]  ;;  %v130_v12 = vld [vmem:[#allocation5 + $0x2d0] sm:$0xff] }
 0x18c   :  { %3131 = vmatpush1.bf16.msra.mxu1 %v3130_v22  ;;  %3069 = vmatprep.subr.bf16.mxu0 %v3068_v23  ;;  %v926_v22 = vld [vmem:[#allocation5 + $0x1bb0] sm:$0xff]  ;;  %v957_v23 = vld [vmem:[#allocation5 + $0x1ca8] sm:$0xff] }
 0x18d   :  { %3133 = vmatprep.subr.bf16.mxu1 %v3132_v27  ;;  %v3086_v27 = vpack.c.bf16 %v924_v19, %v892_v18  ;;  %v3150_v28 = vpack.c.bf16 %v926_v22, %v894_v20  ;;  %v3088_v29 = vpack.c.bf16 %v989_v24, %v957_v23  ;;  %v225_v18 = vld [vmem:[#allocation5 + $0x5c8] sm:$0xff]  ;;  %v195_v19 = vld [vmem:[#allocation5 + $0x4d8] sm:$0xff]  ;;  %v192_v24 = vld [vmem:[#allocation5 + $0x4c0] sm:$0xff] }
 0x18e   :  { %v227_v20 = vld [vmem:[#allocation5 + $0x5d8] sm:$0xff] }
 0x18f   :  { %3071 = vmatpush1.bf16.msra.mxu0 %v3070_v35  ;;  %v3152_v35 = vpack.c.bf16 %v991_v26, %v959_v25  ;;  %v224_v25 = vld [vmem:[#allocation5 + $0x5c0] sm:$0xff]  ;;  %v194_v26 = vld [vmem:[#allocation5 + $0x4d0] sm:$0xff] }
 0x190   :  { %3135 = vmatpush1.bf16.msra.mxu1 %v3134_v36  ;;  %3073 = vmatprep.subr.bf16.mxu0 %v3072_v39  ;;  %v990_v36 = vld [vmem:[#allocation5 + $0x1db0] sm:$0xff]  ;;  %v1021_v39 = vld [vmem:[#allocation5 + $0x1ea8] sm:$0xff] }
 0x191   :  { %3137 = vmatprep.subr.bf16.mxu1 %v3136_v44  ;;  %v3090_v44 = vpack.c.bf16 %v988_v32, %v956_v30  ;;  %v3154_v45 = vpack.c.bf16 %v990_v36, %v958_v34  ;;  %v3092_v15 = vpack.c.bf16 %v1053_v40, %v1021_v39  ;;  %v289_v30 = vld [vmem:[#allocation5 + $0x7c8] sm:$0xff]  ;;  %v259_v32 = vld [vmem:[#allocation5 + $0x6d8] sm:$0xff]  ;;  %v256_v39 = vld [vmem:[#allocation5 + $0x6c0] sm:$0xff] }
 0x192   :  { %v291_v34 = vld [vmem:[#allocation5 + $0x7d8] sm:$0xff]  ;;  %v288_v40 = vld [vmem:[#allocation5 + $0x7c0] sm:$0xff] }
 0x193   :  { %3075 = vmatpush1.bf16.msra.mxu0 %v3074_v51  ;;  %v3156_v51 = vpack.c.bf16 %v1055_v43, %v1023_v42  ;;  %v258_v42 = vld [vmem:[#allocation5 + $0x6d0] sm:$0xff]  ;;  %v3236_v43 = vpack.c.bf16 %v291_v34, %v259_v32 }
 0x194   :  { %3139 = vmatpush1.bf16.msra.mxu1 %v3138_v53  ;;  %3077 = vmatprep.subr.bf16.mxu0 %v3076_v33  ;;  %v1054_v53 = vld [vmem:[#allocation5 + $0x1fb0] sm:$0xff]  ;;  %v65_v33 = vld [vmem:[#allocation5 + $0xc8] sm:$0xff] }
 0x195   :  { %3141 = vmatprep.subr.bf16.mxu1 %v3140_v59  ;;  %v3094_v59 = vpack.c.bf16 %v1052_v48, %v1020_v47  ;;  %v3158_v60 = vpack.c.bf16 %v1054_v53, %v1022_v49  ;;  %v3160_v61 = vpack.c.bf16 %v97_v54, %v65_v33  ;;  %v323_v47 = vld [vmem:[#allocation5 + $0x8d8] sm:$0xff]  ;;  %v3174_v49 = vpack.c.bf16 %v288_v40, %v256_v39  ;;  %v320_v53 = vld [vmem:[#allocation5 + $0x8c0] sm:$0xff]  ;;  %v322_v54 = vld [vmem:[#allocation5 + $0x8d0] sm:$0xff] }
 0x196   :  { %v355_v48 = vld [vmem:[#allocation5 + $0x9d8] sm:$0xff]  ;;  %v352_v33 = vld [vmem:[#allocation5 + $0x9c0] sm:$0xff]  ;;  %v514_v40 = vld [vmem:[#allocation5 + $0xed0] sm:$0xff] }
 0x197   :  { %3079 = vmatpush1.bf16.msra.mxu0 %v3078_v1  ;;  %v3224_v1 = vpack.c.bf16 %v99_v58, %v67_v57  ;;  %v3240_v57 = vpack.c.bf16 %v355_v48, %v323_v47  ;;  %v354_v58 = vld [vmem:[#allocation5 + $0x9d0] sm:$0xff]  ;;  %v544_v39 = vld [vmem:[#allocation5 + $0xfc0] sm:$0xff] }
 0x198   :  { %3143 = vmatpush1.bf16.msra.mxu1 %v3142_v2  ;;  %3081 = vmatprep.subr.bf16.mxu0 %v3080_v3  ;;  %v98_v2 = vld [vmem:[#allocation5 + $0x1d0] sm:$0xff]  ;;  %v129_v3 = vld [vmem:[#allocation5 + $0x2c8] sm:$0xff]  ;;  %v576_v48 = vld [vmem:[#allocation5 + $0x10c0] sm:$0xff] }
 0x199   :  { %3145 = vmatprep.subr.bf16.mxu1 %v3144_v7  ;;  %v3162_v7 = vpack.c.bf16 %v96_v0, %v64_v62  ;;  %v3226_v8 = vpack.c.bf16 %v98_v2, %v66_v46  ;;  %v3164_v9 = vpack.c.bf16 %v161_v4, %v129_v3  ;;  %v419_v62 = vld [vmem:[#allocation5 + $0xbd8] sm:$0xff]  ;;  %v3178_v0 = vpack.c.bf16 %v352_v33, %v320_v53  ;;  %v384_v2 = vld [vmem:[#allocation5 + $0xac0] sm:$0xff]  ;;  %v386_v4 = vld [vmem:[#allocation5 + $0xad0] sm:$0xff] }
 0x19a   :  { %v3242_v46 = vpack.c.bf16 %v354_v58, %v322_v54  ;;  %v416_v3 = vld [vmem:[#allocation5 + $0xbc0] sm:$0xff]  ;;  %v610_v53 = vld [vmem:[#allocation5 + $0x11d0] sm:$0xff]  ;;  %v641_v33 = vld [vmem:[#allocation5 + $0x12c8] sm:$0xff] }
 0x19b   :  { %3083 = vmatpush1.bf16.msra.mxu0 %v3082_v13  ;;  %v3228_v13 = vpack.c.bf16 %v163_v6, %v131_v5  ;;  %v418_v6 = vld [vmem:[#allocation5 + $0xbd0] sm:$0xff]  ;;  %v673_v54 = vld [vmem:[#allocation5 + $0x13c8] sm:$0xff]  ;;  %v675_v58 = vld [vmem:[#allocation5 + $0x13d8] sm:$0xff] }
 0x19c   :  { %3147 = vmatpush1.bf16.msra.mxu1 %v3146_v14  ;;  %3085 = vmatprep.subr.bf16.mxu0 %v3084_v17  ;;  %v162_v14 = vld [vmem:[#allocation5 + $0x3d0] sm:$0xff]  ;;  %v193_v17 = vld [vmem:[#allocation5 + $0x4c8] sm:$0xff] }
 0x19d   :  { %3149 = vmatprep.subr.bf16.mxu1 %v3148_v21  ;;  %v3166_v21 = vpack.c.bf16 %v160_v11, %v128_v10  ;;  %v3230_v22 = vpack.c.bf16 %v162_v14, %v130_v12  ;;  %v3168_v23 = vpack.c.bf16 %v225_v18, %v193_v17  ;;  %v483_v10 = vld [vmem:[#allocation5 + $0xdd8] sm:$0xff]  ;;  %v3182_v11 = vpack.c.bf16 %v416_v3, %v384_v2  ;;  %v448_v14 = vld [vmem:[#allocation5 + $0xcc0] sm:$0xff]  ;;  %v450_v18 = vld [vmem:[#allocation5 + $0xcd0] sm:$0xff] }
 0x19e   :  { %v3246_v12 = vpack.c.bf16 %v418_v6, %v386_v4  ;;  %v480_v17 = vld [vmem:[#allocation5 + $0xdc0] sm:$0xff]  ;;  %v674_v2 = vld [vmem:[#allocation5 + $0x13d0] sm:$0xff]  ;;  %v705_v3 = vld [vmem:[#allocation5 + $0x14c8] sm:$0xff] }
 0x19f   :  { %3087 = vmatpush1.bf16.msra.mxu0 %v3086_v27  ;;  %v3232_v27 = vpack.c.bf16 %v227_v20, %v195_v19  ;;  %v3186_v34 = vpack.c.bf16 %v480_v17, %v448_v14  ;;  %v737_v4 = vld [vmem:[#allocation5 + $0x15c8] sm:$0xff]  ;;  %v739_v6 = vld [vmem:[#allocation5 + $0x15d8] sm:$0xff]  ;;  %v738_v14 = vld [vmem:[#allocation5 + $0x15d0] sm:$0xff] }
 0x1a0   :  { %3151 = vmatpush1.bf16.msra.mxu1 %v3150_v28  ;;  %3089 = vmatprep.subr.bf16.mxu0 %v3088_v29  ;;  %v226_v28 = vld [vmem:[#allocation5 + $0x5d0] sm:$0xff]  ;;  %v257_v29 = vld [vmem:[#allocation5 + $0x6c8] sm:$0xff] }
 0x1a1   :  { %3153 = vmatprep.subr.bf16.mxu1 %v3152_v35  ;;  %v3234_v35 = vpack.c.bf16 %v226_v28, %v194_v26  ;;  %v3172_v36 = vpack.c.bf16 %v289_v30, %v257_v29  ;;  %v547_v28 = vld [vmem:[#allocation5 + $0xfd8] sm:$0xff]  ;;  %v769_v17 = vld [vmem:[#allocation5 + $0x16c8] sm:$0xff] }
 0x1a3   :  { %3091 = vmatpush1.bf16.msra.mxu0 %v3090_v44  ;;  %v290_v44 = vld [vmem:[#allocation5 + $0x7d0] sm:$0xff] }
 0x1a4   :  { %3155 = vmatpush1.bf16.msra.mxu1 %v3154_v45  ;;  %3093 = vmatprep.subr.bf16.mxu0 %v3092_v15  ;;  %v321_v45 = vld [vmem:[#allocation5 + $0x8c8] sm:$0xff] }
 0x1a5   :  { %3157 = vmatprep.subr.bf16.mxu1 %v3156_v51  ;;  %v353_v15 = vld [vmem:[#allocation5 + $0x9c8] sm:$0xff] }
 0x1a6   :  { %v3176_v51 = vpack.c.bf16 %v353_v15, %v321_v45  ;;  %v611_v45 = vld [vmem:[#allocation5 + $0x11d8] sm:$0xff] }
 0x1a7   :  { %3095 = vmatpush1.bf16.msra.mxu0 %v3094_v59  ;;  %v385_v59 = vld [vmem:[#allocation5 + $0xac8] sm:$0xff] }
 0x1a8   :  { %3159 = vmatpush1.bf16.msra.mxu1 %v3158_v60  ;;  %3161 = vmatprep.subr.bf16.mxu0 %v3160_v61  ;;  %v417_v60 = vld [vmem:[#allocation5 + $0xbc8] sm:$0xff]  ;;  %v387_v61 = vld [vmem:[#allocation5 + $0xad8] sm:$0xff] }
 0x1a9   :  { %3225 = vmatprep.subr.bf16.mxu1 %v3224_v1  ;;  %v3180_v1 = vpack.c.bf16 %v417_v60, %v385_v59  ;;  %v3244_v5 = vpack.c.bf16 %v419_v62, %v387_v61  ;;  %v3196_v61 = vpack.c.bf16 %v673_v54, %v641_v33  ;;  %v640_v62 = vld [vmem:[#allocation5 + $0x12c0] sm:$0xff]  ;;  %v898_v54 = vld [vmem:[#allocation5 + $0x1ad0] sm:$0xff] }
 0x1aa   :  { %1839 = vmatmul.mubr.f32.vlgmr.msra.gmra.mrb[10].mxu0 %v3624_v52  ;;  %v928_v33 = vld [vmem:[#allocation5 + $0x1bc0] sm:$0xff] }
 0x1ab   :  { %1910 = vmatmul.mubr.f32.vlgmr.msra.gmra.mrb[10].mxu1 %v3624_v52  ;;  %3163 = vmatpush1.bf16.msra.mxu0 %v3162_v7  ;;  %v3170_v52 = vpack.c.bf16 %v224_v25, %v192_v24  ;;  %v449_v7 = vld [vmem:[#allocation5 + $0xcc8] sm:$0xff] }
 0x1ac   :  { %3227 = vmatpush1.bf16.msra.mxu1 %v3226_v8  ;;  %3165 = vmatprep.subr.bf16.mxu0 %v3164_v9  ;;  %v481_v8 = vld [vmem:[#allocation5 + $0xdc8] sm:$0xff]  ;;  %v451_v9 = vld [vmem:[#allocation5 + $0xcd8] sm:$0xff] }
 0x1ad   :  { %3229 = vmatprep.subr.bf16.mxu1 %v3228_v13  ;;  %1980 = vmatprep.mubr.f32.mxu0 %v3628_v63  ;;  %v3184_v13 = vpack.c.bf16 %v481_v8, %v449_v7  ;;  %v3248_v20 = vpack.c.bf16 %v483_v10, %v451_v9  ;;  %v3200_v9 = vpack.c.bf16 %v737_v4, %v705_v3  ;;  %v704_v10 = vld [vmem:[#allocation5 + $0x14c0] sm:$0xff]  ;;  %v962_v4 = vld [vmem:[#allocation5 + $0x1cd0] sm:$0xff] }
 0x1ae   :  { %2051 = vmatprep.mubr.f32.mxu1 %v3628_v63  ;;  %v3238_v63 = vpack.c.bf16 %v290_v44, %v258_v42  ;;  %v609_v44 = vld [vmem:[#allocation5 + $0x11c8] sm:$0xff]  ;;  %v992_v3 = vld [vmem:[#allocation5 + $0x1dc0] sm:$0xff] }
 0x1af   :  { %3167 = vmatpush1.bf16.msra.mxu0 %v3166_v21  ;;  %v482_v21 = vld [vmem:[#allocation5 + $0xdd0] sm:$0xff] }
 0x1b0   :  { %3231 = vmatpush1.bf16.msra.mxu1 %v3230_v22  ;;  %3169 = vmatprep.subr.bf16.mxu0 %v3168_v23  ;;  %v513_v22 = vld [vmem:[#allocation5 + $0xec8] sm:$0xff] }
 0x1b1   :  { %3233 = vmatprep.subr.bf16.mxu1 %v3232_v27  ;;  %v545_v23 = vld [vmem:[#allocation5 + $0xfc8] sm:$0xff]  ;;  %v515_v27 = vld [vmem:[#allocation5 + $0xed8] sm:$0xff] }
 0x1b2   :  { %v3252_v42 = vpack.c.bf16 %v547_v28, %v515_v27  ;;  %v770_v27 = vld [vmem:[#allocation5 + $0x16d0] sm:$0xff] }
 0x1b3   :  { %3171 = vmatpush1.bf16.msra.mxu0 %v3170_v52 }
 0x1b4   :  { %3235 = vmatpush1.bf16.msra.mxu1 %v3234_v35  ;;  %3173 = vmatprep.subr.bf16.mxu0 %v3172_v36  ;;  %v3188_v35 = vpack.c.bf16 %v545_v23, %v513_v22  ;;  %v512_v36 = vld [vmem:[#allocation5 + $0xec0] sm:$0xff] }
 0x1b5   :  { %3237 = vmatprep.subr.bf16.mxu1 %v3236_v43  ;;  %v577_v43 = vld [vmem:[#allocation5 + $0x10c8] sm:$0xff]  ;;  %v3190_v15 = vpack.c.bf16 %v544_v39, %v512_v36  ;;  %v867_v36 = vld [vmem:[#allocation5 + $0x19d8] sm:$0xff] }
 0x1b6   :  { %v3192_v47 = vpack.c.bf16 %v609_v44, %v577_v43  ;;  %v864_v43 = vld [vmem:[#allocation5 + $0x19c0] sm:$0xff]  ;;  %v834_v44 = vld [vmem:[#allocation5 + $0x18d0] sm:$0xff] }
 0x1b7   :  { %3175 = vmatpush1.bf16.msra.mxu0 %v3174_v49  ;;  %v608_v49 = vld [vmem:[#allocation5 + $0x11c0] sm:$0xff] }
 0x1b8   :  { %3239 = vmatpush1.bf16.msra.mxu1 %v3238_v63  ;;  %3177 = vmatprep.subr.bf16.mxu0 %v3176_v51  ;;  %v578_v63 = vld [vmem:[#allocation5 + $0x10d0] sm:$0xff]  ;;  %v3194_v59 = vpack.c.bf16 %v608_v49, %v576_v48  ;;  %v931_v48 = vld [vmem:[#allocation5 + $0x1bd8] sm:$0xff] }
 0x1b9   :  { %3241 = vmatprep.subr.bf16.mxu1 %v3240_v57  ;;  %v643_v57 = vld [vmem:[#allocation5 + $0x12d8] sm:$0xff]  ;;  %v3258_v60 = vpack.c.bf16 %v610_v53, %v578_v63  ;;  %v896_v53 = vld [vmem:[#allocation5 + $0x1ac0] sm:$0xff] }
 0x1bb   :  { %3179 = vmatpush1.bf16.msra.mxu0 %v3178_v0  ;;  %v672_v0 = vld [vmem:[#allocation5 + $0x13c0] sm:$0xff] }
 0x1bc   :  { %3243 = vmatpush1.bf16.msra.mxu1 %v3242_v46  ;;  %3181 = vmatprep.subr.bf16.mxu0 %v3180_v1  ;;  %v642_v46 = vld [vmem:[#allocation5 + $0x12d0] sm:$0xff]  ;;  %v3260_v1 = vpack.c.bf16 %v675_v58, %v643_v57  ;;  %v3198_v7 = vpack.c.bf16 %v672_v0, %v640_v62  ;;  %v995_v62 = vld [vmem:[#allocation5 + $0x1dd8] sm:$0xff]  ;;  %v3214_v0 = vpack.c.bf16 %v928_v33, %v896_v53 }
 0x1bd   :  { %v1414_v19 = vpop.f32.mrb[4].mxu0  ;;  %3245 = vmatprep.subr.bf16.mxu1 %v3244_v5  ;;  %v707_v5 = vld [vmem:[#allocation5 + $0x14d8] sm:$0xff]  ;;  %v3262_v8 = vpack.c.bf16 %v674_v2, %v642_v46  ;;  %v930_v58 = vld [vmem:[#allocation5 + $0x1bd0] sm:$0xff]  ;;  %v960_v2 = vld [vmem:[#allocation5 + $0x1cc0] sm:$0xff] }
 0x1be   :  { %v3645_v24 = vsub.f32 %v3616_v31, %v1414_v19  ;;  %v1485_v25 = vpop.f32.mrb[4].mxu1  ;;  %v1416_v26 = vpop.f32.mrb[5].mxu0  ;;  %v3250_v31 = vpack.c.bf16 %v482_v21, %v450_v18  ;;  %v801_v18 = vld [vmem:[#allocation5 + $0x17c8] sm:$0xff]  ;;  %v771_v19 = vld [vmem:[#allocation5 + $0x16d8] sm:$0xff]  ;;  %v3278_v46 = vpack.c.bf16 %v930_v58, %v898_v54 }
 0x1bf   :  { %v3648_v29 = vsub.f32 %v3618_v37, %v1485_v25  ;;  %v3651_v30 = vsub.f32 %v3620_v38, %v1416_v26  ;;  %v1487_v32 = vpop.f32.mrb[5].mxu1  ;;  %3183 = vmatpush1.bf16.msra.mxu0 %v3182_v11  ;;  %v546_v37 = vld [vmem:[#allocation5 + $0xfd0] sm:$0xff]  ;;  %v579_v38 = vld [vmem:[#allocation5 + $0x10d8] sm:$0xff]  ;;  %v736_v11 = vld [vmem:[#allocation5 + $0x15c0] sm:$0xff]  ;;  %v3204_v23 = vpack.c.bf16 %v801_v18, %v769_v17 }
 0x1c0   :  { %v3654_v52 = vsub.f32 %v3622_v41, %v1487_v32  ;;  %3247 = vmatpush1.bf16.msra.mxu1 %v3246_v12  ;;  %3185 = vmatprep.subr.bf16.mxu0 %v3184_v13  ;;  %v3254_v41 = vpack.c.bf16 %v546_v37, %v514_v40  ;;  %v3256_v51 = vpack.c.bf16 %v611_v45, %v579_v38  ;;  %v706_v12 = vld [vmem:[#allocation5 + $0x14d0] sm:$0xff]  ;;  %v768_v25 = vld [vmem:[#allocation5 + $0x16c0] sm:$0xff]  ;;  %v199_v53 = vld [vmem:[#allocation5 + $0x4f8] sm:$0xff] }
 0x1c1   :  { %3249 = vmatprep.subr.bf16.mxu1 %v3248_v20  ;;  %v3264_v13 = vpack.c.bf16 %v739_v6, %v707_v5  ;;  %v803_v20 = vld [vmem:[#allocation5 + $0x17d8] sm:$0xff]  ;;  %v3202_v21 = vpack.c.bf16 %v736_v11, %v704_v10  ;;  %v3266_v22 = vpack.c.bf16 %v738_v14, %v706_v12  ;;  %v800_v26 = vld [vmem:[#allocation5 + $0x17c0] sm:$0xff]  ;;  %v802_v32 = vld [vmem:[#allocation5 + $0x17d0] sm:$0xff]  ;;  %v3218_v11 = vpack.c.bf16 %v992_v3, %v960_v2 }
 0x1c2   :  { %v3268_v28 = vpack.c.bf16 %v803_v20, %v771_v19  ;;  %v3206_v39 = vpack.c.bf16 %v800_v26, %v768_v25  ;;  %v3270_v40 = vpack.c.bf16 %v802_v32, %v770_v27  ;;  %v832_v37 = vld [vmem:[#allocation5 + $0x18c0] sm:$0xff]  ;;  %v866_v45 = vld [vmem:[#allocation5 + $0x19d0] sm:$0xff]  ;;  %v1059_v10 = vld [vmem:[#allocation5 + $0x1fd8] sm:$0xff] }
 0x1c3   :  { %3187 = vmatpush1.bf16.msra.mxu0 %v3186_v34  ;;  %v833_v34 = vld [vmem:[#allocation5 + $0x18c8] sm:$0xff]  ;;  %v3210_v49 = vpack.c.bf16 %v864_v43, %v832_v37  ;;  %v3274_v63 = vpack.c.bf16 %v866_v45, %v834_v44  ;;  %v994_v6 = vld [vmem:[#allocation5 + $0x1dd0] sm:$0xff]  ;;  %v1024_v14 = vld [vmem:[#allocation5 + $0x1ec0] sm:$0xff] }
 0x1c4   :  { %3251 = vmatpush1.bf16.msra.mxu1 %v3250_v31  ;;  %3189 = vmatprep.subr.bf16.mxu0 %v3188_v35  ;;  %v865_v31 = vld [vmem:[#allocation5 + $0x19c8] sm:$0xff]  ;;  %v835_v35 = vld [vmem:[#allocation5 + $0x18d8] sm:$0xff]  ;;  %v3282_v12 = vpack.c.bf16 %v994_v6, %v962_v4  ;;  %v1056_v17 = vld [vmem:[#allocation5 + $0x1fc0] sm:$0xff] }
 0x1c5   :  { %3253 = vmatprep.subr.bf16.mxu1 %v3252_v42  ;;  %v3208_v42 = vpack.c.bf16 %v865_v31, %v833_v34  ;;  %v3272_v38 = vpack.c.bf16 %v867_v36, %v835_v35  ;;  %v1026_v18 = vld [vmem:[#allocation5 + $0x1ed0] sm:$0xff]  ;;  %v103_v25 = vld [vmem:[#allocation5 + $0x1f8] sm:$0xff]  ;;  %v3222_v26 = vpack.c.bf16 %v1056_v17, %v1024_v14  ;;  %v68_v32 = vld [vmem:[#allocation5 + $0xe0] sm:$0xff] }
 0x1c6   :  { %v1058_v20 = vld [vmem:[#allocation5 + $0x1fd0] sm:$0xff]  ;;  %v100_v34 = vld [vmem:[#allocation5 + $0x1e0] sm:$0xff]  ;;  %v167_v37 = vld [vmem:[#allocation5 + $0x3f8] sm:$0xff] }
 0x1c7   :  { %3191 = vmatpush1.bf16.msra.mxu0 %v3190_v15  ;;  %v897_v15 = vld [vmem:[#allocation5 + $0x1ac8] sm:$0xff]  ;;  %v3286_v27 = vpack.c.bf16 %v1058_v20, %v1026_v18  ;;  %v70_v31 = vld [vmem:[#allocation5 + $0xf0] sm:$0xff]  ;;  %v3290_v43 = vpack.c.bf16 %v100_v34, %v68_v32  ;;  %v132_v45 = vld [vmem:[#allocation5 + $0x2e0] sm:$0xff] }
 0x1c8   :  { %3255 = vmatpush1.bf16.msra.mxu1 %v3254_v41  ;;  %3193 = vmatprep.subr.bf16.mxu0 %v3192_v47  ;;  %v929_v41 = vld [vmem:[#allocation5 + $0x1bc8] sm:$0xff]  ;;  %v899_v47 = vld [vmem:[#allocation5 + $0x1ad8] sm:$0xff]  ;;  %v102_v36 = vld [vmem:[#allocation5 + $0x1f0] sm:$0xff] }
 0x1c9   :  { %3257 = vmatprep.subr.bf16.mxu1 %v3256_v51  ;;  %v3212_v51 = vpack.c.bf16 %v929_v41, %v897_v15  ;;  %v3276_v57 = vpack.c.bf16 %v931_v48, %v899_v47  ;;  %v3354_v44 = vpack.c.bf16 %v102_v36, %v70_v31  ;;  %v164_v15 = vld [vmem:[#allocation5 + $0x3e0] sm:$0xff]  ;;  %v134_v41 = vld [vmem:[#allocation5 + $0x2f0] sm:$0xff]  ;;  %v231_v33 = vld [vmem:[#allocation5 + $0x5f8] sm:$0xff] }
 0x1ca   :  { %v166_v48 = vld [vmem:[#allocation5 + $0x3f0] sm:$0xff]  ;;  %v3294_v54 = vpack.c.bf16 %v164_v15, %v132_v45  ;;  %v3466_v2 = vld [vmem:[#allocation2 + $0x8] sm:$0xff]  ;;  %v357_v14 = vld [vmem:[#allocation5 + $0x9e8] sm:$0xff] }
 0x1cb   :  { %3195 = vmatpush1.bf16.msra.mxu0 %v3194_v59  ;;  %v961_v59 = vld [vmem:[#allocation5 + $0x1cc8] sm:$0xff]  ;;  %v263_v3 = vld [vmem:[#allocation5 + $0x6f8] sm:$0xff] }
 0x1cc   :  { %3259 = vmatpush1.bf16.msra.mxu1 %v3258_v60  ;;  %3197 = vmatprep.subr.bf16.mxu0 %v3196_v61  ;;  %v993_v60 = vld [vmem:[#allocation5 + $0x1dc8] sm:$0xff]  ;;  %v963_v61 = vld [vmem:[#allocation5 + $0x1cd8] sm:$0xff] }
 0x1cd   :  { %3261 = vmatprep.subr.bf16.mxu1 %v3260_v1  ;;  %v3216_v1 = vpack.c.bf16 %v993_v60, %v961_v59  ;;  %v3280_v5 = vpack.c.bf16 %v995_v62, %v963_v61  ;;  %v196_v59 = vld [vmem:[#allocation5 + $0x4e0] sm:$0xff]  ;;  %v198_v61 = vld [vmem:[#allocation5 + $0x4f0] sm:$0xff]  ;;  %v3360_v62 = vpack.c.bf16 %v231_v33, %v199_v53  ;;  %v295_v4 = vld [vmem:[#allocation5 + $0x7f8] sm:$0xff] }
 0x1ce   :  { %v228_v60 = vld [vmem:[#allocation5 + $0x5e0] sm:$0xff]  ;;  %v327_v17 = vld [vmem:[#allocation5 + $0x8f8] sm:$0xff]  ;;  %v421_v32 = vld [vmem:[#allocation5 + $0xbe8] sm:$0xff] }
 0x1cf   :  { %3199 = vmatpush1.bf16.msra.mxu0 %v3198_v7  ;;  %v1025_v7 = vld [vmem:[#allocation5 + $0x1ec8] sm:$0xff]  ;;  %v359_v18 = vld [vmem:[#allocation5 + $0x9f8] sm:$0xff]  ;;  %v484_v53 = vld [vmem:[#allocation5 + $0xde0] sm:$0xff] }
 0x1d0   :  { %3263 = vmatpush1.bf16.msra.mxu1 %v3262_v8  ;;  %3201 = vmatprep.subr.bf16.mxu0 %v3200_v9  ;;  %v1057_v8 = vld [vmem:[#allocation5 + $0x1fc8] sm:$0xff]  ;;  %v1027_v9 = vld [vmem:[#allocation5 + $0x1ed8] sm:$0xff]  ;;  %v454_v33 = vld [vmem:[#allocation5 + $0xcf0] sm:$0xff] }
 0x1d1   :  { %3265 = vmatprep.subr.bf16.mxu1 %v3264_v13  ;;  %v3220_v13 = vpack.c.bf16 %v1057_v8, %v1025_v7  ;;  %v3284_v19 = vpack.c.bf16 %v1059_v10, %v1027_v9  ;;  %v260_v8 = vld [vmem:[#allocation5 + $0x6e0] sm:$0xff]  ;;  %v262_v10 = vld [vmem:[#allocation5 + $0x6f0] sm:$0xff]  ;;  %v391_v34 = vld [vmem:[#allocation5 + $0xaf8] sm:$0xff] }
 0x1d2   :  { %v292_v9 = vld [vmem:[#allocation5 + $0x7e0] sm:$0xff]  ;;  %v423_v31 = vld [vmem:[#allocation5 + $0xbf8] sm:$0xff]  ;;  %v485_v45 = vld [vmem:[#allocation5 + $0xde8] sm:$0xff] }
 0x1d3   :  { %3203 = vmatpush1.bf16.msra.mxu0 %v3202_v21  ;;  %v69_v21 = vld [vmem:[#allocation5 + $0xe8] sm:$0xff]  ;;  %v455_v15 = vld [vmem:[#allocation5 + $0xcf8] sm:$0xff] }
 0x1d4   :  { %3267 = vmatpush1.bf16.msra.mxu1 %v3266_v22  ;;  %3205 = vmatprep.subr.bf16.mxu0 %v3204_v23  ;;  %v101_v22 = vld [vmem:[#allocation5 + $0x1e8] sm:$0xff]  ;;  %v71_v23 = vld [vmem:[#allocation5 + $0xf8] sm:$0xff] }
 0x1d5   :  { %3269 = vmatprep.subr.bf16.mxu1 %v3268_v28  ;;  %v3288_v28 = vpack.c.bf16 %v101_v22, %v69_v21  ;;  %v3352_v35 = vpack.c.bf16 %v103_v25, %v71_v23  ;;  %v324_v22 = vld [vmem:[#allocation5 + $0x8e0] sm:$0xff]  ;;  %v326_v25 = vld [vmem:[#allocation5 + $0x8f0] sm:$0xff] }
 0x1d6   :  { %v356_v23 = vld [vmem:[#allocation5 + $0x9e0] sm:$0xff] }
 0x1d7   :  { %3207 = vmatpush1.bf16.msra.mxu0 %v3206_v39  ;;  %v133_v39 = vld [vmem:[#allocation5 + $0x2e8] sm:$0xff] }
 0x1d8   :  { %3271 = vmatpush1.bf16.msra.mxu1 %v3270_v40  ;;  %3209 = vmatprep.subr.bf16.mxu0 %v3208_v42  ;;  %v165_v40 = vld [vmem:[#allocation5 + $0x3e8] sm:$0xff]  ;;  %v135_v42 = vld [vmem:[#allocation5 + $0x2f8] sm:$0xff] }
 0x1d9   :  { %3273 = vmatprep.subr.bf16.mxu1 %v3272_v38  ;;  %v3292_v38 = vpack.c.bf16 %v165_v40, %v133_v39  ;;  %v3356_v47 = vpack.c.bf16 %v167_v37, %v135_v42  ;;  %v388_v40 = vld [vmem:[#allocation5 + $0xae0] sm:$0xff]  ;;  %v390_v37 = vld [vmem:[#allocation5 + $0xaf0] sm:$0xff] }
 0x1da   :  { %v420_v42 = vld [vmem:[#allocation5 + $0xbe0] sm:$0xff] }
 0x1db   :  { %3211 = vmatpush1.bf16.msra.mxu0 %v3210_v49  ;;  %v197_v49 = vld [vmem:[#allocation5 + $0x4e8] sm:$0xff] }
 0x1dc   :  { %3275 = vmatpush1.bf16.msra.mxu1 %v3274_v63  ;;  %3213 = vmatprep.subr.bf16.mxu0 %v3212_v51  ;;  %v229_v63 = vld [vmem:[#allocation5 + $0x5e8] sm:$0xff]  ;;  %v3656_v51 = vld [vmem:[#allocation2] sm:$0xff] }
 0x1dd   :  { %3277 = vmatprep.subr.bf16.mxu1 %v3276_v57  ;;  %v3358_v57 = vpack.c.bf16 %v166_v48, %v134_v41  ;;  %v3296_v58 = vpack.c.bf16 %v229_v63, %v197_v49  ;;  %v487_v41 = vld [vmem:[#allocation5 + $0xdf8] sm:$0xff]  ;;  %v452_v63 = vld [vmem:[#allocation5 + $0xce0] sm:$0xff] }
 0x1df   :  { %3215 = vmatpush1.bf16.msra.mxu0 %v3214_v0  ;;  %v230_v0 = vld [vmem:[#allocation5 + $0x5f0] sm:$0xff] }
 0x1e0   :  { %3279 = vmatpush1.bf16.msra.mxu1 %v3278_v46  ;;  %3217 = vmatprep.subr.bf16.mxu0 %v3216_v1  ;;  %v261_v46 = vld [vmem:[#allocation5 + $0x6e8] sm:$0xff]  ;;  %v3362_v6 = vpack.c.bf16 %v230_v0, %v198_v61 }
 0x1e1   :  { %3281 = vmatprep.subr.bf16.mxu1 %v3280_v5  ;;  %v293_v1 = vld [vmem:[#allocation5 + $0x7e8] sm:$0xff]  ;;  %v3298_v5 = vpack.c.bf16 %v228_v60, %v196_v59 }
 0x1e2   :  { %v3300_v7 = vpack.c.bf16 %v293_v1, %v261_v46  ;;  %v517_v59 = vld [vmem:[#allocation5 + $0xee8] sm:$0xff]  ;;  %v519_v46 = vld [vmem:[#allocation5 + $0xef8] sm:$0xff] }
 0x1e3   :  { %3219 = vmatpush1.bf16.msra.mxu0 %v3218_v11  ;;  %v3364_v11 = vpack.c.bf16 %v295_v4, %v263_v3  ;;  %v549_v60 = vld [vmem:[#allocation5 + $0xfe8] sm:$0xff]  ;;  %v551_v1 = vld [vmem:[#allocation5 + $0xff8] sm:$0xff] }
 0x1e4   :  { %3283 = vmatpush1.bf16.msra.mxu1 %v3282_v12  ;;  %3221 = vmatprep.subr.bf16.mxu0 %v3220_v13  ;;  %v294_v12 = vld [vmem:[#allocation5 + $0x7f0] sm:$0xff]  ;;  %v325_v13 = vld [vmem:[#allocation5 + $0x8e8] sm:$0xff] }
 0x1e5   :  { %3285 = vmatprep.subr.bf16.mxu1 %v3284_v19  ;;  %v3302_v19 = vpack.c.bf16 %v292_v9, %v260_v8  ;;  %v3366_v20 = vpack.c.bf16 %v294_v12, %v262_v10  ;;  %v3304_v21 = vpack.c.bf16 %v357_v14, %v325_v13  ;;  %v516_v8 = vld [vmem:[#allocation5 + $0xee0] sm:$0xff]  ;;  %v518_v10 = vld [vmem:[#allocation5 + $0xef0] sm:$0xff]  ;;  %v581_v12 = vld [vmem:[#allocation5 + $0x10e8] sm:$0xff] }
 0x1e6   :  { %v548_v9 = vld [vmem:[#allocation5 + $0xfe0] sm:$0xff]  ;;  %v613_v13 = vld [vmem:[#allocation5 + $0x11e8] sm:$0xff]  ;;  %v615_v14 = vld [vmem:[#allocation5 + $0x11f8] sm:$0xff] }
 0x1e7   :  { %3223 = vmatpush1.bf16.msra.mxu0 %v3222_v26  ;;  %v3368_v26 = vpack.c.bf16 %v359_v18, %v327_v17  ;;  %v3318_v17 = vpack.c.bf16 %v548_v9, %v516_v8  ;;  %v3320_v18 = vpack.c.bf16 %v613_v13, %v581_v12  ;;  %v839_v8 = vld [vmem:[#allocation5 + $0x18f8] sm:$0xff]  ;;  %v836_v12 = vld [vmem:[#allocation5 + $0x18e0] sm:$0xff] }
 0x1e8   :  { %3287 = vmatpush1.bf16.msra.mxu1 %v3286_v27  ;;  %3289 = vmatprep.subr.bf16.mxu0 %v3288_v28  ;;  %v358_v27 = vld [vmem:[#allocation5 + $0x9f0] sm:$0xff]  ;;  %v389_v28 = vld [vmem:[#allocation5 + $0xae8] sm:$0xff]  ;;  %v871_v9 = vld [vmem:[#allocation5 + $0x19f8] sm:$0xff] }
 0x1e9   :  { %3353 = vmatprep.subr.bf16.mxu1 %v3352_v35  ;;  %v3306_v35 = vpack.c.bf16 %v356_v23, %v324_v22  ;;  %v3370_v36 = vpack.c.bf16 %v358_v27, %v326_v25  ;;  %v3308_v39 = vpack.c.bf16 %v421_v32, %v389_v28  ;;  %v614_v23 = vld [vmem:[#allocation5 + $0x11f0] sm:$0xff]  ;;  %v645_v25 = vld [vmem:[#allocation5 + $0x12e8] sm:$0xff]  ;;  %v647_v27 = vld [vmem:[#allocation5 + $0x12f8] sm:$0xff] }
 0x1ea   :  { %1981 = vmatmul.mubr.f32.vlgmr.msra.gmra.mrb[8].mxu0 %v3656_v51  ;;  %v679_v28 = vld [vmem:[#allocation5 + $0x13f8] sm:$0xff]  ;;  %v868_v13 = vld [vmem:[#allocation5 + $0x19e0] sm:$0xff] }
 0x1eb   :  { %2052 = vmatmul.mubr.f32.vlgmr.msra.gmra.mrb[8].mxu1 %v3656_v51  ;;  %3291 = vmatpush1.bf16.msra.mxu0 %v3290_v43  ;;  %v3372_v43 = vpack.c.bf16 %v423_v31, %v391_v34 }
 0x1ec   :  { %3355 = vmatpush1.bf16.msra.mxu1 %v3354_v44  ;;  %3293 = vmatprep.subr.bf16.mxu0 %v3292_v38  ;;  %v422_v44 = vld [vmem:[#allocation5 + $0xbf0] sm:$0xff]  ;;  %v453_v38 = vld [vmem:[#allocation5 + $0xce8] sm:$0xff] }
 0x1ed   :  { %3357 = vmatprep.subr.bf16.mxu1 %v3356_v47  ;;  %2122 = vmatprep.mubr.f32.mxu0 %v3466_v2  ;;  %v3310_v47 = vpack.c.bf16 %v420_v42, %v388_v40  ;;  %v3374_v48 = vpack.c.bf16 %v422_v44, %v390_v37  ;;  %v3312_v49 = vpack.c.bf16 %v485_v45, %v453_v38  ;;  %v678_v42 = vld [vmem:[#allocation5 + $0x13f0] sm:$0xff]  ;;  %v709_v37 = vld [vmem:[#allocation5 + $0x14e8] sm:$0xff]  ;;  %v711_v44 = vld [vmem:[#allocation5 + $0x14f8] sm:$0xff] }
 0x1ee   :  { %2193 = vmatprep.mubr.f32.mxu1 %v3466_v2  ;;  %v3388_v40 = vpack.c.bf16 %v679_v28, %v647_v27  ;;  %v743_v38 = vld [vmem:[#allocation5 + $0x15f8] sm:$0xff]  ;;  %v902_v27 = vld [vmem:[#allocation5 + $0x1af0] sm:$0xff] }
 0x1ef   :  { %3295 = vmatpush1.bf16.msra.mxu0 %v3294_v54 }
 0x1f0   :  { %3359 = vmatpush1.bf16.msra.mxu1 %v3358_v57  ;;  %3297 = vmatprep.subr.bf16.mxu0 %v3296_v58  ;;  %v3376_v57 = vpack.c.bf16 %v487_v41, %v455_v15  ;;  %v486_v58 = vld [vmem:[#allocation5 + $0xdf0] sm:$0xff] }
 0x1f1   :  { %3361 = vmatprep.subr.bf16.mxu1 %v3360_v62 }
 0x1f3   :  { %3299 = vmatpush1.bf16.msra.mxu0 %v3298_v5  ;;  %v3314_v5 = vpack.c.bf16 %v484_v53, %v452_v63  ;;  %v3392_v63 = vpack.c.bf16 %v743_v38, %v711_v44  ;;  %v742_v53 = vld [vmem:[#allocation5 + $0x15f0] sm:$0xff] }
 0x1f4   :  { %3363 = vmatpush1.bf16.msra.mxu1 %v3362_v6  ;;  %3301 = vmatprep.subr.bf16.mxu0 %v3300_v7  ;;  %v3316_v7 = vpack.c.bf16 %v549_v60, %v517_v59  ;;  %v966_v44 = vld [vmem:[#allocation5 + $0x1cf0] sm:$0xff] }
 0x1f5   :  { %3365 = vmatprep.subr.bf16.mxu1 %v3364_v11  ;;  %v3380_v11 = vpack.c.bf16 %v551_v1, %v519_v46  ;;  %v804_v46 = vld [vmem:[#allocation5 + $0x17e0] sm:$0xff]  ;;  %v774_v1 = vld [vmem:[#allocation5 + $0x16f0] sm:$0xff] }
 0x1f7   :  { %3303 = vmatpush1.bf16.msra.mxu0 %v3302_v19  ;;  %v580_v19 = vld [vmem:[#allocation5 + $0x10e0] sm:$0xff] }
 0x1f8   :  { %3367 = vmatpush1.bf16.msra.mxu1 %v3366_v20  ;;  %3305 = vmatprep.subr.bf16.mxu0 %v3304_v21  ;;  %v612_v20 = vld [vmem:[#allocation5 + $0x11e0] sm:$0xff]  ;;  %v582_v21 = vld [vmem:[#allocation5 + $0x10f0] sm:$0xff] }
 0x1f9   :  { %3369 = vmatprep.subr.bf16.mxu1 %v3368_v26  ;;  %v677_v26 = vld [vmem:[#allocation5 + $0x13e8] sm:$0xff]  ;;  %v3322_v32 = vpack.c.bf16 %v612_v20, %v580_v19  ;;  %v3386_v34 = vpack.c.bf16 %v614_v23, %v582_v21  ;;  %v903_v19 = vld [vmem:[#allocation5 + $0x1af8] sm:$0xff]  ;;  %v3338_v21 = vpack.c.bf16 %v868_v13, %v836_v12 }
 0x1fa   :  { %v3324_v31 = vpack.c.bf16 %v677_v26, %v645_v25  ;;  %v935_v20 = vld [vmem:[#allocation5 + $0x1bf8] sm:$0xff]  ;;  %v900_v25 = vld [vmem:[#allocation5 + $0x1ae0] sm:$0xff] }
 0x1fb   :  { %3307 = vmatpush1.bf16.msra.mxu0 %v3306_v35  ;;  %v644_v35 = vld [vmem:[#allocation5 + $0x12e0] sm:$0xff]  ;;  %v3404_v28 = vpack.c.bf16 %v935_v20, %v903_v19 }
 0x1fc   :  { %3371 = vmatpush1.bf16.msra.mxu1 %v3370_v36  ;;  %3309 = vmatprep.subr.bf16.mxu0 %v3308_v39  ;;  %v676_v36 = vld [vmem:[#allocation5 + $0x13e0] sm:$0xff]  ;;  %v646_v39 = vld [vmem:[#allocation5 + $0x12f0] sm:$0xff] }
 0x1fd   :  { %v1556_v54 = vpop.f32.mrb[6].mxu0  ;;  %3373 = vmatprep.subr.bf16.mxu1 %v3372_v43  ;;  %v741_v43 = vld [vmem:[#allocation5 + $0x15e8] sm:$0xff]  ;;  %v3326_v45 = vpack.c.bf16 %v676_v36, %v644_v35  ;;  %v3390_v15 = vpack.c.bf16 %v678_v42, %v646_v39  ;;  %v932_v26 = vld [vmem:[#allocation5 + $0x1be0] sm:$0xff]  ;;  %v967_v35 = vld [vmem:[#allocation5 + $0x1cf8] sm:$0xff] }
 0x1fe   :  { %v3661_v61 = vsub.f32 %v3632_v50, %v1556_v54  ;;  %v1627_v62 = vpop.f32.mrb[6].mxu1  ;;  %v1558_v0 = vpop.f32.mrb[7].mxu0  ;;  %v3378_v50 = vpack.c.bf16 %v486_v58, %v454_v33  ;;  %v3328_v41 = vpack.c.bf16 %v741_v43, %v709_v37  ;;  %v773_v33 = vld [vmem:[#allocation5 + $0x16e8] sm:$0xff]  ;;  %v807_v58 = vld [vmem:[#allocation5 + $0x17f8] sm:$0xff]  ;;  %v3342_v39 = vpack.c.bf16 %v932_v26, %v900_v25  ;;  %v964_v37 = vld [vmem:[#allocation5 + $0x1ce0] sm:$0xff] }
 0x1ff   :  { %v3664_v2 = vsub.f32 %v3634_v55, %v1627_v62  ;;  %v3667_v3 = vsub.f32 %v3636_v56, %v1558_v0  ;;  %v1629_v4 = vpop.f32.mrb[7].mxu1  ;;  %3311 = vmatpush1.bf16.msra.mxu0 %v3310_v47  ;;  %v550_v55 = vld [vmem:[#allocation5 + $0xff0] sm:$0xff]  ;;  %v583_v56 = vld [vmem:[#allocation5 + $0x10f8] sm:$0xff]  ;;  %v708_v47 = vld [vmem:[#allocation5 + $0x14e0] sm:$0xff] }
 0x200   :  { %v3670_v6 = vsub.f32 %v3638_v16, %v1629_v4  ;;  %3375 = vmatpush1.bf16.msra.mxu1 %v3374_v48  ;;  %3313 = vmatprep.subr.bf16.mxu0 %v3312_v49  ;;  %v3382_v16 = vpack.c.bf16 %v550_v55, %v518_v10  ;;  %v3384_v22 = vpack.c.bf16 %v615_v14, %v583_v56  ;;  %v740_v48 = vld [vmem:[#allocation5 + $0x15e0] sm:$0xff]  ;;  %v710_v49 = vld [vmem:[#allocation5 + $0x14f0] sm:$0xff]  ;;  %v805_v54 = vld [vmem:[#allocation5 + $0x17e8] sm:$0xff] }
 0x201   :  { %3377 = vmatprep.subr.bf16.mxu1 %v3376_v57  ;;  %v775_v57 = vld [vmem:[#allocation5 + $0x16f8] sm:$0xff]  ;;  %v3330_v59 = vpack.c.bf16 %v740_v48, %v708_v47  ;;  %v3394_v60 = vpack.c.bf16 %v742_v53, %v710_v49  ;;  %v3332_v62 = vpack.c.bf16 %v805_v54, %v773_v33  ;;  %v772_v0 = vld [vmem:[#allocation5 + $0x16e0] sm:$0xff]  ;;  %v838_v56 = vld [vmem:[#allocation5 + $0x18f0] sm:$0xff]  ;;  %v3400_v14 = vpack.c.bf16 %v871_v9, %v839_v8 }
 0x202   :  { %v3396_v4 = vpack.c.bf16 %v807_v58, %v775_v57  ;;  %v3334_v10 = vpack.c.bf16 %v804_v46, %v772_v0  ;;  %v999_v36 = vld [vmem:[#allocation5 + $0x1df8] sm:$0xff]  ;;  %v996_v43 = vld [vmem:[#allocation5 + $0x1de0] sm:$0xff]  ;;  %v1030_v58 = vld [vmem:[#allocation5 + $0x1ef0] sm:$0xff]  ;;  %v2216_v46 = vmul.f32 %v3645_v24, %v3645_v24  ;;  %v2219_v24 = vmul.f32 %v3654_v52, %v3654_v52 }
 0x203   :  { %3315 = vmatpush1.bf16.msra.mxu0 %v3314_v5  ;;  %v806_v5 = vld [vmem:[#allocation5 + $0x17f0] sm:$0xff]  ;;  %v3408_v38 = vpack.c.bf16 %v999_v36, %v967_v35  ;;  %v1031_v47 = vld [vmem:[#allocation5 + $0x1ef8] sm:$0xff]  ;;  %v3346_v49 = vpack.c.bf16 %v996_v43, %v964_v37  ;;  %v1028_v33 = vld [vmem:[#allocation5 + $0x1ee0] sm:$0xff] }
 0x204   :  { %3379 = vmatpush1.bf16.msra.mxu1 %v3378_v50  ;;  %3317 = vmatprep.subr.bf16.mxu0 %v3316_v7  ;;  %v837_v50 = vld [vmem:[#allocation5 + $0x18e8] sm:$0xff]  ;;  %v1063_v48 = vld [vmem:[#allocation5 + $0x1ff8] sm:$0xff]  ;;  %v1060_v54 = vld [vmem:[#allocation5 + $0x1fe0] sm:$0xff] }
 0x205   :  { %3381 = vmatprep.subr.bf16.mxu1 %v3380_v11  ;;  %v869_v7 = vld [vmem:[#allocation5 + $0x19e8] sm:$0xff]  ;;  %v3398_v11 = vpack.c.bf16 %v806_v5, %v774_v1  ;;  %v3412_v57 = vpack.c.bf16 %v1063_v48, %v1031_v47 }
 0x206   :  { %v3336_v55 = vpack.c.bf16 %v869_v7, %v837_v50  ;;  %v2218_v50 = vmul.f32 %v3648_v29, %v3648_v29  ;;  %v2217_v7 = vmul.f32 %v3651_v30, %v3651_v30 }
 0x207   :  { %3319 = vmatpush1.bf16.msra.mxu0 %v3318_v17  ;;  %v870_v17 = vld [vmem:[#allocation5 + $0x19f0] sm:$0xff] }
 0x208   :  { %3383 = vmatpush1.bf16.msra.mxu1 %v3382_v16  ;;  %3321 = vmatprep.subr.bf16.mxu0 %v3320_v18  ;;  %v901_v16 = vld [vmem:[#allocation5 + $0x1ae8] sm:$0xff] }
 0x209   :  { %3385 = vmatprep.subr.bf16.mxu1 %v3384_v22  ;;  %v933_v18 = vld [vmem:[#allocation5 + $0x1be8] sm:$0xff]  ;;  %v3402_v22 = vpack.c.bf16 %v870_v17, %v838_v56 }
 0x20a   :  { %v3340_v23 = vpack.c.bf16 %v933_v18, %v901_v16 }
 0x20b   :  { %3323 = vmatpush1.bf16.msra.mxu0 %v3322_v32  ;;  %v934_v32 = vld [vmem:[#allocation5 + $0x1bf0] sm:$0xff] }
 0x20c   :  { %3387 = vmatpush1.bf16.msra.mxu1 %v3386_v34  ;;  %3325 = vmatprep.subr.bf16.mxu0 %v3324_v31  ;;  %v965_v34 = vld [vmem:[#allocation5 + $0x1ce8] sm:$0xff] }
 0x20d   :  { %3389 = vmatprep.subr.bf16.mxu1 %v3388_v40  ;;  %v997_v31 = vld [vmem:[#allocation5 + $0x1de8] sm:$0xff]  ;;  %v3406_v40 = vpack.c.bf16 %v934_v32, %v902_v27 }
 0x20e   :  { %v3344_v42 = vpack.c.bf16 %v997_v31, %v965_v34 }
 0x20f   :  { %3327 = vmatpush1.bf16.msra.mxu0 %v3326_v45  ;;  %v998_v45 = vld [vmem:[#allocation5 + $0x1df0] sm:$0xff] }
 0x210   :  { %3391 = vmatpush1.bf16.msra.mxu1 %v3390_v15  ;;  %3329 = vmatprep.subr.bf16.mxu0 %v3328_v41  ;;  %v1029_v15 = vld [vmem:[#allocation5 + $0x1ee8] sm:$0xff] }
 0x211   :  { %3393 = vmatprep.subr.bf16.mxu1 %v3392_v63  ;;  %v1061_v41 = vld [vmem:[#allocation5 + $0x1fe8] sm:$0xff]  ;;  %v3410_v63 = vpack.c.bf16 %v998_v45, %v966_v44 }
 0x212   :  { %v3348_v53 = vpack.c.bf16 %v1061_v41, %v1029_v15 }
 0x213   :  { %3331 = vmatpush1.bf16.msra.mxu0 %v3330_v59  ;;  %v1062_v59 = vld [vmem:[#allocation5 + $0x1ff0] sm:$0xff] }
 0x214   :  { %3395 = vmatpush1.bf16.msra.mxu1 %v3394_v60  ;;  %3333 = vmatprep.subr.bf16.mxu0 %v3332_v62  ;;  %v3350_v60 = vpack.c.bf16 %v1060_v54, %v1028_v33  ;;  %v3414_v62 = vpack.c.bf16 %v1062_v59, %v1030_v58 }
 0x215   :  { %3397 = vmatprep.subr.bf16.mxu1 %v3396_v4 }
 0x217   :  { %3335 = vmatpush1.bf16.msra.mxu0 %v3334_v10 }
 0x218   :  { %3399 = vmatpush1.bf16.msra.mxu1 %v3398_v11  ;;  %3337 = vmatprep.subr.bf16.mxu0 %v3336_v55 }
 0x219   :  { %3401 = vmatprep.subr.bf16.mxu1 %v3400_v14 }
 0x21b   :  { %3339 = vmatpush1.bf16.msra.mxu0 %v3338_v21 }
 0x21c   :  { %3403 = vmatpush1.bf16.msra.mxu1 %v3402_v22  ;;  %3341 = vmatprep.subr.bf16.mxu0 %v3340_v23 }
 0x21d   :  { %3405 = vmatprep.subr.bf16.mxu1 %v3404_v28 }
 0x21f   :  { %3343 = vmatpush1.bf16.msra.mxu0 %v3342_v39 }
 0x220   :  { %3407 = vmatpush1.bf16.msra.mxu1 %v3406_v40  ;;  %3345 = vmatprep.subr.bf16.mxu0 %v3344_v42 }
 0x221   :  { %3409 = vmatprep.subr.bf16.mxu1 %v3408_v38 }
 0x223   :  { %3347 = vmatpush1.bf16.msra.mxu0 %v3346_v49 }
 0x224   :  { %3411 = vmatpush1.bf16.msra.mxu1 %v3410_v63  ;;  %3349 = vmatprep.subr.bf16.mxu0 %v3348_v53 }
 0x225   :  { %3413 = vmatprep.subr.bf16.mxu1 %v3412_v57 }
 0x227   :  { %3351 = vmatpush1.bf16.msra.mxu0 %v3350_v60 }
 0x228   :  { %3415 = vmatpush1.bf16.msra.mxu1 %v3414_v62 }
 0x22a   :  { %2123 = vmatmul.mubr.f32.vlgmr.msra.gmra.mrb[10].mxu0 %v3656_v51 }
 0x22b   :  { %2194 = vmatmul.mubr.f32.vlgmr.msra.gmra.mrb[10].mxu1 %v3656_v51 }
 0x2bd   :  { %v1982_v0 = vpop.f32.mrb[8].mxu0 }
 0x2be   :  { %v2224_v1 = vmul.f32 %v1982_v0, %v1982_v0  ;;  %v2053_v4 = vpop.f32.mrb[8].mxu1  ;;  %v1984_v5 = vpop.f32.mrb[9].mxu0 }
 0x2bf   :  { %v2226_v8 = vmul.f32 %v2053_v4, %v2053_v4  ;;  %v2225_v9 = vmul.f32 %v1984_v5, %v1984_v5  ;;  %v2055_v10 = vpop.f32.mrb[9].mxu1 }
 0x2c0   :  { %v2232_v11 = vadd.f32 %v2224_v1, %v2216_v46  ;;  %v2227_v51 = vmul.f32 %v2055_v10, %v2055_v10  ;;  %v2220_v10 = vmul.f32 %v3661_v61, %v3661_v61  ;;  %v2223_v61 = vmul.f32 %v3670_v6, %v3670_v6 }
 0x2c1   :  { %v2234_v55 = vadd.f32 %v2226_v8, %v2218_v50  ;;  %v2233_v12 = vadd.f32 %v2225_v9, %v2217_v7 }
 0x2c2   :  { %3429 = vrsqrt.f32 %v2232_v11  ;;  %v2235_v13 = vadd.f32 %v2227_v51, %v2219_v24  ;;  %vm2242_vm0 = vcmp.eq.f32.partialorder %v2232_v11, inf  ;;  %vm2244_vm1 = vcmp.eq.f32.partialorder %v2232_v11, 0.0 }
 0x2c3   :  { %3431 = vrsqrt.f32 %v2234_v55  ;;  %v2245_v30 = vand.u32 2147483648, %v2232_v11  ;;  %vm2256_vm2 = vcmp.eq.f32.partialorder %v2234_v55, inf  ;;  %v2259_v19 = vand.u32 2147483648, %v2234_v55 }
 0x2c4   :  { %3433 = vrsqrt.f32 %v2233_v12  ;;  %vm2258_vm3 = vcmp.eq.f32.partialorder %v2234_v55, 0.0  ;;  %vm2249_vm4 = vcmp.eq.f32.partialorder %v2233_v12, inf  ;;  %v2252_v25 = vand.u32 2147483648, %v2233_v12 }
 0x2c5   :  { %3435 = vrsqrt.f32 %v2235_v13  ;;  %vm2251_vm5 = vcmp.eq.f32.partialorder %v2233_v12, 0.0  ;;  %vm2263_vm6 = vcmp.eq.f32.partialorder %v2235_v13, inf  ;;  %v2266_v36 = vand.u32 2147483648, %v2235_v13 }
 0x2c6   :  { %vm2265_vm7 = vcmp.eq.f32.partialorder %v2235_v13, 0.0  ;;  %v2222_v51 = vmul.f32 %v3664_v2, %v3664_v2  ;;  %v2221_v24 = vmul.f32 %v3667_v3, %v3667_v3 }
 0x2cc   :  { %v3430_v56 = vpop.eup %3429 }
 0x2cd   :  { %v3432_v29 = vpop.eup %3431  ;;  %v2241_v14 = vmul.f32 %v3430_v56, %v2232_v11 }
 0x2ce   :  { %v3434_v17 = vpop.eup %3433  ;;  %v2255_v16 = vmul.f32 %v3432_v29, %v2234_v55 }
 0x2cf   :  { %v2243_v18 = vsel %vm2242_vm0, %v2232_v11, %v2241_v14  ;;  %v2248_v20 = vmul.f32 %v3434_v17, %v2233_v12  ;;  %v3436_v26 = vpop.eup %3435 }
 0x2d0   :  { %v2246_v21 = vsel %vm2244_vm1, %v2245_v30, %v2243_v18  ;;  %v2257_v22 = vsel %vm2256_vm2, %v2234_v55, %v2255_v16  ;;  %v2262_v31 = vmul.f32 %v3436_v26, %v2235_v13 }
 0x2d1   :  { %v2296_v52 = vadd.f32 1.0, %v2246_v21  ;;  %v2260_v23 = vsel %vm2258_vm3, %v2259_v19, %v2257_v22  ;;  %v2250_v28 = vsel %vm2249_vm4, %v2233_v12, %v2248_v20  ;;  %v2299_v35 = vmul.f32 -0.5, %v2246_v21 }
 0x2d2   :  { %v2314_v27 = vadd.f32 1.0, %v2260_v23  ;;  %v2253_v32 = vsel %vm2251_vm5, %v2252_v25, %v2250_v28  ;;  %v2317_v39 = vmul.f32 -0.5, %v2260_v23  ;;  %v2264_v40 = vsel %vm2263_vm6, %v2235_v13, %v2262_v31 }
 0x2d3   :  { %3437 = vlog2.f32 %v2296_v52  ;;  %v2305_v34 = vadd.f32 1.0, %v2253_v32  ;;  %v2267_v42 = vsel %vm2265_vm7, %v2266_v36, %v2264_v40  ;;  %v2308_v37 = vmul.f32 -0.5, %v2253_v32 }
 0x2d4   :  { %3439 = vlog2.f32 %v2314_v27  ;;  %v2323_v43 = vadd.f32 1.0, %v2267_v42  ;;  %v2300_v44 = vadd.f32 1.0, %v2299_v35  ;;  %v2302_v38 = vand.u32 2147483647, %v2246_v21 }
 0x2d5   :  { %3441 = vlog2.f32 %v2305_v34  ;;  %v2318_v45 = vadd.f32 1.0, %v2317_v39  ;;  %v2320_v15 = vand.u32 2147483647, %v2260_v23  ;;  %v2309_v47 = vadd.f32 1.0, %v2308_v37 }
 0x2d6   :  { %3443 = vlog2.f32 %v2323_v43  ;;  %v2301_v49 = vmul.f32 %v2300_v44, %v2246_v21  ;;  %v2311_v63 = vand.u32 2147483647, %v2253_v32  ;;  %v2326_v53 = vmul.f32 -0.5, %v2267_v42 }
 0x2d7   :  { %vm2303_vm8 = vcmp.lt.f32.partialorder %v2302_v38, 0.0004427343  ;;  %v2319_v54 = vmul.f32 %v2318_v45, %v2260_v23  ;;  %vm2321_vm9 = vcmp.lt.f32.partialorder %v2320_v15, 0.0004427343  ;;  %v2310_v60 = vmul.f32 %v2309_v47, %v2253_v32 }
 0x2d8   :  { %vm2312_vm10 = vcmp.lt.f32.partialorder %v2311_v63, 0.0004427343  ;;  %v2327_v46 = vadd.f32 1.0, %v2326_v53  ;;  %v2329_v1 = vand.u32 2147483647, %v2267_v42 }
 0x2da   :  { %v2328_v50 = vmul.f32 %v2327_v46, %v2267_v42  ;;  %vm2330_vm11 = vcmp.lt.f32.partialorder %v2329_v1, 0.0004427343 }
 0x2dd   :  { %v3438_v41 = vpop.eup %3437 }
 0x2de   :  { %v3440_v48 = vpop.eup %3439  ;;  %v2298_v33 = vmul.f32 0.6931472, %v3438_v41 }
 0x2df   :  { %v2316_v57 = vmul.f32 0.6931472, %v3440_v48  ;;  %v3442_v58 = vpop.eup %3441 }
 0x2e0   :  { %v2304_v59 = vsel %vm2303_vm8, %v2301_v49, %v2298_v33  ;;  %v2307_v62 = vmul.f32 0.6931472, %v3442_v58  ;;  %v3444_v5 = vpop.eup %3443 }
 0x2e1   :  { %v2322_v0 = vsel %vm2321_vm9, %v2319_v54, %v2316_v57  ;;  %2368 = vst [vmem:[#allocation7] sm:$0xff] %v2304_v59  ;;  %v2325_v7 = vmul.f32 0.6931472, %v3444_v5 }
 0x2e2   :  { %2370 = vst [vmem:[#allocation7 + $0x10] sm:$0xff] %v2322_v0  ;;  %v2313_v4 = vsel %vm2312_vm10, %v2310_v60, %v2307_v62 }
 0x2e3   :  { %2369 = vst [vmem:[#allocation7 + $0x8] sm:$0xff] %v2313_v4  ;;  %v2331_v8 = vsel %vm2330_vm11, %v2328_v50, %v2325_v7 }
 0x2e4   :  { %2371 = vst [vmem:[#allocation7 + $0x18] sm:$0xff] %v2331_v8 }
 0x2fd   :  { %v2124_v9 = vpop.f32.mrb[10].mxu0 }
 0x2fe   :  { %v2228_v11 = vmul.f32 %v2124_v9, %v2124_v9  ;;  %v2195_v55 = vpop.f32.mrb[10].mxu1  ;;  %v2126_v12 = vpop.f32.mrb[11].mxu0 }
 0x2ff   :  { %v2230_v13 = vmul.f32 %v2195_v55, %v2195_v55  ;;  %v2229_v56 = vmul.f32 %v2126_v12, %v2126_v12  ;;  %v2197_v29 = vpop.f32.mrb[11].mxu1 }
 0x300   :  { %v2236_v14 = vadd.f32 %v2228_v11, %v2220_v10  ;;  %v2231_v16 = vmul.f32 %v2197_v29, %v2197_v29 }
 0x301   :  { %v2238_v17 = vadd.f32 %v2230_v13, %v2222_v51  ;;  %v2237_v30 = vadd.f32 %v2229_v56, %v2221_v24 }
 0x302   :  { %3445 = vrsqrt.f32 %v2236_v14  ;;  %v2239_v18 = vadd.f32 %v2231_v16, %v2223_v61  ;;  %vm2270_vm12 = vcmp.eq.f32.partialorder %v2236_v14, inf  ;;  %vm2272_vm13 = vcmp.eq.f32.partialorder %v2236_v14, 0.0 }
 0x303   :  { %3447 = vrsqrt.f32 %v2238_v17  ;;  %v2273_v3 = vand.u32 2147483648, %v2236_v14  ;;  %vm2284_vm14 = vcmp.eq.f32.partialorder %v2238_v17, inf  ;;  %v2287_v23 = vand.u32 2147483648, %v2238_v17 }
 0x304   :  { %3449 = vrsqrt.f32 %v2237_v30  ;;  %vm2286_vm15 = vcmp.eq.f32.partialorder %v2238_v17, 0.0  ;;  %vm2277_vm0 = vcmp.eq.f32.partialorder %v2237_v30, inf  ;;  %v2280_v32 = vand.u32 2147483648, %v2237_v30 }
 0x305   :  { %3451 = vrsqrt.f32 %v2239_v18  ;;  %vm2279_vm1 = vcmp.eq.f32.partialorder %v2237_v30, 0.0  ;;  %vm2291_vm2 = vcmp.eq.f32.partialorder %v2239_v18, inf  ;;  %v2294_v37 = vand.u32 2147483648, %v2239_v18 }
 0x306   :  { %vm2293_vm3 = vcmp.eq.f32.partialorder %v2239_v18, 0.0 }
 0x30c   :  { %v3446_v19 = vpop.eup %3445 }
 0x30d   :  { %v3448_v2 = vpop.eup %3447  ;;  %v2269_v20 = vmul.f32 %v3446_v19, %v2236_v14 }
 0x30e   :  { %v3450_v21 = vpop.eup %3449  ;;  %v2283_v22 = vmul.f32 %v3448_v2, %v2238_v17 }
 0x30f   :  { %v2271_v52 = vsel %vm2270_vm12, %v2236_v14, %v2269_v20  ;;  %v2276_v25 = vmul.f32 %v3450_v21, %v2237_v30  ;;  %v3452_v34 = vpop.eup %3451 }
 0x310   :  { %v2274_v26 = vsel %vm2272_vm13, %v2273_v3, %v2271_v52  ;;  %v2285_v27 = vsel %vm2284_vm14, %v2238_v17, %v2283_v22  ;;  %v2290_v40 = vmul.f32 %v3452_v34, %v2239_v18 }
 0x311   :  { %v2332_v6 = vadd.f32 1.0, %v2274_v26  ;;  %v2288_v28 = vsel %vm2286_vm15, %v2287_v23, %v2285_v27  ;;  %v2278_v35 = vsel %vm2277_vm0, %v2237_v30, %v2276_v25  ;;  %v2335_v42 = vmul.f32 -0.5, %v2274_v26 }
 0x312   :  { %v2350_v31 = vadd.f32 1.0, %v2288_v28  ;;  %v2281_v36 = vsel %vm2279_vm1, %v2280_v32, %v2278_v35  ;;  %v2353_v43 = vmul.f32 -0.5, %v2288_v28  ;;  %v2292_v44 = vsel %vm2291_vm2, %v2239_v18, %v2290_v40 }
 0x313   :  { %3453 = vlog2.f32 %v2332_v6  ;;  %v2341_v39 = vadd.f32 1.0, %v2281_v36  ;;  %v2295_v38 = vsel %vm2293_vm3, %v2294_v37, %v2292_v44  ;;  %v2344_v45 = vmul.f32 -0.5, %v2281_v36 }
 0x314   :  { %3455 = vlog2.f32 %v2350_v31  ;;  %v2359_v15 = vadd.f32 1.0, %v2295_v38  ;;  %v2336_v41 = vadd.f32 1.0, %v2335_v42  ;;  %v2338_v47 = vand.u32 2147483647, %v2274_v26 }
 0x315   :  { %3457 = vlog2.f32 %v2341_v39  ;;  %v2354_v48 = vadd.f32 1.0, %v2353_v43  ;;  %v2356_v49 = vand.u32 2147483647, %v2288_v28  ;;  %v2345_v53 = vadd.f32 1.0, %v2344_v45 }
 0x316   :  { %3459 = vlog2.f32 %v2359_v15  ;;  %v2337_v54 = vmul.f32 %v2336_v41, %v2274_v26  ;;  %v2347_v57 = vand.u32 2147483647, %v2281_v36  ;;  %v2362_v58 = vmul.f32 -0.5, %v2295_v38 }
 0x317   :  { %vm2339_vm4 = vcmp.lt.f32.partialorder %v2338_v47, 0.0004427343  ;;  %v2355_v60 = vmul.f32 %v2354_v48, %v2288_v28  ;;  %vm2357_vm5 = vcmp.lt.f32.partialorder %v2356_v49, 0.0004427343  ;;  %v2346_v4 = vmul.f32 %v2345_v53, %v2281_v36 }
 0x318   :  { %vm2348_vm6 = vcmp.lt.f32.partialorder %v2347_v57, 0.0004427343  ;;  %v2363_v50 = vadd.f32 1.0, %v2362_v58  ;;  %v2365_v7 = vand.u32 2147483647, %v2295_v38 }
 0x31a   :  { %v2364_v11 = vmul.f32 %v2363_v50, %v2295_v38  ;;  %vm2366_vm7 = vcmp.lt.f32.partialorder %v2365_v7, 0.0004427343 }
 0x31d   :  { %v3454_v63 = vpop.eup %3453 }
 0x31e   :  { %v3456_v33 = vpop.eup %3455  ;;  %v2334_v59 = vmul.f32 0.6931472, %v3454_v63 }
 0x31f   :  { %v2352_v62 = vmul.f32 0.6931472, %v3456_v33  ;;  %v3458_v0 = vpop.eup %3457 }
 0x320   :  { %v2340_v46 = vsel %vm2339_vm4, %v2337_v54, %v2334_v59  ;;  %v2343_v1 = vmul.f32 0.6931472, %v3458_v0  ;;  %v3460_v9 = vpop.eup %3459 }
 0x321   :  { %v2358_v5 = vsel %vm2357_vm5, %v2355_v60, %v2352_v62  ;;  %2372 = vst [vmem:[#allocation7 + $0x20] sm:$0xff] %v2340_v46  ;;  %v2361_v10 = vmul.f32 0.6931472, %v3460_v9 }
 0x322   :  { %2374 = vst [vmem:[#allocation7 + $0x30] sm:$0xff] %v2358_v5  ;;  %v2349_v8 = vsel %vm2348_vm6, %v2346_v4, %v2343_v1 }
 0x323   :  { %2373 = vst [vmem:[#allocation7 + $0x28] sm:$0xff] %v2349_v8  ;;  %v2367_v55 = vsel %vm2366_vm7, %v2364_v11, %v2361_v10 }
 0x324   :  { %2375 = vst [vmem:[#allocation7 + $0x38] sm:$0xff] %v2367_v55 }
 0x325   :  { %3522 = shalt.err (!%p3519_p6)
}
 0x326   :  { %s3523_s10 = scalar_lea.hbm %s3704_s2, 1024 }
 0x327   :  { %p3524_p7 = scmp.ne.s32.totalorder %s3704_s2, %s3523_s10  ;;  %p3527_p8 = scmp.lt.u32.totalorder %s3523_s10, %s3704_s2 }
 0x329   :  { %p3529_p9 = pnand %p3527_p8, %p3524_p7 }
 0x32b   :  { %3532 = shalt.err (!%p3529_p9)
}
 0x32c   :  { %2385 = dma.vmem_to_hbm [thread:$0]  %s2383_s6, 1024, %s3704_s2, [#allocation4]  }
 0x32d   :  { %3537 = dma.done.wait [#allocation4], 1024  }
 0x32e   :  { %3538 = vsyncadd [#allocation4], 4294966272 }
 0x32f   :  { %2389 = vsyncpa [#allocation3], 1 }
 0x330   :  { %2390 = vsyncpa [#allocation6], 1 }
 0x331   :  { %2391 = vsyncpa [#allocation4], 1 }

</bundles_post_ra>
